<compile_context>
chip_gen: v7x
topology: tpu7x:2x2x1
jax: 0.10.0
libtpu: 0.0.40
codegen_flags: <defaults>
</compile_context>

<pallas_src>
import jax
import jax.numpy as jnp
from jax.experimental import pallas as pl
from jax.experimental.pallas import tpu as pltpu

# --- model hyper-parameters --------------------------------------------------------
D_MODEL = 32           # d_model (num_features == d_model for this module)
NHEAD = 8              # nhead
HEAD_DIM = D_MODEL // NHEAD
DIM_FF = 370           # dim_feedforward
DIM_FF_PAD = 384       # zero-padded to a multiple of 128
NUM_LAYERS = 2         # constructor default num_layers
OUTPUT_SIZE = 15       # module-level output_size
LN_EPS = 1e-5

BATCH = 2
SEQ = 8
BS = BATCH * SEQ

_STACKED_PARAM_NAMES = ('w_qkv', 'b_qkv', 'wo', 'bo', 'g1', 'b1',
                        'wf1', 'bf1', 'wf2', 'bf2', 'g2', 'b2')


def _layer_norm(h, gamma, beta):
    mu = jnp.mean(h, axis=-1, keepdims=True)
    c = h - mu
    var = jnp.mean(c * c, axis=-1, keepdims=True)
    return c * jax.lax.rsqrt(var + LN_EPS) * gamma + beta


# --- fused kernel: NUM_LAYERS encoder layers + final linear, no grid ----------------
def fused_transformer_kernel(
        x_ref, mask_ref,
        wqkv_ref, bqkv_ref, wo_ref, bo_ref, g1_ref, b1_ref,
        wf1_ref, bf1_ref, wf2_ref, bf2_ref, g2_ref, b2_ref,
        wout_ref, bout_ref,
        o_ref):
    h = x_ref[...].astype(jnp.float32)              # (B*S, D)
    attn_mask = mask_ref[...]                       # (B*S, B*S) block-diagonal additive

    for l in range(NUM_LAYERS):                     # static unroll over layers
        # ---- fused Q/K/V projection (attention scale pre-folded into Wq/bq) --------
        qkv = (jnp.dot(h, wqkv_ref[l], preferred_element_type=jnp.float32)
               + bqkv_ref[l])                       # (B*S, 3D)
        wo = wo_ref[l]                              # (D, D)

        # ---- multi-head self-attention, flat rows + block-diagonal mask ------------
        attn = jnp.zeros((BS, D_MODEL), jnp.float32)
        for hd in range(NHEAD):                     # static loop, Dh=4 lane slices
            lo = hd * HEAD_DIM
            qh = qkv[:, lo:lo + HEAD_DIM]
            kh = qkv[:, D_MODEL + lo:D_MODEL + lo + HEAD_DIM]
            vh = qkv[:, 2 * D_MODEL + lo:2 * D_MODEL + lo + HEAD_DIM]
            s = jax.lax.dot_general(qh, kh, (((1,), (1,)), ((), ())),
                                    preferred_element_type=jnp.float32)  # (B*S, B*S)
            s = s + attn_mask
            s = s - jnp.max(s, axis=-1, keepdims=True)
            p = jnp.exp(s)
            p = p * pl.reciprocal(jnp.sum(p, axis=-1, keepdims=True), approx=True)
            pv = jnp.dot(p, vh, preferred_element_type=jnp.float32)     # (B*S, Dh)
            # fold output projection into the head loop (no 8-way lane concat)
            attn = attn + jnp.dot(pv, wo[lo:lo + HEAD_DIM, :],
                                  preferred_element_type=jnp.float32)
        attn = attn + bo_ref[l]

        # ---- residual + LayerNorm1 --------------------------------------------------
        h1 = _layer_norm(h + attn, g1_ref[l], b1_ref[l])

        # ---- feed-forward (relu), bf16 MXU operands, width padded 370 -> 384 --------
        f = (jnp.dot(h1.astype(jnp.bfloat16), wf1_ref[l],
                     preferred_element_type=jnp.float32) + bf1_ref[l])
        f = jnp.maximum(f, 0.0)
        f = (jnp.dot(f.astype(jnp.bfloat16), wf2_ref[l],
                     preferred_element_type=jnp.float32) + bf2_ref[l])

        # ---- residual + LayerNorm2 --------------------------------------------------
        h = _layer_norm(h1 + f, g2_ref[l], b2_ref[l])

    # ---- final linear: matmul on all rows, then pick last-timestep rows -------------
    y_all = (jnp.dot(h, wout_ref[...], preferred_element_type=jnp.float32)
             + bout_ref[...])                       # (B*S, OUTPUT_SIZE)
    for b in range(BATCH):                          # two static sublane-row stores
        r = b * SEQ + SEQ - 1
        o_ref[b:b + 1, :] = y_all[r:r + 1, :].astype(o_ref.dtype)


# --- wrapper -------------------------------------------------------------------------
@jax.jit
def time_series_transformer_forward(x, params):
    """x: (batch, seq, d_model)  == PyTorch input before its permute(1, 0, 2)."""
    B, S, D = x.shape
    assert (B, S, D) == (BATCH, SEQ, D_MODEL), (B, S, D)
    x2 = x.reshape(B * S, D)

    # block-diagonal additive mask (0 within a batch's seq block, -1e30 elsewhere);
    # constant-folded by XLA, zero in-kernel build cost.
    idx = jnp.arange(BS) // SEQ
    attn_mask = jnp.where(idx[:, None] == idx[None, :], 0.0, -1e30).astype(jnp.float32)

    args = ([x2, attn_mask]
            + [params[n] for n in _STACKED_PARAM_NAMES]
            + [params['w_out'], params['b_out']])

    return pl.pallas_call(
        fused_transformer_kernel,
        out_shape=jax.ShapeDtypeStruct((B, OUTPUT_SIZE), x.dtype),
        in_specs=[pl.BlockSpec(memory_space=pltpu.MemorySpace.VMEM) for _ in args],
        out_specs=pl.BlockSpec(memory_space=pltpu.MemorySpace.VMEM),
    )(*args)


# --- parameter init (deterministic, synthetic) ---------------------------------------
def init_params(key):
    def nrm(k, shape, scale):
        return scale * jax.random.normal(k, shape, dtype=jnp.float32)

    ks = jax.random.split(key, 10)
    L, D, FF = NUM_LAYERS, D_MODEL, DIM_FF
    scale = 1.0 / (HEAD_DIM ** 0.5)

    # attention 1/sqrt(head_dim) folded into Wq / bq at init (free at runtime)
    wq = nrm(ks[0], (L, D, D), D ** -0.5) * scale
    wk = nrm(ks[1], (L, D, D), D ** -0.5)
    wv = nrm(ks[2], (L, D, D), D ** -0.5)
    bq = jnp.zeros((L, 1, D), jnp.float32) * scale
    bk = jnp.zeros((L, 1, D), jnp.float32)
    bv = jnp.zeros((L, 1, D), jnp.float32)

    # feed-forward, zero-padded 370 -> 384 (exact no-op through relu + second matmul)
    wf1 = nrm(ks[4], (L, D, FF), D ** -0.5)
    bf1 = nrm(ks[5], (L, 1, FF), 0.01)
    wf2 = nrm(ks[6], (L, FF, D), FF ** -0.5)
    pad = DIM_FF_PAD - DIM_FF
    wf1 = jnp.pad(wf1, ((0, 0), (0, 0), (0, pad)))
    bf1 = jnp.pad(bf1, ((0, 0), (0, 0), (0, pad)))   # pad must stay zero
    wf2 = jnp.pad(wf2, ((0, 0), (0, pad), (0, 0)))

    return dict(
        w_qkv=jnp.concatenate([wq, wk, wv], axis=-1),   # (L, D, 3D) packed QKV
        b_qkv=jnp.concatenate([bq, bk, bv], axis=-1),   # (L, 1, 3D)
        wo=nrm(ks[3], (L, D, D), D ** -0.5),
        bo=jnp.zeros((L, 1, D), jnp.float32),
        g1=jnp.ones((L, 1, D), jnp.float32),
        b1=jnp.zeros((L, 1, D), jnp.float32),
        wf1=wf1.astype(jnp.bfloat16),                   # bf16 MXU operands, f32 accum
        bf1=bf1,
        wf2=wf2.astype(jnp.bfloat16),
        bf2=nrm(ks[7], (L, 1, D), 0.01),
        g2=jnp.ones((L, 1, D), jnp.float32),
        b2=jnp.zeros((L, 1, D), jnp.float32),
        w_out=nrm(ks[8], (D, OUTPUT_SIZE), D ** -0.5),
        b_out=nrm(ks[9], (1, OUTPUT_SIZE), 0.01),
    )


if __name__ == "__main__":
    x = jax.random.normal(jax.random.PRNGKey(0), (BATCH, SEQ, D_MODEL), dtype=jnp.float32)
    params = init_params(jax.random.PRNGKey(42))

    out = jax.block_until_ready(time_series_transformer_forward(x, params))
    assert out.shape == (BATCH, OUTPUT_SIZE), out.shape
    assert bool(jnp.all(jnp.isfinite(out)))
    print("KERNEL_OK")
</pallas_src>

<mosaic_0001>
module attributes {stable_mosaic.version = 11 : i64} {
  func.func @fused_transformer_kernel(%arg0: memref<16x32xf32, #tpu.memory_space<vmem>>, %arg1: memref<16x16xf32, #tpu.memory_space<vmem>>, %arg2: memref<2x32x96xf32, #tpu.memory_space<vmem>>, %arg3: memref<2x1x96xf32, #tpu.memory_space<vmem>>, %arg4: memref<2x32x32xf32, #tpu.memory_space<vmem>>, %arg5: memref<2x1x32xf32, #tpu.memory_space<vmem>>, %arg6: memref<2x1x32xf32, #tpu.memory_space<vmem>>, %arg7: memref<2x1x32xf32, #tpu.memory_space<vmem>>, %arg8: memref<2x32x384xbf16, #tpu.memory_space<vmem>>, %arg9: memref<2x1x384xf32, #tpu.memory_space<vmem>>, %arg10: memref<2x384x32xbf16, #tpu.memory_space<vmem>>, %arg11: memref<2x1x32xf32, #tpu.memory_space<vmem>>, %arg12: memref<2x1x32xf32, #tpu.memory_space<vmem>>, %arg13: memref<2x1x32xf32, #tpu.memory_space<vmem>>, %arg14: memref<32x15xf32, #tpu.memory_space<vmem>>, %arg15: memref<1x15xf32, #tpu.memory_space<vmem>>, %arg16: memref<2x15xf32, #tpu.memory_space<vmem>>) attributes {dimension_semantics = [], scalar_prefetch = 0 : i64, scratch_operands = 0 : i64, tpu.core_type = #tpu.core_type<tc>} {
    %c0 = arith.constant 0 : index
    %c0_0 = arith.constant 0 : index
    %0 = vector.load %arg0[%c0, %c0_0] : memref<16x32xf32, #tpu.memory_space<vmem>>, vector<16x32xf32>
    %c0_1 = arith.constant 0 : index
    %c0_2 = arith.constant 0 : index
    %1 = vector.load %arg1[%c0_1, %c0_2] : memref<16x16xf32, #tpu.memory_space<vmem>>, vector<16x16xf32>
    %c0_3 = arith.constant 0 : index
    %c0_4 = arith.constant 0 : index
    %c0_5 = arith.constant 0 : index
    %2 = vector.load %arg2[%c0_3, %c0_4, %c0_5] : memref<2x32x96xf32, #tpu.memory_space<vmem>>, vector<1x32x96xf32>
    %3 = vector.shape_cast %2 : vector<1x32x96xf32> to vector<32x96xf32>
    %cst = arith.constant dense<0.000000e+00> : vector<16x96xf32>
    %4 = tpu.matmul %0, %3, %cst {dimension_numbers = #tpu.dot_dimension_numbers<[1], [0], [0], [1], [0, 0, 1, 1], [], []>} : vector<16x32xf32>, vector<32x96xf32>, vector<16x96xf32> -> vector<16x96xf32>
    %c0_6 = arith.constant 0 : index
    %c0_7 = arith.constant 0 : index
    %c0_8 = arith.constant 0 : index
    %5 = vector.load %arg3[%c0_6, %c0_7, %c0_8] : memref<2x1x96xf32, #tpu.memory_space<vmem>>, vector<1x1x96xf32>
    %6 = vector.shape_cast %5 : vector<1x1x96xf32> to vector<1x96xf32>
    %7 = vector.broadcast %6 : vector<1x96xf32> to vector<16x96xf32>
    %8 = arith.addf %4, %7 : vector<16x96xf32>
    %c0_9 = arith.constant 0 : index
    %c0_10 = arith.constant 0 : index
    %c0_11 = arith.constant 0 : index
    %9 = vector.load %arg4[%c0_9, %c0_10, %c0_11] : memref<2x32x32xf32, #tpu.memory_space<vmem>>, vector<1x32x32xf32>
    %10 = vector.shape_cast %9 : vector<1x32x32xf32> to vector<32x32xf32>
    %cst_12 = arith.constant 0.000000e+00 : f32
    %11 = vector.broadcast %cst_12 : f32 to vector<16x32xf32>
    %12 = vector.extract_strided_slice %8 {offsets = [0, 0], sizes = [16, 4], strides = [1, 1]} : vector<16x96xf32> to vector<16x4xf32>
    %13 = vector.extract_strided_slice %8 {offsets = [0, 32], sizes = [16, 4], strides = [1, 1]} : vector<16x96xf32> to vector<16x4xf32>
    %14 = vector.extract_strided_slice %8 {offsets = [0, 64], sizes = [16, 4], strides = [1, 1]} : vector<16x96xf32> to vector<16x4xf32>
    %cst_13 = arith.constant dense<0.000000e+00> : vector<16x16xf32>
    %15 = tpu.matmul %12, %13, %cst_13 {dimension_numbers = #tpu.dot_dimension_numbers<[1], [1], [0], [0], [0, 0, 1, 0], [], []>} : vector<16x4xf32>, vector<16x4xf32>, vector<16x16xf32> -> vector<16x16xf32>
    %16 = arith.addf %15, %1 : vector<16x16xf32>
    %cst_14 = arith.constant dense<0xFF800000> : vector<16xf32>
    %17 = vector.multi_reduction <maximumf>, %16, %cst_14 [1] : vector<16x16xf32> to vector<16xf32>
    %18 = vector.shape_cast %17 : vector<16xf32> to vector<16x1xf32>
    %19 = vector.broadcast %18 : vector<16x1xf32> to vector<16x16xf32>
    %20 = arith.subf %16, %19 : vector<16x16xf32>
    %21 = math.exp %20 : vector<16x16xf32>
    %cst_15 = arith.constant dense<0.000000e+00> : vector<16xf32>
    %22 = vector.multi_reduction <add>, %21, %cst_15 [1] : vector<16x16xf32> to vector<16xf32>
    %23 = vector.shape_cast %22 : vector<16xf32> to vector<16x1xf32>
    %24 = tpu.reciprocal %23 {approx = true} : vector<16x1xf32> -> vector<16x1xf32>
    %25 = vector.broadcast %24 : vector<16x1xf32> to vector<16x16xf32>
    %26 = arith.mulf %21, %25 : vector<16x16xf32>
    %cst_16 = arith.constant dense<0.000000e+00> : vector<16x4xf32>
    %27 = tpu.matmul %26, %14, %cst_16 {dimension_numbers = #tpu.dot_dimension_numbers<[1], [0], [0], [1], [0, 0, 1, 1], [], []>} : vector<16x16xf32>, vector<16x4xf32>, vector<16x4xf32> -> vector<16x4xf32>
    %28 = vector.extract_strided_slice %10 {offsets = [0, 0], sizes = [4, 32], strides = [1, 1]} : vector<32x32xf32> to vector<4x32xf32>
    %cst_17 = arith.constant dense<0.000000e+00> : vector<16x32xf32>
    %29 = tpu.matmul %27, %28, %cst_17 {dimension_numbers = #tpu.dot_dimension_numbers<[1], [0], [0], [1], [0, 0, 1, 1], [], []>} : vector<16x4xf32>, vector<4x32xf32>, vector<16x32xf32> -> vector<16x32xf32>
    %30 = arith.addf %11, %29 : vector<16x32xf32>
    %31 = vector.extract_strided_slice %8 {offsets = [0, 4], sizes = [16, 4], strides = [1, 1]} : vector<16x96xf32> to vector<16x4xf32>
    %32 = vector.extract_strided_slice %8 {offsets = [0, 36], sizes = [16, 4], strides = [1, 1]} : vector<16x96xf32> to vector<16x4xf32>
    %33 = vector.extract_strided_slice %8 {offsets = [0, 68], sizes = [16, 4], strides = [1, 1]} : vector<16x96xf32> to vector<16x4xf32>
    %cst_18 = arith.constant dense<0.000000e+00> : vector<16x16xf32>
    %34 = tpu.matmul %31, %32, %cst_18 {dimension_numbers = #tpu.dot_dimension_numbers<[1], [1], [0], [0], [0, 0, 1, 0], [], []>} : vector<16x4xf32>, vector<16x4xf32>, vector<16x16xf32> -> vector<16x16xf32>
    %35 = arith.addf %34, %1 : vector<16x16xf32>
    %cst_19 = arith.constant dense<0xFF800000> : vector<16xf32>
    %36 = vector.multi_reduction <maximumf>, %35, %cst_19 [1] : vector<16x16xf32> to vector<16xf32>
    %37 = vector.shape_cast %36 : vector<16xf32> to vector<16x1xf32>
    %38 = vector.broadcast %37 : vector<16x1xf32> to vector<16x16xf32>
    %39 = arith.subf %35, %38 : vector<16x16xf32>
    %40 = math.exp %39 : vector<16x16xf32>
    %cst_20 = arith.constant dense<0.000000e+00> : vector<16xf32>
    %41 = vector.multi_reduction <add>, %40, %cst_20 [1] : vector<16x16xf32> to vector<16xf32>
    %42 = vector.shape_cast %41 : vector<16xf32> to vector<16x1xf32>
    %43 = tpu.reciprocal %42 {approx = true} : vector<16x1xf32> -> vector<16x1xf32>
    %44 = vector.broadcast %43 : vector<16x1xf32> to vector<16x16xf32>
    %45 = arith.mulf %40, %44 : vector<16x16xf32>
    %cst_21 = arith.constant dense<0.000000e+00> : vector<16x4xf32>
    %46 = tpu.matmul %45, %33, %cst_21 {dimension_numbers = #tpu.dot_dimension_numbers<[1], [0], [0], [1], [0, 0, 1, 1], [], []>} : vector<16x16xf32>, vector<16x4xf32>, vector<16x4xf32> -> vector<16x4xf32>
    %47 = vector.extract_strided_slice %10 {offsets = [4, 0], sizes = [4, 32], strides = [1, 1]} : vector<32x32xf32> to vector<4x32xf32>
    %cst_22 = arith.constant dense<0.000000e+00> : vector<16x32xf32>
    %48 = tpu.matmul %46, %47, %cst_22 {dimension_numbers = #tpu.dot_dimension_numbers<[1], [0], [0], [1], [0, 0, 1, 1], [], []>} : vector<16x4xf32>, vector<4x32xf32>, vector<16x32xf32> -> vector<16x32xf32>
    %49 = arith.addf %30, %48 : vector<16x32xf32>
    %50 = vector.extract_strided_slice %8 {offsets = [0, 8], sizes = [16, 4], strides = [1, 1]} : vector<16x96xf32> to vector<16x4xf32>
    %51 = vector.extract_strided_slice %8 {offsets = [0, 40], sizes = [16, 4], strides = [1, 1]} : vector<16x96xf32> to vector<16x4xf32>
    %52 = vector.extract_strided_slice %8 {offsets = [0, 72], sizes = [16, 4], strides = [1, 1]} : vector<16x96xf32> to vector<16x4xf32>
    %cst_23 = arith.constant dense<0.000000e+00> : vector<16x16xf32>
    %53 = tpu.matmul %50, %51, %cst_23 {dimension_numbers = #tpu.dot_dimension_numbers<[1], [1], [0], [0], [0, 0, 1, 0], [], []>} : vector<16x4xf32>, vector<16x4xf32>, vector<16x16xf32> -> vector<16x16xf32>
    %54 = arith.addf %53, %1 : vector<16x16xf32>
    %cst_24 = arith.constant dense<0xFF800000> : vector<16xf32>
    %55 = vector.multi_reduction <maximumf>, %54, %cst_24 [1] : vector<16x16xf32> to vector<16xf32>
    %56 = vector.shape_cast %55 : vector<16xf32> to vector<16x1xf32>
    %57 = vector.broadcast %56 : vector<16x1xf32> to vector<16x16xf32>
    %58 = arith.subf %54, %57 : vector<16x16xf32>
    %59 = math.exp %58 : vector<16x16xf32>
    %cst_25 = arith.constant dense<0.000000e+00> : vector<16xf32>
    %60 = vector.multi_reduction <add>, %59, %cst_25 [1] : vector<16x16xf32> to vector<16xf32>
    %61 = vector.shape_cast %60 : vector<16xf32> to vector<16x1xf32>
    %62 = tpu.reciprocal %61 {approx = true} : vector<16x1xf32> -> vector<16x1xf32>
    %63 = vector.broadcast %62 : vector<16x1xf32> to vector<16x16xf32>
    %64 = arith.mulf %59, %63 : vector<16x16xf32>
    %cst_26 = arith.constant dense<0.000000e+00> : vector<16x4xf32>
    %65 = tpu.matmul %64, %52, %cst_26 {dimension_numbers = #tpu.dot_dimension_numbers<[1], [0], [0], [1], [0, 0, 1, 1], [], []>} : vector<16x16xf32>, vector<16x4xf32>, vector<16x4xf32> -> vector<16x4xf32>
    %66 = vector.extract_strided_slice %10 {offsets = [8, 0], sizes = [4, 32], strides = [1, 1]} : vector<32x32xf32> to vector<4x32xf32>
    %cst_27 = arith.constant dense<0.000000e+00> : vector<16x32xf32>
    %67 = tpu.matmul %65, %66, %cst_27 {dimension_numbers = #tpu.dot_dimension_numbers<[1], [0], [0], [1], [0, 0, 1, 1], [], []>} : vector<16x4xf32>, vector<4x32xf32>, vector<16x32xf32> -> vector<16x32xf32>
    %68 = arith.addf %49, %67 : vector<16x32xf32>
    %69 = vector.extract_strided_slice %8 {offsets = [0, 12], sizes = [16, 4], strides = [1, 1]} : vector<16x96xf32> to vector<16x4xf32>
    %70 = vector.extract_strided_slice %8 {offsets = [0, 44], sizes = [16, 4], strides = [1, 1]} : vector<16x96xf32> to vector<16x4xf32>
    %71 = vector.extract_strided_slice %8 {offsets = [0, 76], sizes = [16, 4], strides = [1, 1]} : vector<16x96xf32> to vector<16x4xf32>
    %cst_28 = arith.constant dense<0.000000e+00> : vector<16x16xf32>
    %72 = tpu.matmul %69, %70, %cst_28 {dimension_numbers = #tpu.dot_dimension_numbers<[1], [1], [0], [0], [0, 0, 1, 0], [], []>} : vector<16x4xf32>, vector<16x4xf32>, vector<16x16xf32> -> vector<16x16xf32>
    %73 = arith.addf %72, %1 : vector<16x16xf32>
    %cst_29 = arith.constant dense<0xFF800000> : vector<16xf32>
    %74 = vector.multi_reduction <maximumf>, %73, %cst_29 [1] : vector<16x16xf32> to vector<16xf32>
    %75 = vector.shape_cast %74 : vector<16xf32> to vector<16x1xf32>
    %76 = vector.broadcast %75 : vector<16x1xf32> to vector<16x16xf32>
    %77 = arith.subf %73, %76 : vector<16x16xf32>
    %78 = math.exp %77 : vector<16x16xf32>
    %cst_30 = arith.constant dense<0.000000e+00> : vector<16xf32>
    %79 = vector.multi_reduction <add>, %78, %cst_30 [1] : vector<16x16xf32> to vector<16xf32>
    %80 = vector.shape_cast %79 : vector<16xf32> to vector<16x1xf32>
    %81 = tpu.reciprocal %80 {approx = true} : vector<16x1xf32> -> vector<16x1xf32>
    %82 = vector.broadcast %81 : vector<16x1xf32> to vector<16x16xf32>
    %83 = arith.mulf %78, %82 : vector<16x16xf32>
    %cst_31 = arith.constant dense<0.000000e+00> : vector<16x4xf32>
    %84 = tpu.matmul %83, %71, %cst_31 {dimension_numbers = #tpu.dot_dimension_numbers<[1], [0], [0], [1], [0, 0, 1, 1], [], []>} : vector<16x16xf32>, vector<16x4xf32>, vector<16x4xf32> -> vector<16x4xf32>
    %85 = vector.extract_strided_slice %10 {offsets = [12, 0], sizes = [4, 32], strides = [1, 1]} : vector<32x32xf32> to vector<4x32xf32>
    %cst_32 = arith.constant dense<0.000000e+00> : vector<16x32xf32>
    %86 = tpu.matmul %84, %85, %cst_32 {dimension_numbers = #tpu.dot_dimension_numbers<[1], [0], [0], [1], [0, 0, 1, 1], [], []>} : vector<16x4xf32>, vector<4x32xf32>, vector<16x32xf32> -> vector<16x32xf32>
    %87 = arith.addf %68, %86 : vector<16x32xf32>
    %88 = vector.extract_strided_slice %8 {offsets = [0, 16], sizes = [16, 4], strides = [1, 1]} : vector<16x96xf32> to vector<16x4xf32>
    %89 = vector.extract_strided_slice %8 {offsets = [0, 48], sizes = [16, 4], strides = [1, 1]} : vector<16x96xf32> to vector<16x4xf32>
    %90 = vector.extract_strided_slice %8 {offsets = [0, 80], sizes = [16, 4], strides = [1, 1]} : vector<16x96xf32> to vector<16x4xf32>
    %cst_33 = arith.constant dense<0.000000e+00> : vector<16x16xf32>
    %91 = tpu.matmul %88, %89, %cst_33 {dimension_numbers = #tpu.dot_dimension_numbers<[1], [1], [0], [0], [0, 0, 1, 0], [], []>} : vector<16x4xf32>, vector<16x4xf32>, vector<16x16xf32> -> vector<16x16xf32>
    %92 = arith.addf %91, %1 : vector<16x16xf32>
    %cst_34 = arith.constant dense<0xFF800000> : vector<16xf32>
    %93 = vector.multi_reduction <maximumf>, %92, %cst_34 [1] : vector<16x16xf32> to vector<16xf32>
    %94 = vector.shape_cast %93 : vector<16xf32> to vector<16x1xf32>
    %95 = vector.broadcast %94 : vector<16x1xf32> to vector<16x16xf32>
    %96 = arith.subf %92, %95 : vector<16x16xf32>
    %97 = math.exp %96 : vector<16x16xf32>
    %cst_35 = arith.constant dense<0.000000e+00> : vector<16xf32>
    %98 = vector.multi_reduction <add>, %97, %cst_35 [1] : vector<16x16xf32> to vector<16xf32>
    %99 = vector.shape_cast %98 : vector<16xf32> to vector<16x1xf32>
    %100 = tpu.reciprocal %99 {approx = true} : vector<16x1xf32> -> vector<16x1xf32>
    %101 = vector.broadcast %100 : vector<16x1xf32> to vector<16x16xf32>
    %102 = arith.mulf %97, %101 : vector<16x16xf32>
    %cst_36 = arith.constant dense<0.000000e+00> : vector<16x4xf32>
    %103 = tpu.matmul %102, %90, %cst_36 {dimension_numbers = #tpu.dot_dimension_numbers<[1], [0], [0], [1], [0, 0, 1, 1], [], []>} : vector<16x16xf32>, vector<16x4xf32>, vector<16x4xf32> -> vector<16x4xf32>
    %104 = vector.extract_strided_slice %10 {offsets = [16, 0], sizes = [4, 32], strides = [1, 1]} : vector<32x32xf32> to vector<4x32xf32>
    %cst_37 = arith.constant dense<0.000000e+00> : vector<16x32xf32>
    %105 = tpu.matmul %103, %104, %cst_37 {dimension_numbers = #tpu.dot_dimension_numbers<[1], [0], [0], [1], [0, 0, 1, 1], [], []>} : vector<16x4xf32>, vector<4x32xf32>, vector<16x32xf32> -> vector<16x32xf32>
    %106 = arith.addf %87, %105 : vector<16x32xf32>
    %107 = vector.extract_strided_slice %8 {offsets = [0, 20], sizes = [16, 4], strides = [1, 1]} : vector<16x96xf32> to vector<16x4xf32>
    %108 = vector.extract_strided_slice %8 {offsets = [0, 52], sizes = [16, 4], strides = [1, 1]} : vector<16x96xf32> to vector<16x4xf32>
    %109 = vector.extract_strided_slice %8 {offsets = [0, 84], sizes = [16, 4], strides = [1, 1]} : vector<16x96xf32> to vector<16x4xf32>
    %cst_38 = arith.constant dense<0.000000e+00> : vector<16x16xf32>
    %110 = tpu.matmul %107, %108, %cst_38 {dimension_numbers = #tpu.dot_dimension_numbers<[1], [1], [0], [0], [0, 0, 1, 0], [], []>} : vector<16x4xf32>, vector<16x4xf32>, vector<16x16xf32> -> vector<16x16xf32>
    %111 = arith.addf %110, %1 : vector<16x16xf32>
    %cst_39 = arith.constant dense<0xFF800000> : vector<16xf32>
    %112 = vector.multi_reduction <maximumf>, %111, %cst_39 [1] : vector<16x16xf32> to vector<16xf32>
    %113 = vector.shape_cast %112 : vector<16xf32> to vector<16x1xf32>
    %114 = vector.broadcast %113 : vector<16x1xf32> to vector<16x16xf32>
    %115 = arith.subf %111, %114 : vector<16x16xf32>
    %116 = math.exp %115 : vector<16x16xf32>
    %cst_40 = arith.constant dense<0.000000e+00> : vector<16xf32>
    %117 = vector.multi_reduction <add>, %116, %cst_40 [1] : vector<16x16xf32> to vector<16xf32>
    %118 = vector.shape_cast %117 : vector<16xf32> to vector<16x1xf32>
    %119 = tpu.reciprocal %118 {approx = true} : vector<16x1xf32> -> vector<16x1xf32>
    %120 = vector.broadcast %119 : vector<16x1xf32> to vector<16x16xf32>
    %121 = arith.mulf %116, %120 : vector<16x16xf32>
    %cst_41 = arith.constant dense<0.000000e+00> : vector<16x4xf32>
    %122 = tpu.matmul %121, %109, %cst_41 {dimension_numbers = #tpu.dot_dimension_numbers<[1], [0], [0], [1], [0, 0, 1, 1], [], []>} : vector<16x16xf32>, vector<16x4xf32>, vector<16x4xf32> -> vector<16x4xf32>
    %123 = vector.extract_strided_slice %10 {offsets = [20, 0], sizes = [4, 32], strides = [1, 1]} : vector<32x32xf32> to vector<4x32xf32>
    %cst_42 = arith.constant dense<0.000000e+00> : vector<16x32xf32>
    %124 = tpu.matmul %122, %123, %cst_42 {dimension_numbers = #tpu.dot_dimension_numbers<[1], [0], [0], [1], [0, 0, 1, 1], [], []>} : vector<16x4xf32>, vector<4x32xf32>, vector<16x32xf32> -> vector<16x32xf32>
    %125 = arith.addf %106, %124 : vector<16x32xf32>
    %126 = vector.extract_strided_slice %8 {offsets = [0, 24], sizes = [16, 4], strides = [1, 1]} : vector<16x96xf32> to vector<16x4xf32>
    %127 = vector.extract_strided_slice %8 {offsets = [0, 56], sizes = [16, 4], strides = [1, 1]} : vector<16x96xf32> to vector<16x4xf32>
    %128 = vector.extract_strided_slice %8 {offsets = [0, 88], sizes = [16, 4], strides = [1, 1]} : vector<16x96xf32> to vector<16x4xf32>
    %cst_43 = arith.constant dense<0.000000e+00> : vector<16x16xf32>
    %129 = tpu.matmul %126, %127, %cst_43 {dimension_numbers = #tpu.dot_dimension_numbers<[1], [1], [0], [0], [0, 0, 1, 0], [], []>} : vector<16x4xf32>, vector<16x4xf32>, vector<16x16xf32> -> vector<16x16xf32>
    %130 = arith.addf %129, %1 : vector<16x16xf32>
    %cst_44 = arith.constant dense<0xFF800000> : vector<16xf32>
    %131 = vector.multi_reduction <maximumf>, %130, %cst_44 [1] : vector<16x16xf32> to vector<16xf32>
    %132 = vector.shape_cast %131 : vector<16xf32> to vector<16x1xf32>
    %133 = vector.broadcast %132 : vector<16x1xf32> to vector<16x16xf32>
    %134 = arith.subf %130, %133 : vector<16x16xf32>
    %135 = math.exp %134 : vector<16x16xf32>
    %cst_45 = arith.constant dense<0.000000e+00> : vector<16xf32>
    %136 = vector.multi_reduction <add>, %135, %cst_45 [1] : vector<16x16xf32> to vector<16xf32>
    %137 = vector.shape_cast %136 : vector<16xf32> to vector<16x1xf32>
    %138 = tpu.reciprocal %137 {approx = true} : vector<16x1xf32> -> vector<16x1xf32>
    %139 = vector.broadcast %138 : vector<16x1xf32> to vector<16x16xf32>
    %140 = arith.mulf %135, %139 : vector<16x16xf32>
    %cst_46 = arith.constant dense<0.000000e+00> : vector<16x4xf32>
    %141 = tpu.matmul %140, %128, %cst_46 {dimension_numbers = #tpu.dot_dimension_numbers<[1], [0], [0], [1], [0, 0, 1, 1], [], []>} : vector<16x16xf32>, vector<16x4xf32>, vector<16x4xf32> -> vector<16x4xf32>
    %142 = vector.extract_strided_slice %10 {offsets = [24, 0], sizes = [4, 32], strides = [1, 1]} : vector<32x32xf32> to vector<4x32xf32>
    %cst_47 = arith.constant dense<0.000000e+00> : vector<16x32xf32>
    %143 = tpu.matmul %141, %142, %cst_47 {dimension_numbers = #tpu.dot_dimension_numbers<[1], [0], [0], [1], [0, 0, 1, 1], [], []>} : vector<16x4xf32>, vector<4x32xf32>, vector<16x32xf32> -> vector<16x32xf32>
    %144 = arith.addf %125, %143 : vector<16x32xf32>
    %145 = vector.extract_strided_slice %8 {offsets = [0, 28], sizes = [16, 4], strides = [1, 1]} : vector<16x96xf32> to vector<16x4xf32>
    %146 = vector.extract_strided_slice %8 {offsets = [0, 60], sizes = [16, 4], strides = [1, 1]} : vector<16x96xf32> to vector<16x4xf32>
    %147 = vector.extract_strided_slice %8 {offsets = [0, 92], sizes = [16, 4], strides = [1, 1]} : vector<16x96xf32> to vector<16x4xf32>
    %cst_48 = arith.constant dense<0.000000e+00> : vector<16x16xf32>
    %148 = tpu.matmul %145, %146, %cst_48 {dimension_numbers = #tpu.dot_dimension_numbers<[1], [1], [0], [0], [0, 0, 1, 0], [], []>} : vector<16x4xf32>, vector<16x4xf32>, vector<16x16xf32> -> vector<16x16xf32>
    %149 = arith.addf %148, %1 : vector<16x16xf32>
    %cst_49 = arith.constant dense<0xFF800000> : vector<16xf32>
    %150 = vector.multi_reduction <maximumf>, %149, %cst_49 [1] : vector<16x16xf32> to vector<16xf32>
    %151 = vector.shape_cast %150 : vector<16xf32> to vector<16x1xf32>
    %152 = vector.broadcast %151 : vector<16x1xf32> to vector<16x16xf32>
    %153 = arith.subf %149, %152 : vector<16x16xf32>
    %154 = math.exp %153 : vector<16x16xf32>
    %cst_50 = arith.constant dense<0.000000e+00> : vector<16xf32>
    %155 = vector.multi_reduction <add>, %154, %cst_50 [1] : vector<16x16xf32> to vector<16xf32>
    %156 = vector.shape_cast %155 : vector<16xf32> to vector<16x1xf32>
    %157 = tpu.reciprocal %156 {approx = true} : vector<16x1xf32> -> vector<16x1xf32>
    %158 = vector.broadcast %157 : vector<16x1xf32> to vector<16x16xf32>
    %159 = arith.mulf %154, %158 : vector<16x16xf32>
    %cst_51 = arith.constant dense<0.000000e+00> : vector<16x4xf32>
    %160 = tpu.matmul %159, %147, %cst_51 {dimension_numbers = #tpu.dot_dimension_numbers<[1], [0], [0], [1], [0, 0, 1, 1], [], []>} : vector<16x16xf32>, vector<16x4xf32>, vector<16x4xf32> -> vector<16x4xf32>
    %161 = vector.extract_strided_slice %10 {offsets = [28, 0], sizes = [4, 32], strides = [1, 1]} : vector<32x32xf32> to vector<4x32xf32>
    %cst_52 = arith.constant dense<0.000000e+00> : vector<16x32xf32>
    %162 = tpu.matmul %160, %161, %cst_52 {dimension_numbers = #tpu.dot_dimension_numbers<[1], [0], [0], [1], [0, 0, 1, 1], [], []>} : vector<16x4xf32>, vector<4x32xf32>, vector<16x32xf32> -> vector<16x32xf32>
    %163 = arith.addf %144, %162 : vector<16x32xf32>
    %c0_53 = arith.constant 0 : index
    %c0_54 = arith.constant 0 : index
    %c0_55 = arith.constant 0 : index
    %164 = vector.load %arg5[%c0_53, %c0_54, %c0_55] : memref<2x1x32xf32, #tpu.memory_space<vmem>>, vector<1x1x32xf32>
    %165 = vector.shape_cast %164 : vector<1x1x32xf32> to vector<1x32xf32>
    %166 = vector.broadcast %165 : vector<1x32xf32> to vector<16x32xf32>
    %167 = arith.addf %163, %166 : vector<16x32xf32>
    %168 = arith.addf %0, %167 : vector<16x32xf32>
    %c0_56 = arith.constant 0 : index
    %c0_57 = arith.constant 0 : index
    %c0_58 = arith.constant 0 : index
    %169 = vector.load %arg6[%c0_56, %c0_57, %c0_58] : memref<2x1x32xf32, #tpu.memory_space<vmem>>, vector<1x1x32xf32>
    %170 = vector.shape_cast %169 : vector<1x1x32xf32> to vector<1x32xf32>
    %c0_59 = arith.constant 0 : index
    %c0_60 = arith.constant 0 : index
    %c0_61 = arith.constant 0 : index
    %171 = vector.load %arg7[%c0_59, %c0_60, %c0_61] : memref<2x1x32xf32, #tpu.memory_space<vmem>>, vector<1x1x32xf32>
    %172 = vector.shape_cast %171 : vector<1x1x32xf32> to vector<1x32xf32>
    %cst_62 = arith.constant dense<0.000000e+00> : vector<16xf32>
    %173 = vector.multi_reduction <add>, %168, %cst_62 [1] : vector<16x32xf32> to vector<16xf32>
    %174 = vector.shape_cast %173 : vector<16xf32> to vector<16x1xf32>
    %cst_63 = arith.constant 3.200000e+01 : f32
    %175 = vector.broadcast %cst_63 : f32 to vector<16x1xf32>
    %176 = arith.divf %174, %175 : vector<16x1xf32>
    %177 = vector.broadcast %176 : vector<16x1xf32> to vector<16x32xf32>
    %178 = arith.subf %168, %177 : vector<16x32xf32>
    %179 = arith.mulf %178, %178 : vector<16x32xf32>
    %cst_64 = arith.constant dense<0.000000e+00> : vector<16xf32>
    %180 = vector.multi_reduction <add>, %179, %cst_64 [1] : vector<16x32xf32> to vector<16xf32>
    %181 = vector.shape_cast %180 : vector<16xf32> to vector<16x1xf32>
    %cst_65 = arith.constant 3.200000e+01 : f32
    %182 = vector.broadcast %cst_65 : f32 to vector<16x1xf32>
    %183 = arith.divf %181, %182 : vector<16x1xf32>
    %cst_66 = arith.constant 9.99999974E-6 : f32
    %184 = vector.broadcast %cst_66 : f32 to vector<16x1xf32>
    %185 = arith.addf %183, %184 : vector<16x1xf32>
    %186 = math.rsqrt %185 : vector<16x1xf32>
    %187 = vector.broadcast %186 : vector<16x1xf32> to vector<16x32xf32>
    %188 = arith.mulf %178, %187 : vector<16x32xf32>
    %189 = vector.broadcast %170 : vector<1x32xf32> to vector<16x32xf32>
    %190 = arith.mulf %188, %189 : vector<16x32xf32>
    %191 = vector.broadcast %172 : vector<1x32xf32> to vector<16x32xf32>
    %192 = arith.addf %190, %191 : vector<16x32xf32>
    %193 = arith.truncf %192 : vector<16x32xf32> to vector<16x32xbf16>
    %c0_67 = arith.constant 0 : index
    %c0_68 = arith.constant 0 : index
    %c0_69 = arith.constant 0 : index
    %194 = vector.load %arg8[%c0_67, %c0_68, %c0_69] : memref<2x32x384xbf16, #tpu.memory_space<vmem>>, vector<1x32x384xbf16>
    %195 = vector.shape_cast %194 : vector<1x32x384xbf16> to vector<32x384xbf16>
    %cst_70 = arith.constant dense<0.000000e+00> : vector<16x384xf32>
    %196 = tpu.matmul %193, %195, %cst_70 {dimension_numbers = #tpu.dot_dimension_numbers<[1], [0], [0], [1], [0, 0, 1, 1], [], []>} : vector<16x32xbf16>, vector<32x384xbf16>, vector<16x384xf32> -> vector<16x384xf32>
    %c0_71 = arith.constant 0 : index
    %c0_72 = arith.constant 0 : index
    %c0_73 = arith.constant 0 : index
    %197 = vector.load %arg9[%c0_71, %c0_72, %c0_73] : memref<2x1x384xf32, #tpu.memory_space<vmem>>, vector<1x1x384xf32>
    %198 = vector.shape_cast %197 : vector<1x1x384xf32> to vector<1x384xf32>
    %199 = vector.broadcast %198 : vector<1x384xf32> to vector<16x384xf32>
    %200 = arith.addf %196, %199 : vector<16x384xf32>
    %cst_74 = arith.constant 0.000000e+00 : f32
    %201 = vector.broadcast %cst_74 : f32 to vector<16x384xf32>
    %202 = arith.maximumf %200, %201 : vector<16x384xf32>
    %203 = arith.truncf %202 : vector<16x384xf32> to vector<16x384xbf16>
    %c0_75 = arith.constant 0 : index
    %c0_76 = arith.constant 0 : index
    %c0_77 = arith.constant 0 : index
    %204 = vector.load %arg10[%c0_75, %c0_76, %c0_77] : memref<2x384x32xbf16, #tpu.memory_space<vmem>>, vector<1x384x32xbf16>
    %205 = vector.shape_cast %204 : vector<1x384x32xbf16> to vector<384x32xbf16>
    %cst_78 = arith.constant dense<0.000000e+00> : vector<16x32xf32>
    %206 = tpu.matmul %203, %205, %cst_78 {dimension_numbers = #tpu.dot_dimension_numbers<[1], [0], [0], [1], [0, 0, 1, 1], [], []>} : vector<16x384xbf16>, vector<384x32xbf16>, vector<16x32xf32> -> vector<16x32xf32>
    %c0_79 = arith.constant 0 : index
    %c0_80 = arith.constant 0 : index
    %c0_81 = arith.constant 0 : index
    %207 = vector.load %arg11[%c0_79, %c0_80, %c0_81] : memref<2x1x32xf32, #tpu.memory_space<vmem>>, vector<1x1x32xf32>
    %208 = vector.shape_cast %207 : vector<1x1x32xf32> to vector<1x32xf32>
    %209 = vector.broadcast %208 : vector<1x32xf32> to vector<16x32xf32>
    %210 = arith.addf %206, %209 : vector<16x32xf32>
    %211 = arith.addf %192, %210 : vector<16x32xf32>
    %c0_82 = arith.constant 0 : index
    %c0_83 = arith.constant 0 : index
    %c0_84 = arith.constant 0 : index
    %212 = vector.load %arg12[%c0_82, %c0_83, %c0_84] : memref<2x1x32xf32, #tpu.memory_space<vmem>>, vector<1x1x32xf32>
    %213 = vector.shape_cast %212 : vector<1x1x32xf32> to vector<1x32xf32>
    %c0_85 = arith.constant 0 : index
    %c0_86 = arith.constant 0 : index
    %c0_87 = arith.constant 0 : index
    %214 = vector.load %arg13[%c0_85, %c0_86, %c0_87] : memref<2x1x32xf32, #tpu.memory_space<vmem>>, vector<1x1x32xf32>
    %215 = vector.shape_cast %214 : vector<1x1x32xf32> to vector<1x32xf32>
    %cst_88 = arith.constant dense<0.000000e+00> : vector<16xf32>
    %216 = vector.multi_reduction <add>, %211, %cst_88 [1] : vector<16x32xf32> to vector<16xf32>
    %217 = vector.shape_cast %216 : vector<16xf32> to vector<16x1xf32>
    %cst_89 = arith.constant 3.200000e+01 : f32
    %218 = vector.broadcast %cst_89 : f32 to vector<16x1xf32>
    %219 = arith.divf %217, %218 : vector<16x1xf32>
    %220 = vector.broadcast %219 : vector<16x1xf32> to vector<16x32xf32>
    %221 = arith.subf %211, %220 : vector<16x32xf32>
    %222 = arith.mulf %221, %221 : vector<16x32xf32>
    %cst_90 = arith.constant dense<0.000000e+00> : vector<16xf32>
    %223 = vector.multi_reduction <add>, %222, %cst_90 [1] : vector<16x32xf32> to vector<16xf32>
    %224 = vector.shape_cast %223 : vector<16xf32> to vector<16x1xf32>
    %cst_91 = arith.constant 3.200000e+01 : f32
    %225 = vector.broadcast %cst_91 : f32 to vector<16x1xf32>
    %226 = arith.divf %224, %225 : vector<16x1xf32>
    %cst_92 = arith.constant 9.99999974E-6 : f32
    %227 = vector.broadcast %cst_92 : f32 to vector<16x1xf32>
    %228 = arith.addf %226, %227 : vector<16x1xf32>
    %229 = math.rsqrt %228 : vector<16x1xf32>
    %230 = vector.broadcast %229 : vector<16x1xf32> to vector<16x32xf32>
    %231 = arith.mulf %221, %230 : vector<16x32xf32>
    %232 = vector.broadcast %213 : vector<1x32xf32> to vector<16x32xf32>
    %233 = arith.mulf %231, %232 : vector<16x32xf32>
    %234 = vector.broadcast %215 : vector<1x32xf32> to vector<16x32xf32>
    %235 = arith.addf %233, %234 : vector<16x32xf32>
    %c1 = arith.constant 1 : index
    %c0_93 = arith.constant 0 : index
    %c0_94 = arith.constant 0 : index
    %236 = vector.load %arg2[%c1, %c0_93, %c0_94] : memref<2x32x96xf32, #tpu.memory_space<vmem>>, vector<1x32x96xf32>
    %237 = vector.shape_cast %236 : vector<1x32x96xf32> to vector<32x96xf32>
    %cst_95 = arith.constant dense<0.000000e+00> : vector<16x96xf32>
    %238 = tpu.matmul %235, %237, %cst_95 {dimension_numbers = #tpu.dot_dimension_numbers<[1], [0], [0], [1], [0, 0, 1, 1], [], []>} : vector<16x32xf32>, vector<32x96xf32>, vector<16x96xf32> -> vector<16x96xf32>
    %c1_96 = arith.constant 1 : index
    %c0_97 = arith.constant 0 : index
    %c0_98 = arith.constant 0 : index
    %239 = vector.load %arg3[%c1_96, %c0_97, %c0_98] : memref<2x1x96xf32, #tpu.memory_space<vmem>>, vector<1x1x96xf32>
    %240 = vector.shape_cast %239 : vector<1x1x96xf32> to vector<1x96xf32>
    %241 = vector.broadcast %240 : vector<1x96xf32> to vector<16x96xf32>
    %242 = arith.addf %238, %241 : vector<16x96xf32>
    %c1_99 = arith.constant 1 : index
    %c0_100 = arith.constant 0 : index
    %c0_101 = arith.constant 0 : index
    %243 = vector.load %arg4[%c1_99, %c0_100, %c0_101] : memref<2x32x32xf32, #tpu.memory_space<vmem>>, vector<1x32x32xf32>
    %244 = vector.shape_cast %243 : vector<1x32x32xf32> to vector<32x32xf32>
    %cst_102 = arith.constant 0.000000e+00 : f32
    %245 = vector.broadcast %cst_102 : f32 to vector<16x32xf32>
    %246 = vector.extract_strided_slice %242 {offsets = [0, 0], sizes = [16, 4], strides = [1, 1]} : vector<16x96xf32> to vector<16x4xf32>
    %247 = vector.extract_strided_slice %242 {offsets = [0, 32], sizes = [16, 4], strides = [1, 1]} : vector<16x96xf32> to vector<16x4xf32>
    %248 = vector.extract_strided_slice %242 {offsets = [0, 64], sizes = [16, 4], strides = [1, 1]} : vector<16x96xf32> to vector<16x4xf32>
    %cst_103 = arith.constant dense<0.000000e+00> : vector<16x16xf32>
    %249 = tpu.matmul %246, %247, %cst_103 {dimension_numbers = #tpu.dot_dimension_numbers<[1], [1], [0], [0], [0, 0, 1, 0], [], []>} : vector<16x4xf32>, vector<16x4xf32>, vector<16x16xf32> -> vector<16x16xf32>
    %250 = arith.addf %249, %1 : vector<16x16xf32>
    %cst_104 = arith.constant dense<0xFF800000> : vector<16xf32>
    %251 = vector.multi_reduction <maximumf>, %250, %cst_104 [1] : vector<16x16xf32> to vector<16xf32>
    %252 = vector.shape_cast %251 : vector<16xf32> to vector<16x1xf32>
    %253 = vector.broadcast %252 : vector<16x1xf32> to vector<16x16xf32>
    %254 = arith.subf %250, %253 : vector<16x16xf32>
    %255 = math.exp %254 : vector<16x16xf32>
    %cst_105 = arith.constant dense<0.000000e+00> : vector<16xf32>
    %256 = vector.multi_reduction <add>, %255, %cst_105 [1] : vector<16x16xf32> to vector<16xf32>
    %257 = vector.shape_cast %256 : vector<16xf32> to vector<16x1xf32>
    %258 = tpu.reciprocal %257 {approx = true} : vector<16x1xf32> -> vector<16x1xf32>
    %259 = vector.broadcast %258 : vector<16x1xf32> to vector<16x16xf32>
    %260 = arith.mulf %255, %259 : vector<16x16xf32>
    %cst_106 = arith.constant dense<0.000000e+00> : vector<16x4xf32>
    %261 = tpu.matmul %260, %248, %cst_106 {dimension_numbers = #tpu.dot_dimension_numbers<[1], [0], [0], [1], [0, 0, 1, 1], [], []>} : vector<16x16xf32>, vector<16x4xf32>, vector<16x4xf32> -> vector<16x4xf32>
    %262 = vector.extract_strided_slice %244 {offsets = [0, 0], sizes = [4, 32], strides = [1, 1]} : vector<32x32xf32> to vector<4x32xf32>
    %cst_107 = arith.constant dense<0.000000e+00> : vector<16x32xf32>
    %263 = tpu.matmul %261, %262, %cst_107 {dimension_numbers = #tpu.dot_dimension_numbers<[1], [0], [0], [1], [0, 0, 1, 1], [], []>} : vector<16x4xf32>, vector<4x32xf32>, vector<16x32xf32> -> vector<16x32xf32>
    %264 = arith.addf %245, %263 : vector<16x32xf32>
    %265 = vector.extract_strided_slice %242 {offsets = [0, 4], sizes = [16, 4], strides = [1, 1]} : vector<16x96xf32> to vector<16x4xf32>
    %266 = vector.extract_strided_slice %242 {offsets = [0, 36], sizes = [16, 4], strides = [1, 1]} : vector<16x96xf32> to vector<16x4xf32>
    %267 = vector.extract_strided_slice %242 {offsets = [0, 68], sizes = [16, 4], strides = [1, 1]} : vector<16x96xf32> to vector<16x4xf32>
    %cst_108 = arith.constant dense<0.000000e+00> : vector<16x16xf32>
    %268 = tpu.matmul %265, %266, %cst_108 {dimension_numbers = #tpu.dot_dimension_numbers<[1], [1], [0], [0], [0, 0, 1, 0], [], []>} : vector<16x4xf32>, vector<16x4xf32>, vector<16x16xf32> -> vector<16x16xf32>
    %269 = arith.addf %268, %1 : vector<16x16xf32>
    %cst_109 = arith.constant dense<0xFF800000> : vector<16xf32>
    %270 = vector.multi_reduction <maximumf>, %269, %cst_109 [1] : vector<16x16xf32> to vector<16xf32>
    %271 = vector.shape_cast %270 : vector<16xf32> to vector<16x1xf32>
    %272 = vector.broadcast %271 : vector<16x1xf32> to vector<16x16xf32>
    %273 = arith.subf %269, %272 : vector<16x16xf32>
    %274 = math.exp %273 : vector<16x16xf32>
    %cst_110 = arith.constant dense<0.000000e+00> : vector<16xf32>
    %275 = vector.multi_reduction <add>, %274, %cst_110 [1] : vector<16x16xf32> to vector<16xf32>
    %276 = vector.shape_cast %275 : vector<16xf32> to vector<16x1xf32>
    %277 = tpu.reciprocal %276 {approx = true} : vector<16x1xf32> -> vector<16x1xf32>
    %278 = vector.broadcast %277 : vector<16x1xf32> to vector<16x16xf32>
    %279 = arith.mulf %274, %278 : vector<16x16xf32>
    %cst_111 = arith.constant dense<0.000000e+00> : vector<16x4xf32>
    %280 = tpu.matmul %279, %267, %cst_111 {dimension_numbers = #tpu.dot_dimension_numbers<[1], [0], [0], [1], [0, 0, 1, 1], [], []>} : vector<16x16xf32>, vector<16x4xf32>, vector<16x4xf32> -> vector<16x4xf32>
    %281 = vector.extract_strided_slice %244 {offsets = [4, 0], sizes = [4, 32], strides = [1, 1]} : vector<32x32xf32> to vector<4x32xf32>
    %cst_112 = arith.constant dense<0.000000e+00> : vector<16x32xf32>
    %282 = tpu.matmul %280, %281, %cst_112 {dimension_numbers = #tpu.dot_dimension_numbers<[1], [0], [0], [1], [0, 0, 1, 1], [], []>} : vector<16x4xf32>, vector<4x32xf32>, vector<16x32xf32> -> vector<16x32xf32>
    %283 = arith.addf %264, %282 : vector<16x32xf32>
    %284 = vector.extract_strided_slice %242 {offsets = [0, 8], sizes = [16, 4], strides = [1, 1]} : vector<16x96xf32> to vector<16x4xf32>
    %285 = vector.extract_strided_slice %242 {offsets = [0, 40], sizes = [16, 4], strides = [1, 1]} : vector<16x96xf32> to vector<16x4xf32>
    %286 = vector.extract_strided_slice %242 {offsets = [0, 72], sizes = [16, 4], strides = [1, 1]} : vector<16x96xf32> to vector<16x4xf32>
    %cst_113 = arith.constant dense<0.000000e+00> : vector<16x16xf32>
    %287 = tpu.matmul %284, %285, %cst_113 {dimension_numbers = #tpu.dot_dimension_numbers<[1], [1], [0], [0], [0, 0, 1, 0], [], []>} : vector<16x4xf32>, vector<16x4xf32>, vector<16x16xf32> -> vector<16x16xf32>
    %288 = arith.addf %287, %1 : vector<16x16xf32>
    %cst_114 = arith.constant dense<0xFF800000> : vector<16xf32>
    %289 = vector.multi_reduction <maximumf>, %288, %cst_114 [1] : vector<16x16xf32> to vector<16xf32>
    %290 = vector.shape_cast %289 : vector<16xf32> to vector<16x1xf32>
    %291 = vector.broadcast %290 : vector<16x1xf32> to vector<16x16xf32>
    %292 = arith.subf %288, %291 : vector<16x16xf32>
    %293 = math.exp %292 : vector<16x16xf32>
    %cst_115 = arith.constant dense<0.000000e+00> : vector<16xf32>
    %294 = vector.multi_reduction <add>, %293, %cst_115 [1] : vector<16x16xf32> to vector<16xf32>
    %295 = vector.shape_cast %294 : vector<16xf32> to vector<16x1xf32>
    %296 = tpu.reciprocal %295 {approx = true} : vector<16x1xf32> -> vector<16x1xf32>
    %297 = vector.broadcast %296 : vector<16x1xf32> to vector<16x16xf32>
    %298 = arith.mulf %293, %297 : vector<16x16xf32>
    %cst_116 = arith.constant dense<0.000000e+00> : vector<16x4xf32>
    %299 = tpu.matmul %298, %286, %cst_116 {dimension_numbers = #tpu.dot_dimension_numbers<[1], [0], [0], [1], [0, 0, 1, 1], [], []>} : vector<16x16xf32>, vector<16x4xf32>, vector<16x4xf32> -> vector<16x4xf32>
    %300 = vector.extract_strided_slice %244 {offsets = [8, 0], sizes = [4, 32], strides = [1, 1]} : vector<32x32xf32> to vector<4x32xf32>
    %cst_117 = arith.constant dense<0.000000e+00> : vector<16x32xf32>
    %301 = tpu.matmul %299, %300, %cst_117 {dimension_numbers = #tpu.dot_dimension_numbers<[1], [0], [0], [1], [0, 0, 1, 1], [], []>} : vector<16x4xf32>, vector<4x32xf32>, vector<16x32xf32> -> vector<16x32xf32>
    %302 = arith.addf %283, %301 : vector<16x32xf32>
    %303 = vector.extract_strided_slice %242 {offsets = [0, 12], sizes = [16, 4], strides = [1, 1]} : vector<16x96xf32> to vector<16x4xf32>
    %304 = vector.extract_strided_slice %242 {offsets = [0, 44], sizes = [16, 4], strides = [1, 1]} : vector<16x96xf32> to vector<16x4xf32>
    %305 = vector.extract_strided_slice %242 {offsets = [0, 76], sizes = [16, 4], strides = [1, 1]} : vector<16x96xf32> to vector<16x4xf32>
    %cst_118 = arith.constant dense<0.000000e+00> : vector<16x16xf32>
    %306 = tpu.matmul %303, %304, %cst_118 {dimension_numbers = #tpu.dot_dimension_numbers<[1], [1], [0], [0], [0, 0, 1, 0], [], []>} : vector<16x4xf32>, vector<16x4xf32>, vector<16x16xf32> -> vector<16x16xf32>
    %307 = arith.addf %306, %1 : vector<16x16xf32>
    %cst_119 = arith.constant dense<0xFF800000> : vector<16xf32>
    %308 = vector.multi_reduction <maximumf>, %307, %cst_119 [1] : vector<16x16xf32> to vector<16xf32>
    %309 = vector.shape_cast %308 : vector<16xf32> to vector<16x1xf32>
    %310 = vector.broadcast %309 : vector<16x1xf32> to vector<16x16xf32>
    %311 = arith.subf %307, %310 : vector<16x16xf32>
    %312 = math.exp %311 : vector<16x16xf32>
    %cst_120 = arith.constant dense<0.000000e+00> : vector<16xf32>
    %313 = vector.multi_reduction <add>, %312, %cst_120 [1] : vector<16x16xf32> to vector<16xf32>
    %314 = vector.shape_cast %313 : vector<16xf32> to vector<16x1xf32>
    %315 = tpu.reciprocal %314 {approx = true} : vector<16x1xf32> -> vector<16x1xf32>
    %316 = vector.broadcast %315 : vector<16x1xf32> to vector<16x16xf32>
    %317 = arith.mulf %312, %316 : vector<16x16xf32>
    %cst_121 = arith.constant dense<0.000000e+00> : vector<16x4xf32>
    %318 = tpu.matmul %317, %305, %cst_121 {dimension_numbers = #tpu.dot_dimension_numbers<[1], [0], [0], [1], [0, 0, 1, 1], [], []>} : vector<16x16xf32>, vector<16x4xf32>, vector<16x4xf32> -> vector<16x4xf32>
    %319 = vector.extract_strided_slice %244 {offsets = [12, 0], sizes = [4, 32], strides = [1, 1]} : vector<32x32xf32> to vector<4x32xf32>
    %cst_122 = arith.constant dense<0.000000e+00> : vector<16x32xf32>
    %320 = tpu.matmul %318, %319, %cst_122 {dimension_numbers = #tpu.dot_dimension_numbers<[1], [0], [0], [1], [0, 0, 1, 1], [], []>} : vector<16x4xf32>, vector<4x32xf32>, vector<16x32xf32> -> vector<16x32xf32>
    %321 = arith.addf %302, %320 : vector<16x32xf32>
    %322 = vector.extract_strided_slice %242 {offsets = [0, 16], sizes = [16, 4], strides = [1, 1]} : vector<16x96xf32> to vector<16x4xf32>
    %323 = vector.extract_strided_slice %242 {offsets = [0, 48], sizes = [16, 4], strides = [1, 1]} : vector<16x96xf32> to vector<16x4xf32>
    %324 = vector.extract_strided_slice %242 {offsets = [0, 80], sizes = [16, 4], strides = [1, 1]} : vector<16x96xf32> to vector<16x4xf32>
    %cst_123 = arith.constant dense<0.000000e+00> : vector<16x16xf32>
    %325 = tpu.matmul %322, %323, %cst_123 {dimension_numbers = #tpu.dot_dimension_numbers<[1], [1], [0], [0], [0, 0, 1, 0], [], []>} : vector<16x4xf32>, vector<16x4xf32>, vector<16x16xf32> -> vector<16x16xf32>
    %326 = arith.addf %325, %1 : vector<16x16xf32>
    %cst_124 = arith.constant dense<0xFF800000> : vector<16xf32>
    %327 = vector.multi_reduction <maximumf>, %326, %cst_124 [1] : vector<16x16xf32> to vector<16xf32>
    %328 = vector.shape_cast %327 : vector<16xf32> to vector<16x1xf32>
    %329 = vector.broadcast %328 : vector<16x1xf32> to vector<16x16xf32>
    %330 = arith.subf %326, %329 : vector<16x16xf32>
    %331 = math.exp %330 : vector<16x16xf32>
    %cst_125 = arith.constant dense<0.000000e+00> : vector<16xf32>
    %332 = vector.multi_reduction <add>, %331, %cst_125 [1] : vector<16x16xf32> to vector<16xf32>
    %333 = vector.shape_cast %332 : vector<16xf32> to vector<16x1xf32>
    %334 = tpu.reciprocal %333 {approx = true} : vector<16x1xf32> -> vector<16x1xf32>
    %335 = vector.broadcast %334 : vector<16x1xf32> to vector<16x16xf32>
    %336 = arith.mulf %331, %335 : vector<16x16xf32>
    %cst_126 = arith.constant dense<0.000000e+00> : vector<16x4xf32>
    %337 = tpu.matmul %336, %324, %cst_126 {dimension_numbers = #tpu.dot_dimension_numbers<[1], [0], [0], [1], [0, 0, 1, 1], [], []>} : vector<16x16xf32>, vector<16x4xf32>, vector<16x4xf32> -> vector<16x4xf32>
    %338 = vector.extract_strided_slice %244 {offsets = [16, 0], sizes = [4, 32], strides = [1, 1]} : vector<32x32xf32> to vector<4x32xf32>
    %cst_127 = arith.constant dense<0.000000e+00> : vector<16x32xf32>
    %339 = tpu.matmul %337, %338, %cst_127 {dimension_numbers = #tpu.dot_dimension_numbers<[1], [0], [0], [1], [0, 0, 1, 1], [], []>} : vector<16x4xf32>, vector<4x32xf32>, vector<16x32xf32> -> vector<16x32xf32>
    %340 = arith.addf %321, %339 : vector<16x32xf32>
    %341 = vector.extract_strided_slice %242 {offsets = [0, 20], sizes = [16, 4], strides = [1, 1]} : vector<16x96xf32> to vector<16x4xf32>
    %342 = vector.extract_strided_slice %242 {offsets = [0, 52], sizes = [16, 4], strides = [1, 1]} : vector<16x96xf32> to vector<16x4xf32>
    %343 = vector.extract_strided_slice %242 {offsets = [0, 84], sizes = [16, 4], strides = [1, 1]} : vector<16x96xf32> to vector<16x4xf32>
    %cst_128 = arith.constant dense<0.000000e+00> : vector<16x16xf32>
    %344 = tpu.matmul %341, %342, %cst_128 {dimension_numbers = #tpu.dot_dimension_numbers<[1], [1], [0], [0], [0, 0, 1, 0], [], []>} : vector<16x4xf32>, vector<16x4xf32>, vector<16x16xf32> -> vector<16x16xf32>
    %345 = arith.addf %344, %1 : vector<16x16xf32>
    %cst_129 = arith.constant dense<0xFF800000> : vector<16xf32>
    %346 = vector.multi_reduction <maximumf>, %345, %cst_129 [1] : vector<16x16xf32> to vector<16xf32>
    %347 = vector.shape_cast %346 : vector<16xf32> to vector<16x1xf32>
    %348 = vector.broadcast %347 : vector<16x1xf32> to vector<16x16xf32>
    %349 = arith.subf %345, %348 : vector<16x16xf32>
    %350 = math.exp %349 : vector<16x16xf32>
    %cst_130 = arith.constant dense<0.000000e+00> : vector<16xf32>
    %351 = vector.multi_reduction <add>, %350, %cst_130 [1] : vector<16x16xf32> to vector<16xf32>
    %352 = vector.shape_cast %351 : vector<16xf32> to vector<16x1xf32>
    %353 = tpu.reciprocal %352 {approx = true} : vector<16x1xf32> -> vector<16x1xf32>
    %354 = vector.broadcast %353 : vector<16x1xf32> to vector<16x16xf32>
    %355 = arith.mulf %350, %354 : vector<16x16xf32>
    %cst_131 = arith.constant dense<0.000000e+00> : vector<16x4xf32>
    %356 = tpu.matmul %355, %343, %cst_131 {dimension_numbers = #tpu.dot_dimension_numbers<[1], [0], [0], [1], [0, 0, 1, 1], [], []>} : vector<16x16xf32>, vector<16x4xf32>, vector<16x4xf32> -> vector<16x4xf32>
    %357 = vector.extract_strided_slice %244 {offsets = [20, 0], sizes = [4, 32], strides = [1, 1]} : vector<32x32xf32> to vector<4x32xf32>
    %cst_132 = arith.constant dense<0.000000e+00> : vector<16x32xf32>
    %358 = tpu.matmul %356, %357, %cst_132 {dimension_numbers = #tpu.dot_dimension_numbers<[1], [0], [0], [1], [0, 0, 1, 1], [], []>} : vector<16x4xf32>, vector<4x32xf32>, vector<16x32xf32> -> vector<16x32xf32>
    %359 = arith.addf %340, %358 : vector<16x32xf32>
    %360 = vector.extract_strided_slice %242 {offsets = [0, 24], sizes = [16, 4], strides = [1, 1]} : vector<16x96xf32> to vector<16x4xf32>
    %361 = vector.extract_strided_slice %242 {offsets = [0, 56], sizes = [16, 4], strides = [1, 1]} : vector<16x96xf32> to vector<16x4xf32>
    %362 = vector.extract_strided_slice %242 {offsets = [0, 88], sizes = [16, 4], strides = [1, 1]} : vector<16x96xf32> to vector<16x4xf32>
    %cst_133 = arith.constant dense<0.000000e+00> : vector<16x16xf32>
    %363 = tpu.matmul %360, %361, %cst_133 {dimension_numbers = #tpu.dot_dimension_numbers<[1], [1], [0], [0], [0, 0, 1, 0], [], []>} : vector<16x4xf32>, vector<16x4xf32>, vector<16x16xf32> -> vector<16x16xf32>
    %364 = arith.addf %363, %1 : vector<16x16xf32>
    %cst_134 = arith.constant dense<0xFF800000> : vector<16xf32>
    %365 = vector.multi_reduction <maximumf>, %364, %cst_134 [1] : vector<16x16xf32> to vector<16xf32>
    %366 = vector.shape_cast %365 : vector<16xf32> to vector<16x1xf32>
    %367 = vector.broadcast %366 : vector<16x1xf32> to vector<16x16xf32>
    %368 = arith.subf %364, %367 : vector<16x16xf32>
    %369 = math.exp %368 : vector<16x16xf32>
    %cst_135 = arith.constant dense<0.000000e+00> : vector<16xf32>
    %370 = vector.multi_reduction <add>, %369, %cst_135 [1] : vector<16x16xf32> to vector<16xf32>
    %371 = vector.shape_cast %370 : vector<16xf32> to vector<16x1xf32>
    %372 = tpu.reciprocal %371 {approx = true} : vector<16x1xf32> -> vector<16x1xf32>
    %373 = vector.broadcast %372 : vector<16x1xf32> to vector<16x16xf32>
    %374 = arith.mulf %369, %373 : vector<16x16xf32>
    %cst_136 = arith.constant dense<0.000000e+00> : vector<16x4xf32>
    %375 = tpu.matmul %374, %362, %cst_136 {dimension_numbers = #tpu.dot_dimension_numbers<[1], [0], [0], [1], [0, 0, 1, 1], [], []>} : vector<16x16xf32>, vector<16x4xf32>, vector<16x4xf32> -> vector<16x4xf32>
    %376 = vector.extract_strided_slice %244 {offsets = [24, 0], sizes = [4, 32], strides = [1, 1]} : vector<32x32xf32> to vector<4x32xf32>
    %cst_137 = arith.constant dense<0.000000e+00> : vector<16x32xf32>
    %377 = tpu.matmul %375, %376, %cst_137 {dimension_numbers = #tpu.dot_dimension_numbers<[1], [0], [0], [1], [0, 0, 1, 1], [], []>} : vector<16x4xf32>, vector<4x32xf32>, vector<16x32xf32> -> vector<16x32xf32>
    %378 = arith.addf %359, %377 : vector<16x32xf32>
    %379 = vector.extract_strided_slice %242 {offsets = [0, 28], sizes = [16, 4], strides = [1, 1]} : vector<16x96xf32> to vector<16x4xf32>
    %380 = vector.extract_strided_slice %242 {offsets = [0, 60], sizes = [16, 4], strides = [1, 1]} : vector<16x96xf32> to vector<16x4xf32>
    %381 = vector.extract_strided_slice %242 {offsets = [0, 92], sizes = [16, 4], strides = [1, 1]} : vector<16x96xf32> to vector<16x4xf32>
    %cst_138 = arith.constant dense<0.000000e+00> : vector<16x16xf32>
    %382 = tpu.matmul %379, %380, %cst_138 {dimension_numbers = #tpu.dot_dimension_numbers<[1], [1], [0], [0], [0, 0, 1, 0], [], []>} : vector<16x4xf32>, vector<16x4xf32>, vector<16x16xf32> -> vector<16x16xf32>
    %383 = arith.addf %382, %1 : vector<16x16xf32>
    %cst_139 = arith.constant dense<0xFF800000> : vector<16xf32>
    %384 = vector.multi_reduction <maximumf>, %383, %cst_139 [1] : vector<16x16xf32> to vector<16xf32>
    %385 = vector.shape_cast %384 : vector<16xf32> to vector<16x1xf32>
    %386 = vector.broadcast %385 : vector<16x1xf32> to vector<16x16xf32>
    %387 = arith.subf %383, %386 : vector<16x16xf32>
    %388 = math.exp %387 : vector<16x16xf32>
    %cst_140 = arith.constant dense<0.000000e+00> : vector<16xf32>
    %389 = vector.multi_reduction <add>, %388, %cst_140 [1] : vector<16x16xf32> to vector<16xf32>
    %390 = vector.shape_cast %389 : vector<16xf32> to vector<16x1xf32>
    %391 = tpu.reciprocal %390 {approx = true} : vector<16x1xf32> -> vector<16x1xf32>
    %392 = vector.broadcast %391 : vector<16x1xf32> to vector<16x16xf32>
    %393 = arith.mulf %388, %392 : vector<16x16xf32>
    %cst_141 = arith.constant dense<0.000000e+00> : vector<16x4xf32>
    %394 = tpu.matmul %393, %381, %cst_141 {dimension_numbers = #tpu.dot_dimension_numbers<[1], [0], [0], [1], [0, 0, 1, 1], [], []>} : vector<16x16xf32>, vector<16x4xf32>, vector<16x4xf32> -> vector<16x4xf32>
    %395 = vector.extract_strided_slice %244 {offsets = [28, 0], sizes = [4, 32], strides = [1, 1]} : vector<32x32xf32> to vector<4x32xf32>
    %cst_142 = arith.constant dense<0.000000e+00> : vector<16x32xf32>
    %396 = tpu.matmul %394, %395, %cst_142 {dimension_numbers = #tpu.dot_dimension_numbers<[1], [0], [0], [1], [0, 0, 1, 1], [], []>} : vector<16x4xf32>, vector<4x32xf32>, vector<16x32xf32> -> vector<16x32xf32>
    %397 = arith.addf %378, %396 : vector<16x32xf32>
    %c1_143 = arith.constant 1 : index
    %c0_144 = arith.constant 0 : index
    %c0_145 = arith.constant 0 : index
    %398 = vector.load %arg5[%c1_143, %c0_144, %c0_145] : memref<2x1x32xf32, #tpu.memory_space<vmem>>, vector<1x1x32xf32>
    %399 = vector.shape_cast %398 : vector<1x1x32xf32> to vector<1x32xf32>
    %400 = vector.broadcast %399 : vector<1x32xf32> to vector<16x32xf32>
    %401 = arith.addf %397, %400 : vector<16x32xf32>
    %402 = arith.addf %235, %401 : vector<16x32xf32>
    %c1_146 = arith.constant 1 : index
    %c0_147 = arith.constant 0 : index
    %c0_148 = arith.constant 0 : index
    %403 = vector.load %arg6[%c1_146, %c0_147, %c0_148] : memref<2x1x32xf32, #tpu.memory_space<vmem>>, vector<1x1x32xf32>
    %404 = vector.shape_cast %403 : vector<1x1x32xf32> to vector<1x32xf32>
    %c1_149 = arith.constant 1 : index
    %c0_150 = arith.constant 0 : index
    %c0_151 = arith.constant 0 : index
    %405 = vector.load %arg7[%c1_149, %c0_150, %c0_151] : memref<2x1x32xf32, #tpu.memory_space<vmem>>, vector<1x1x32xf32>
    %406 = vector.shape_cast %405 : vector<1x1x32xf32> to vector<1x32xf32>
    %cst_152 = arith.constant dense<0.000000e+00> : vector<16xf32>
    %407 = vector.multi_reduction <add>, %402, %cst_152 [1] : vector<16x32xf32> to vector<16xf32>
    %408 = vector.shape_cast %407 : vector<16xf32> to vector<16x1xf32>
    %cst_153 = arith.constant 3.200000e+01 : f32
    %409 = vector.broadcast %cst_153 : f32 to vector<16x1xf32>
    %410 = arith.divf %408, %409 : vector<16x1xf32>
    %411 = vector.broadcast %410 : vector<16x1xf32> to vector<16x32xf32>
    %412 = arith.subf %402, %411 : vector<16x32xf32>
    %413 = arith.mulf %412, %412 : vector<16x32xf32>
    %cst_154 = arith.constant dense<0.000000e+00> : vector<16xf32>
    %414 = vector.multi_reduction <add>, %413, %cst_154 [1] : vector<16x32xf32> to vector<16xf32>
    %415 = vector.shape_cast %414 : vector<16xf32> to vector<16x1xf32>
    %cst_155 = arith.constant 3.200000e+01 : f32
    %416 = vector.broadcast %cst_155 : f32 to vector<16x1xf32>
    %417 = arith.divf %415, %416 : vector<16x1xf32>
    %cst_156 = arith.constant 9.99999974E-6 : f32
    %418 = vector.broadcast %cst_156 : f32 to vector<16x1xf32>
    %419 = arith.addf %417, %418 : vector<16x1xf32>
    %420 = math.rsqrt %419 : vector<16x1xf32>
    %421 = vector.broadcast %420 : vector<16x1xf32> to vector<16x32xf32>
    %422 = arith.mulf %412, %421 : vector<16x32xf32>
    %423 = vector.broadcast %404 : vector<1x32xf32> to vector<16x32xf32>
    %424 = arith.mulf %422, %423 : vector<16x32xf32>
    %425 = vector.broadcast %406 : vector<1x32xf32> to vector<16x32xf32>
    %426 = arith.addf %424, %425 : vector<16x32xf32>
    %427 = arith.truncf %426 : vector<16x32xf32> to vector<16x32xbf16>
    %c1_157 = arith.constant 1 : index
    %c0_158 = arith.constant 0 : index
    %c0_159 = arith.constant 0 : index
    %428 = vector.load %arg8[%c1_157, %c0_158, %c0_159] : memref<2x32x384xbf16, #tpu.memory_space<vmem>>, vector<1x32x384xbf16>
    %429 = vector.shape_cast %428 : vector<1x32x384xbf16> to vector<32x384xbf16>
    %cst_160 = arith.constant dense<0.000000e+00> : vector<16x384xf32>
    %430 = tpu.matmul %427, %429, %cst_160 {dimension_numbers = #tpu.dot_dimension_numbers<[1], [0], [0], [1], [0, 0, 1, 1], [], []>} : vector<16x32xbf16>, vector<32x384xbf16>, vector<16x384xf32> -> vector<16x384xf32>
    %c1_161 = arith.constant 1 : index
    %c0_162 = arith.constant 0 : index
    %c0_163 = arith.constant 0 : index
    %431 = vector.load %arg9[%c1_161, %c0_162, %c0_163] : memref<2x1x384xf32, #tpu.memory_space<vmem>>, vector<1x1x384xf32>
    %432 = vector.shape_cast %431 : vector<1x1x384xf32> to vector<1x384xf32>
    %433 = vector.broadcast %432 : vector<1x384xf32> to vector<16x384xf32>
    %434 = arith.addf %430, %433 : vector<16x384xf32>
    %cst_164 = arith.constant 0.000000e+00 : f32
    %435 = vector.broadcast %cst_164 : f32 to vector<16x384xf32>
    %436 = arith.maximumf %434, %435 : vector<16x384xf32>
    %437 = arith.truncf %436 : vector<16x384xf32> to vector<16x384xbf16>
    %c1_165 = arith.constant 1 : index
    %c0_166 = arith.constant 0 : index
    %c0_167 = arith.constant 0 : index
    %438 = vector.load %arg10[%c1_165, %c0_166, %c0_167] : memref<2x384x32xbf16, #tpu.memory_space<vmem>>, vector<1x384x32xbf16>
    %439 = vector.shape_cast %438 : vector<1x384x32xbf16> to vector<384x32xbf16>
    %cst_168 = arith.constant dense<0.000000e+00> : vector<16x32xf32>
    %440 = tpu.matmul %437, %439, %cst_168 {dimension_numbers = #tpu.dot_dimension_numbers<[1], [0], [0], [1], [0, 0, 1, 1], [], []>} : vector<16x384xbf16>, vector<384x32xbf16>, vector<16x32xf32> -> vector<16x32xf32>
    %c1_169 = arith.constant 1 : index
    %c0_170 = arith.constant 0 : index
    %c0_171 = arith.constant 0 : index
    %441 = vector.load %arg11[%c1_169, %c0_170, %c0_171] : memref<2x1x32xf32, #tpu.memory_space<vmem>>, vector<1x1x32xf32>
    %442 = vector.shape_cast %441 : vector<1x1x32xf32> to vector<1x32xf32>
    %443 = vector.broadcast %442 : vector<1x32xf32> to vector<16x32xf32>
    %444 = arith.addf %440, %443 : vector<16x32xf32>
    %445 = arith.addf %426, %444 : vector<16x32xf32>
    %c1_172 = arith.constant 1 : index
    %c0_173 = arith.constant 0 : index
    %c0_174 = arith.constant 0 : index
    %446 = vector.load %arg12[%c1_172, %c0_173, %c0_174] : memref<2x1x32xf32, #tpu.memory_space<vmem>>, vector<1x1x32xf32>
    %447 = vector.shape_cast %446 : vector<1x1x32xf32> to vector<1x32xf32>
    %c1_175 = arith.constant 1 : index
    %c0_176 = arith.constant 0 : index
    %c0_177 = arith.constant 0 : index
    %448 = vector.load %arg13[%c1_175, %c0_176, %c0_177] : memref<2x1x32xf32, #tpu.memory_space<vmem>>, vector<1x1x32xf32>
    %449 = vector.shape_cast %448 : vector<1x1x32xf32> to vector<1x32xf32>
    %cst_178 = arith.constant dense<0.000000e+00> : vector<16xf32>
    %450 = vector.multi_reduction <add>, %445, %cst_178 [1] : vector<16x32xf32> to vector<16xf32>
    %451 = vector.shape_cast %450 : vector<16xf32> to vector<16x1xf32>
    %cst_179 = arith.constant 3.200000e+01 : f32
    %452 = vector.broadcast %cst_179 : f32 to vector<16x1xf32>
    %453 = arith.divf %451, %452 : vector<16x1xf32>
    %454 = vector.broadcast %453 : vector<16x1xf32> to vector<16x32xf32>
    %455 = arith.subf %445, %454 : vector<16x32xf32>
    %456 = arith.mulf %455, %455 : vector<16x32xf32>
    %cst_180 = arith.constant dense<0.000000e+00> : vector<16xf32>
    %457 = vector.multi_reduction <add>, %456, %cst_180 [1] : vector<16x32xf32> to vector<16xf32>
    %458 = vector.shape_cast %457 : vector<16xf32> to vector<16x1xf32>
    %cst_181 = arith.constant 3.200000e+01 : f32
    %459 = vector.broadcast %cst_181 : f32 to vector<16x1xf32>
    %460 = arith.divf %458, %459 : vector<16x1xf32>
    %cst_182 = arith.constant 9.99999974E-6 : f32
    %461 = vector.broadcast %cst_182 : f32 to vector<16x1xf32>
    %462 = arith.addf %460, %461 : vector<16x1xf32>
    %463 = math.rsqrt %462 : vector<16x1xf32>
    %464 = vector.broadcast %463 : vector<16x1xf32> to vector<16x32xf32>
    %465 = arith.mulf %455, %464 : vector<16x32xf32>
    %466 = vector.broadcast %447 : vector<1x32xf32> to vector<16x32xf32>
    %467 = arith.mulf %465, %466 : vector<16x32xf32>
    %468 = vector.broadcast %449 : vector<1x32xf32> to vector<16x32xf32>
    %469 = arith.addf %467, %468 : vector<16x32xf32>
    %c0_183 = arith.constant 0 : index
    %c0_184 = arith.constant 0 : index
    %470 = vector.load %arg14[%c0_183, %c0_184] : memref<32x15xf32, #tpu.memory_space<vmem>>, vector<32x15xf32>
    %cst_185 = arith.constant dense<0.000000e+00> : vector<16x15xf32>
    %471 = tpu.matmul %469, %470, %cst_185 {dimension_numbers = #tpu.dot_dimension_numbers<[1], [0], [0], [1], [0, 0, 1, 1], [], []>} : vector<16x32xf32>, vector<32x15xf32>, vector<16x15xf32> -> vector<16x15xf32>
    %c0_186 = arith.constant 0 : index
    %c0_187 = arith.constant 0 : index
    %472 = vector.load %arg15[%c0_186, %c0_187] : memref<1x15xf32, #tpu.memory_space<vmem>>, vector<1x15xf32>
    %473 = vector.broadcast %472 : vector<1x15xf32> to vector<16x15xf32>
    %474 = arith.addf %471, %473 : vector<16x15xf32>
    %475 = vector.extract_strided_slice %474 {offsets = [7, 0], sizes = [1, 15], strides = [1, 1]} : vector<16x15xf32> to vector<1x15xf32>
    %c0_188 = arith.constant 0 : index
    %c0_189 = arith.constant 0 : index
    %476 = vector.load %arg16[%c0_188, %c0_189] : memref<2x15xf32, #tpu.memory_space<vmem>>, vector<1x15xf32>
    tpu.vector_store %arg16[%c0_188, %c0_189], %475 {strides = array<i32>} : memref<2x15xf32, #tpu.memory_space<vmem>>, vector<1x15xf32>,
    %477 = vector.extract_strided_slice %474 {offsets = [15, 0], sizes = [1, 15], strides = [1, 1]} : vector<16x15xf32> to vector<1x15xf32>
    %c1_190 = arith.constant 1 : index
    %c0_191 = arith.constant 0 : index
    %478 = vector.load %arg16[%c1_190, %c0_191] : memref<2x15xf32, #tpu.memory_space<vmem>>, vector<1x15xf32>
    tpu.vector_store %arg16[%c1_190, %c0_191], %477 {strides = array<i32>} : memref<2x15xf32, #tpu.memory_space<vmem>>, vector<1x15xf32>,
    return
  }
}

</mosaic_0001>

<bundles_post_ra>
// kernel: time_series_transformer_forward.1
= control target key start
LH: loop header
LB: loop body
LE: loop exit
PB: predicated region body
PF: predicated region fallthrough
CT: control target
= control target key end

     0   :  { %s8606_s0 = inlined_call_operand.vmem [shape: f32[16,32], index: 0, kind: input, shape index: {}]   ;;  %s8607_s1 = inlined_call_operand.vmem [shape: f32[16,16], index: 1, kind: input, shape index: {}]   ;;  %s8608_s2 = inlined_call_operand.vmem [shape: f32[2,32,96], index: 2, kind: input, shape index: {}]   ;;  %s8609_s3 = inlined_call_operand.vmem [shape: f32[2,1,96], index: 3, kind: input, shape index: {}]   ;;  %s8610_s4 = inlined_call_operand.vmem [shape: f32[2,32,32], index: 4, kind: input, shape index: {}]   ;;  %s8611_s5 = inlined_call_operand.vmem [shape: f32[2,1,32], index: 5, kind: input, shape index: {}]   ;;  %s8612_s6 = inlined_call_operand.vmem [shape: f32[2,1,32], index: 6, kind: input, shape index: {}]   ;;  %s8613_s7 = inlined_call_operand.vmem [shape: f32[2,1,32], index: 7, kind: input, shape index: {}]   ;;  %s8614_s8 = inlined_call_operand.vmem [shape: bf16[2,32,384], index: 8, kind: input, shape index: {}]   ;;  %s8615_s9 = inlined_call_operand.vmem [shape: f32[2,1,384], index: 9, kind: input, shape index: {}]   ;;  %s8616_s10 = inlined_call_operand.vmem [shape: bf16[2,384,32], index: 10, kind: input, shape index: {}]   ;;  %s8617_s11 = inlined_call_operand.vmem [shape: f32[2,1,32], index: 11, kind: input, shape index: {}]   ;;  %s8618_s12 = inlined_call_operand.vmem [shape: f32[2,1,32], index: 12, kind: input, shape index: {}]   ;;  %s8619_s13 = inlined_call_operand.vmem [shape: f32[2,1,32], index: 13, kind: input, shape index: {}]   ;;  %s8620_s14 = inlined_call_operand.vmem [shape: f32[32,15], index: 14, kind: input, shape index: {}]   ;;  %s8621_s15 = inlined_call_operand.vmem [shape: f32[1,15], index: 15, kind: input, shape index: {}]   ;;  %s8622_s16 = inlined_call_operand.hbm [shape: f32[2,15], index: 16, kind: output, shape index: {}]  }
   0x1   :  { %8646 = sst [smem:[#allocation5_spill]] %s8606_s0 }
   0x2   :  { %v59_v0 = vld [vmem:[%s8608_s2] sm:$0xff]  ;;  %v60_v1 = vld [vmem:[%s8608_s2 + $0x8] sm:$0xff]  ;;  %v61_v2 = vld [vmem:[%s8608_s2 + $0x10] sm:$0xff]  ;;  %vm70_vm0 = vcmask 261120   ;;  %s8647_s0 = sld [smem:[#allocation5_spill]] }
   0x3   :  { %v6969_v3 = vpack.c.bf16 %v60_v1, %v59_v0  ;;  %v62_v4 = vld [vmem:[%s8608_s2 + $0x18] sm:$0xff] }
   0x4   :  { %v6973_v6 = vpack.c.bf16 %v62_v4, %v61_v2 }
   0x5   :  { %6970 = vmatprep.subr.bf16.mxu0 %v6969_v3 }
   0x6   :  { %6972 = vmatpush3.bf16.msra.mxu0 %v6969_v3 }
   0x7   :  { %6974 = vmatprep.subr.bf16.mxu0 %v6973_v6 }
   0x8   :  { %v55_v5 = vld [vmem:[%s8647_s0] sm:$0xff]  ;;  %v56_v7 = vld [vmem:[%s8647_s0 + $0x8] sm:$0xff] }
   0x9   :  { %6584 = vmatprep.mubr.msk.f32.mxu0 %vm70_vm0, %v55_v5 }
   0xa   :  { %6976 = vmatpush3.bf16.msra.mxu0 %v6973_v6 }
   0xd   :  { %6585 = vmatmul.mubr.msk.f32.vlgmr.msra.gmra.mrb[0].mxu0 %vm70_vm0, %v56_v7 }
   0xe   :  { %21 = vsyncpa [#allocation3], 0  ;;  %v6013_v8 = vld [vmem:[%s8609_s3] ss:$0 sm:$0xff]  ;;  %vm162_vm1 = vcmask 31744   ;;  %s7604_s21 = smov 124  }
   0xf   :  { %s7605_s22 = smov 96   ;;  %s7606_s23 = smov 92   ;;  %vm7765_vm2 = vmpackc.low %vm162_vm1, %vm162_vm1  ;;  %v7790_v31 = vld [vmem:[%s8607_s1 + $0x8] sm:$0xff]  ;;  %v7795_v32 = vld [vmem:[%s8607_s1] sm:$0xff]  ;;  %vm246_vm3 = vcmask 130048   ;;  %vm564_vm4 = vcmask 1043456  }
  0x10   :  { %s7607_s24 = smov 120   ;;  %s7608_s25 = smov 88   ;;  %vm7629_vm5 = vmmov 0   ;;  %vm5996_vm6 = vcmask 121863  }
  0x11   :  { %s8644_s30 = smov 60   ;;  %s8645_s17 = smov 84  }
  0x12   :  { %s7611_s18 = smov 64   ;;  %s8642_s19 = smov 116  }
  0x13   :  { %s8641_s20 = smov 56   ;;  %s8625_s26 = smov 112  }
  0x14   :  { %s8624_s29 = smov 80   ;;  %s8634_s27 = smov 52  }
  0x15   :  { %s8631_s28 = smov 48  }
  0xe0   :  { %v6586_v9 = vpop.f32.mrb[0].mxu0 }
  0xe1   :  { %v7739_v10 = vadd.f32 %v6586_v9, %v6013_v8  ;;  %v143_v11 = vpop.f32.mrb[1].mxu0 }
  0xe2   :  { %v7741_v12 = vadd.f32 %v6013_v8, %v143_v11 }
  0xe4   :  { %356 = vrot.lane.b32.xlu1 %v7741_v12, %s7604_s21  ;;  %6591 = vmatprep.mubr.msk.f32.mxu1 %vm162_vm1, %v7741_v12  ;;  %v7749_v13 = vpack.i.bf16 %v7739_v10, %v7741_v12 }
  0xe6   :  { %7209 = vrot.lane.b32.xlu0 %v7749_v13, %s7605_s22 }
  0xe8   :  { %358 = vrot.lane.b32.xlu1 %v7739_v10, %s7604_s21 }
  0xea   :  { %7214 = vrot.lane.b32.xlu0 %v7749_v13, %s7606_s23 }
  0xec   :  { %725 = vrot.lane.b32.xlu1 %v7741_v12, %s7607_s24 }
  0xee   :  { %7219 = vrot.lane.b32.xlu0 %v7749_v13, %s7608_s25 }
  0xf2   :  { %727 = vrot.lane.b32.xlu0 %v7739_v10, %s7607_s24 }
 0x156   :  { %v357_v24 = vpop.permute.xlu1 %356 }
 0x158   :  { %v7210_v14 = vpop.permute.xlu0 %7209 }
 0x159   :  { %v7212_v15 = vunpack.i.h.bf16 %v7210_v14  ;;  %v7211_v16 = vunpack.i.l.bf16 %v7210_v14 }
 0x15a   :  { %v359_v28 = vpop.permute.xlu1 %358 }
 0x15b   :  { %v6977_v18 = vpack.c.bf16 %v7212_v15, %v7211_v16 }
 0x15c   :  { %v7215_v19 = vpop.permute.xlu0 %7214 }
 0x15d   :  { %v7217_v20 = vunpack.i.h.bf16 %v7215_v19  ;;  %v7216_v21 = vunpack.i.l.bf16 %v7215_v19  ;;  %6979 = vmatprep.subr.msk.bf16.mxu1 %vm7765_vm2, %v6977_v18 }
 0x15e   :  { %6982 = vmatpush3.bf16.xpose.msk.msra.mxu1 %vm7765_vm2, %v6977_v18  ;;  %v726_v29 = vpop.permute.xlu1 %725 }
 0x15f   :  { %v6987_v22 = vpack.c.bf16 %v7217_v20, %v7216_v21 }
 0x160   :  { %v7220_v23 = vpop.permute.xlu0 %7219 }
 0x161   :  { %v7222_v25 = vunpack.i.h.bf16 %v7220_v23  ;;  %v7221_v26 = vunpack.i.l.bf16 %v7220_v23  ;;  %6989 = vmatprep.subr.msk.bf16.mxu1 %vm7765_vm2, %v6987_v22 }
 0x163   :  { %v6997_v27 = vpack.c.bf16 %v7222_v25, %v7221_v26 }
 0x164   :  { %v728_v30 = vpop.permute.xlu0 %727 }
 0x165   :  { %6592 = vmatmul.mubr.msk.f32.vlgmr.msra.gmra.mrb[0].mxu1 %vm162_vm1, %v7739_v10 }
 0x166   :  { %6992 = vmatpush3.bf16.xpose.msk.msra.mxu1 %vm7765_vm2, %v6987_v22  ;;  %6605 = vmatprep.mubr.msk.f32.mxu1 %vm162_vm1, %v357_v24 }
 0x167   :  { %6999 = vmatprep.subr.msk.bf16.mxu1 %vm7765_vm2, %v6997_v27 }
 0x16d   :  { %6606 = vmatmul.mubr.msk.f32.vlgmr.msra.gmra.mrb[2].mxu1 %vm162_vm1, %v359_v28 }
 0x16e   :  { %7002 = vmatpush3.bf16.xpose.msk.msra.mxu1 %vm7765_vm2, %v6997_v27  ;;  %6629 = vmatprep.mubr.msk.f32.mxu1 %vm162_vm1, %v726_v29 }
 0x175   :  { %6630 = vmatmul.mubr.msk.f32.vlgmr.msra.gmra.mrb[4].mxu1 %vm162_vm1, %v728_v30 }
 0x238   :  { %v6593_v33 = vpop.f32.mrb[0].mxu1 }
 0x239   :  { %v243_v34 = vadd.f32 %v6593_v33, %v7790_v31  ;;  %v237_v35 = vpop.f32.mrb[1].mxu1 }
 0x23a   :  { %v238_v36 = vadd.f32 %v237_v35, %v7795_v32 }
 0x23b   :  { %v250_v37 = vsel %vm246_vm3, %v243_v34, -inf }
 0x23c   :  { %251 = vmax.xlane.f32.xlu0 %v250_v37  ;;  %v247_v38 = vsel %vm246_vm3, %v238_v36, -inf }
 0x23d   :  { %248 = vmax.xlane.f32.xlu1 %v247_v38 }
 0x240   :  { %v6607_v39 = vpop.f32.mrb[2].mxu1 }
 0x241   :  { %v444_v40 = vadd.f32 %v6607_v39, %v7790_v31  ;;  %v438_v41 = vpop.f32.mrb[3].mxu1 }
 0x242   :  { %v439_v42 = vadd.f32 %v438_v41, %v7795_v32 }
 0x243   :  { %v450_v43 = vsel %vm246_vm3, %v444_v40, -inf }
 0x244   :  { %451 = vmax.xlane.f32.xlu1 %v450_v43  ;;  %v447_v44 = vsel %vm246_vm3, %v439_v42, -inf }
 0x245   :  { %448 = vmax.xlane.f32.xlu0 %v447_v44 }
 0x248   :  { %v6631_v45 = vpop.f32.mrb[4].mxu1 }
 0x249   :  { %v807_v46 = vpop.f32.mrb[5].mxu1  ;;  %v813_v4 = vadd.f32 %v6631_v45, %v7790_v31 }
 0x24a   :  { %v808_v3 = vadd.f32 %v807_v46, %v7795_v32 }
 0x24b   :  { %v819_v6 = vsel %vm246_vm3, %v813_v4, -inf }
 0x24c   :  { %v816_v5 = vsel %vm246_vm3, %v808_v3, -inf }
 0x2c9   :  { %v252_v47 = vpop.xlane.xlu0 %251 }
 0x2ca   :  { %v254_v48 = vsub.f32 %v243_v34, %v252_v47  ;;  %v249_v49 = vpop.xlane.xlu1 %248 }
 0x2cb   :  { %v253_v50 = vsub.f32 %v238_v36, %v249_v49 }
 0x2cc   :  { %v257_v51 = vmul.f32 1.442695, %v254_v48 }
 0x2cd   :  { %v255_v52 = vmul.f32 1.442695, %v253_v50 }
 0x2ce   :  { %7432 = vpow2.f32 %v257_v51  ;;  %v152_v51 = vld [vmem:[%s8610_s4] sm:$0xff] }
 0x2cf   :  { %7434 = vpow2.f32 %v255_v52  ;;  %v557_v52 = vrot.slane %v152_v51, 4 }
 0x2d1   :  { %v452_v53 = vpop.xlane.xlu1 %451 }
 0x2d2   :  { %v454_v54 = vsub.f32 %v444_v40, %v452_v53  ;;  %v449_v55 = vpop.xlane.xlu0 %448 }
 0x2d3   :  { %v453_v56 = vsub.f32 %v439_v42, %v449_v55 }
 0x2d4   :  { %v457_v57 = vmul.f32 1.442695, %v454_v54 }
 0x2d5   :  { %v455_v58 = vmul.f32 1.442695, %v453_v56 }
 0x2d6   :  { %7436 = vpow2.f32 %v457_v57 }
 0x2d7   :  { %7438 = vpow2.f32 %v455_v58 }
 0x2d8   :  { %v7433_v59 = vpop.eup %7432 }
 0x2d9   :  { %v7435_v60 = vpop.eup %7434  ;;  %v262_v61 = vsel %vm246_vm3, %v7433_v59, 0.0 }
 0x2da   :  { %263 = vadd.xlane.f32.xlu1 %v262_v61  ;;  %v259_v62 = vsel %vm246_vm3, %v7435_v60, 0.0 }
 0x2db   :  { %260 = vadd.xlane.f32.xlu0 %v259_v62 }
 0x2e0   :  { %v7807_v63 = vpop.eup %7436 }
 0x2e1   :  { %v7439_v0 = vpop.eup %7438  ;;  %v462_v1 = vsel %vm246_vm3, %v7807_v63, 0.0 }
 0x2e2   :  { %463 = vadd.xlane.f32.xlu1 %v462_v1  ;;  %v459_v2 = vsel %vm246_vm3, %v7439_v0, 0.0 }
 0x2e3   :  { %460 = vadd.xlane.f32.xlu0 %v459_v2 }
 0x2f3   :  { %7229 = vrot.lane.b32.xlu1 %v7749_v13, %s8644_s30  ;;  %s8661_s30 = smov 72  }
 0x2f7   :  { %7234 = vrot.lane.b32.xlu1 %v7749_v13, %s8645_s17 }
 0x2f9   :  { %7224 = vrot.lane.b32.xlu0 %v7749_v13, %s7611_s18 }
 0x2fb   :  { %1013 = vrot.lane.b32.xlu1 %v7739_v10, %s8642_s19 }
 0x2fd   :  { %1011 = vrot.lane.b32.xlu0 %v7741_v12, %s8642_s19  ;;  %s8657_s19 = smov 108  }
 0x31c   :  { %817 = vmax.xlane.f32.xlu0 %v816_v5 }
 0x31f   :  { %820 = vmax.xlane.f32.xlu1 %v819_v6 }
 0x330   :  { %7239 = vrot.lane.b32.xlu1 %v7749_v13, %s8641_s20  ;;  %s8658_s20 = smov 76  }
 0x334   :  { %1297 = vrot.lane.b32.xlu1 %v7741_v12, %s8625_s26 }
 0x338   :  { %1299 = vrot.lane.b32.xlu1 %v7739_v10, %s8625_s26  ;;  %s8632_s26 = smov 108  }
 0x367   :  { %v264_v8 = vpop.xlane.xlu1 %263 }
 0x368   :  { %v261_v7 = vpop.xlane.xlu0 %260 }
 0x369   :  { %7440 = vrcp.f32 %v261_v7 }
 0x36a   :  { %7442 = vrcp.f32 %v264_v8 }
 0x36f   :  { %v464_v9 = vpop.xlane.xlu1 %463 }
 0x370   :  { %v461_v11 = vpop.xlane.xlu0 %460 }
 0x371   :  { %7444 = vrcp.f32 %v461_v11 }
 0x372   :  { %7446 = vrcp.f32 %v464_v9 }
 0x373   :  { %v7441_v14 = vpop.eup %7440  ;;  %v7230_v15 = vpop.permute.xlu1 %7229 }
 0x374   :  { %v7225_v16 = vpop.permute.xlu0 %7224  ;;  %v267_v18 = vmul.f32 %v7441_v14, %v7435_v60  ;;  %v7232_v19 = vunpack.i.h.bf16 %v7230_v15  ;;  %v7231_v20 = vunpack.i.l.bf16 %v7230_v15  ;;  %v7443_v25 = vpop.eup %7442 }
 0x375   :  { %v7227_v21 = vunpack.i.h.bf16 %v7225_v16  ;;  %v7226_v22 = vunpack.i.l.bf16 %v7225_v16  ;;  %v268_v34 = vmul.f32 %v7443_v25, %v7433_v59  ;;  %v7875_v16 = vld [vmem:[%s8610_s4 + $0x8] sm:$0xff] }
 0x376   :  { %6598 = vmatprep.mubr.msk.f32.mxu0 %vm246_vm3, %v267_v18  ;;  %v6993_v29 = vpack.c.bf16 %v7232_v19, %v7231_v20 }
 0x377   :  { %v7235_v23 = vpop.permute.xlu1 %7234  ;;  %v6983_v24 = vpack.c.bf16 %v7227_v21, %v7226_v22 }
 0x378   :  { %v7237_v26 = vunpack.i.h.bf16 %v7235_v23  ;;  %v7236_v27 = vunpack.i.l.bf16 %v7235_v23  ;;  %v1012_v28 = vpop.permute.xlu0 %1011 }
 0x379   :  { %6984 = vmatprep.subr.bf16.mxu0 %v6983_v24  ;;  %6648 = vmatprep.mubr.msk.f32.mxu1 %vm162_vm1, %v1012_v28 }
 0x37a   :  { %v7007_v30 = vpack.c.bf16 %v7237_v26, %v7236_v27  ;;  %6986 = vmatpush3.bf16.msra.mxu0 %v6983_v24 }
 0x37b   :  { %v7445_v33 = vpop.eup %7444  ;;  %6994 = vmatprep.subr.bf16.mxu0 %v6993_v29  ;;  %v1014_v38 = vpop.permute.xlu1 %1013 }
 0x37c   :  { %v7447_v35 = vpop.eup %7446  ;;  %7009 = vmatprep.subr.msk.bf16.mxu1 %vm7765_vm2, %v7007_v30  ;;  %v467_v36 = vmul.f32 %v7445_v33, %v7439_v0 }
 0x37d   :  { %6599 = vmatmul.mubr.msk.f32.vlgmr.msra.gmra.mrb[2].mxu0 %vm246_vm3, %v268_v34  ;;  %7012 = vmatpush3.bf16.xpose.msk.msra.mxu1 %vm7765_vm2, %v7007_v30  ;;  %v468_v37 = vmul.f32 %v7447_v35, %v7807_v63 }
 0x37e   :  { %6996 = vmatpush3.bf16.msra.mxu0 %v6993_v29  ;;  %6612 = vmatprep.mubr.msk.f32.mxu0 %vm246_vm3, %v467_v36 }
 0x37f   :  { %6615 = vmatprep.subr.msk.mxu0 %vm564_vm4, %v557_v52 }
 0x381   :  { %6613 = vmatmul.mubr.msk.f32.vlgmr.msra.gmra.mrb[4].mxu0 %vm246_vm3, %v468_v37 }
 0x382   :  { %6616 = vmatpush3.msk.msra.mxu0 %vm564_vm4, %v557_v52 }
 0x383   :  { %6620 = vmatprep.subr.msk.mxu0 %vm564_vm4, %v152_v51 }
 0x384   :  { %6649 = vmatmul.mubr.msk.f32.vlgmr.msra.gmra.mrb[6].mxu1 %vm162_vm1, %v1014_v38 }
 0x3a9   :  { %v818_v39 = vpop.xlane.xlu0 %817 }
 0x3aa   :  { %v822_v40 = vsub.f32 %v808_v3, %v818_v39 }
 0x3ac   :  { %v824_v41 = vmul.f32 1.442695, %v822_v40  ;;  %v821_v42 = vpop.xlane.xlu1 %820 }
 0x3ad   :  { %v823_v43 = vsub.f32 %v813_v4, %v821_v42  ;;  %v1211_v42 = vrot.slane %v7875_v16, 4 }
 0x3ae   :  { %7448 = vpow2.f32 %v824_v41 }
 0x3af   :  { %v826_v44 = vmul.f32 1.442695, %v823_v43 }
 0x3b0   :  { %v7240_v45 = vpop.permute.xlu1 %7239 }
 0x3b1   :  { %7450 = vpow2.f32 %v826_v44  ;;  %v7242_v61 = vunpack.i.h.bf16 %v7240_v45  ;;  %v7241_v62 = vunpack.i.l.bf16 %v7240_v45 }
 0x3b3   :  { %v7003_v2 = vpack.c.bf16 %v7242_v61, %v7241_v62 }
 0x3b4   :  { %v1298_v46 = vpop.permute.xlu1 %1297 }
 0x3b5   :  { %6667 = vmatprep.mubr.msk.f32.mxu1 %vm162_vm1, %v1298_v46 }
 0x3b8   :  { %v7449_v47 = vpop.eup %7448  ;;  %v1300_v8 = vpop.permute.xlu1 %1299 }
 0x3b9   :  { %v828_v48 = vsel %vm246_vm3, %v7449_v47, 0.0 }
 0x3ba   :  { %829 = vadd.xlane.f32.xlu0 %v828_v48 }
 0x3bb   :  { %v7451_v49 = vpop.eup %7450 }
 0x3bc   :  { %v831_v50 = vsel %vm246_vm3, %v7451_v49, 0.0 }
 0x3be   :  { %832 = vadd.xlane.f32.xlu0 %v831_v50 }
 0x3d4   :  { %7244 = vrot.lane.b32.xlu0 %v7749_v13, %s8624_s29  ;;  %s8627_s29 = smov 76  }
 0x447   :  { %v830_v53 = vpop.xlane.xlu0 %829 }
 0x448   :  { %7452 = vrcp.f32 %v830_v53 }
 0x44b   :  { %v833_v54 = vpop.xlane.xlu0 %832 }
 0x44c   :  { %7454 = vrcp.f32 %v833_v54 }
 0x44f   :  { %v7245_v55 = vpop.permute.xlu0 %7244 }
 0x450   :  { %v7247_v56 = vunpack.i.h.bf16 %v7245_v55  ;;  %v7246_v57 = vunpack.i.l.bf16 %v7245_v55  ;;  %v6600_v58 = vpop.f32.mrb[2].mxu0 }
 0x451   :  { %v347_v59 = vpop.f32.mrb[3].mxu0 }
 0x452   :  { %v7017_v60 = vpack.c.bf16 %v7247_v56, %v7246_v57  ;;  %v7453_v7 = vpop.eup %7452 }
 0x453   :  { %v836_v14 = vmul.f32 %v7453_v7, %v7449_v47 }
 0x454   :  { %v6614_v63 = vpop.f32.mrb[4].mxu0  ;;  %7019 = vmatprep.subr.msk.bf16.mxu1 %vm7765_vm2, %v7017_v60 }
 0x455   :  { %v547_v0 = vpop.f32.mrb[5].mxu0  ;;  %7022 = vmatpush3.bf16.xpose.msk.msra.mxu1 %vm7765_vm2, %v7017_v60 }
 0x456   :  { %6617 = vmatprep.mubr.msk.f32.mxu0 %vm162_vm1, %v547_v0  ;;  %v7455_v11 = vpop.eup %7454 }
 0x457   :  { %6618 = vmatmul.mubr.msk.f32.vlgmr.msra.gmra.mrb[6].mxu0 %vm162_vm1, %v6614_v63  ;;  %v6650_v1 = vpop.f32.mrb[6].mxu1  ;;  %v837_v15 = vmul.f32 %v7455_v11, %v7451_v49 }
 0x458   :  { %6621 = vmatpush3.msk.msra.mxu0 %vm564_vm4, %v152_v51  ;;  %v1099_v3 = vadd.f32 %v6650_v1, %v7790_v31  ;;  %6622 = vmatprep.mubr.msk.f32.mxu0 %vm162_vm1, %v347_v59  ;;  %v1093_v4 = vpop.f32.mrb[7].mxu1 }
 0x459   :  { %7004 = vmatprep.subr.bf16.mxu0 %v7003_v2  ;;  %v1094_v5 = vadd.f32 %v1093_v4, %v7795_v32 }
 0x45a   :  { %v1105_v6 = vsel %vm246_vm3, %v1099_v3, -inf }
 0x45b   :  { %1106 = vmax.xlane.f32.xlu1 %v1105_v6  ;;  %v1102_v9 = vsel %vm246_vm3, %v1094_v5, -inf }
 0x45c   :  { %6668 = vmatmul.mubr.msk.f32.vlgmr.msra.gmra.mrb[8].mxu1 %vm162_vm1, %v1300_v8  ;;  %1103 = vmax.xlane.f32.xlu0 %v1102_v9 }
 0x45f   :  { %6623 = vmatmul.mubr.msk.f32.vlgmr.msra.gmra.mrb[6].mxu0 %vm162_vm1, %v6600_v58 }
 0x460   :  { %7006 = vmatpush3.bf16.msra.mxu0 %v7003_v2  ;;  %6636 = vmatprep.mubr.msk.f32.mxu0 %vm246_vm3, %v836_v14 }
 0x461   :  { %6639 = vmatprep.subr.msk.mxu0 %vm564_vm4, %v7875_v16 }
 0x463   :  { %6637 = vmatmul.mubr.msk.f32.vlgmr.msra.gmra.mrb[8].mxu0 %vm246_vm3, %v837_v15 }
 0x464   :  { %6640 = vmatpush3.msk.msra.mxu0 %vm564_vm4, %v7875_v16 }
 0x46c   :  { %7249 = vrot.lane.b32.xlu1 %v7749_v13, %s8634_s27  ;;  %s8638_s27 = smov 100  }
 0x470   :  { %1583 = vrot.lane.b32.xlu1 %v7741_v12, %s8632_s26 }
 0x474   :  { %1585 = vrot.lane.b32.xlu1 %v7739_v10, %s8632_s26  ;;  %s8635_s26 = smov 68  }
 0x4e8   :  { %v1107_v18 = vpop.xlane.xlu1 %1106 }
 0x4e9   :  { %v1109_v19 = vsub.f32 %v1099_v3, %v1107_v18  ;;  %v1104_v20 = vpop.xlane.xlu0 %1103 }
 0x4ea   :  { %v1108_v21 = vsub.f32 %v1094_v5, %v1104_v20 }
 0x4eb   :  { %v1112_v22 = vmul.f32 1.442695, %v1109_v19 }
 0x4ec   :  { %v1110_v23 = vmul.f32 1.442695, %v1108_v21  ;;  %v7250_v24 = vpop.permute.xlu1 %7249 }
 0x4ed   :  { %v7252_v25 = vunpack.i.h.bf16 %v7250_v24  ;;  %v7251_v26 = vunpack.i.l.bf16 %v7250_v24 }
 0x4ee   :  { %7456 = vpow2.f32 %v1110_v23 }
 0x4ef   :  { %v7013_v27 = vpack.c.bf16 %v7252_v25, %v7251_v26  ;;  %7458 = vpow2.f32 %v1112_v22 }
 0x4f0   :  { %v1584_v28 = vpop.permute.xlu1 %1583 }
 0x4f1   :  { %7014 = vmatprep.subr.bf16.mxu0 %v7013_v27  ;;  %6686 = vmatprep.mubr.msk.f32.mxu1 %vm162_vm1, %v1584_v28 }
 0x4f4   :  { %v1586_v54 = vpop.permute.xlu1 %1585 }
 0x4f8   :  { %v7457_v29 = vpop.eup %7456 }
 0x4f9   :  { %v1114_v30 = vsel %vm246_vm3, %v7457_v29, 0.0  ;;  %v7459_v33 = vpop.eup %7458 }
 0x4fa   :  { %1115 = vadd.xlane.f32.xlu0 %v1114_v30  ;;  %v1117_v34 = vsel %vm246_vm3, %v7459_v33, 0.0 }
 0x4fe   :  { %1118 = vadd.xlane.f32.xlu0 %v1117_v34 }
 0x514   :  { %7254 = vrot.lane.b32.xlu0 %v7749_v13, %s8627_s29  ;;  %s8628_s29 = smov 104  }
 0x52f   :  { %v6669_v35 = vpop.f32.mrb[8].mxu1 }
 0x530   :  { %v1385_v36 = vadd.f32 %v6669_v35, %v7790_v31  ;;  %v1379_v37 = vpop.f32.mrb[9].mxu1 }
 0x531   :  { %v1380_v38 = vadd.f32 %v1379_v37, %v7795_v32 }
 0x532   :  { %v1391_v39 = vsel %vm246_vm3, %v1385_v36, -inf }
 0x533   :  { %1392 = vmax.xlane.f32.xlu1 %v1391_v39  ;;  %v1388_v40 = vsel %vm246_vm3, %v1380_v38, -inf }
 0x534   :  { %1389 = vmax.xlane.f32.xlu0 %v1388_v40 }
 0x536   :  { %v6638_v41 = vpop.f32.mrb[8].mxu0 }
 0x537   :  { %v916_v43 = vpop.f32.mrb[9].mxu0 }
 0x538   :  { %6641 = vmatprep.mubr.msk.f32.mxu0 %vm162_vm1, %v916_v43 }
 0x539   :  { %6642 = vmatmul.mubr.msk.f32.vlgmr.msra.gmra.mrb[6].mxu0 %vm162_vm1, %v6638_v41 }
 0x53a   :  { %7016 = vmatpush3.bf16.msra.mxu0 %v7013_v27 }
 0x53b   :  { %6658 = vmatprep.subr.msk.mxu0 %vm564_vm4, %v1211_v42 }
 0x544   :  { %7259 = vrot.lane.b32.xlu1 %v7749_v13, %s8631_s28  ;;  %s8637_s28 = smov 40  }
 0x548   :  { %1869 = vrot.lane.b32.xlu1 %v7741_v12, %s8628_s29 }
 0x54c   :  { %1871 = vrot.lane.b32.xlu1 %v7739_v10, %s8628_s29  ;;  %s8630_s29 = smov 72  }
 0x587   :  { %v1116_v44 = vpop.xlane.xlu0 %1115 }
 0x588   :  { %7460 = vrcp.f32 %v1116_v44 }
 0x58b   :  { %v1119_v45 = vpop.xlane.xlu0 %1118 }
 0x58c   :  { %7462 = vrcp.f32 %v1119_v45 }
 0x58f   :  { %v7255_v46 = vpop.permute.xlu0 %7254 }
 0x590   :  { %v7257_v47 = vunpack.i.h.bf16 %v7255_v46  ;;  %v7256_v48 = vunpack.i.l.bf16 %v7255_v46 }
 0x592   :  { %v7461_v49 = vpop.eup %7460  ;;  %v7027_v50 = vpack.c.bf16 %v7257_v47, %v7256_v48 }
 0x593   :  { %v1122_v51 = vmul.f32 %v7461_v49, %v7457_v29  ;;  %v7935_v29 = vld [vmem:[%s8610_s4 + $0x10] sm:$0xff] }
 0x594   :  { %7029 = vmatprep.subr.msk.bf16.mxu1 %vm7765_vm2, %v7027_v50  ;;  %v1783_v46 = vrot.slane %v7935_v29, 4 }
 0x595   :  { %6655 = vmatprep.mubr.msk.f32.mxu0 %vm246_vm3, %v1122_v51  ;;  %7032 = vmatpush3.bf16.xpose.msk.msra.mxu1 %vm7765_vm2, %v7027_v50 }
 0x596   :  { %v7463_v52 = vpop.eup %7462 }
 0x597   :  { %v1123_v53 = vmul.f32 %v7463_v52, %v7459_v33 }
 0x599   :  { %6656 = vmatmul.mubr.msk.f32.vlgmr.msra.gmra.mrb[10].mxu0 %vm246_vm3, %v1123_v53 }
 0x59a   :  { %6659 = vmatpush3.msk.msra.mxu0 %vm564_vm4, %v1211_v42 }
 0x59c   :  { %6687 = vmatmul.mubr.msk.f32.vlgmr.msra.gmra.mrb[10].mxu1 %vm162_vm1, %v1586_v54 }
 0x5c0   :  { %v1393_v55 = vpop.xlane.xlu1 %1392 }
 0x5c1   :  { %v1395_v56 = vsub.f32 %v1385_v36, %v1393_v55  ;;  %v1390_v57 = vpop.xlane.xlu0 %1389 }
 0x5c2   :  { %v1394_v58 = vsub.f32 %v1380_v38, %v1390_v57 }
 0x5c3   :  { %v1398_v59 = vmul.f32 1.442695, %v1395_v56 }
 0x5c4   :  { %v1396_v60 = vmul.f32 1.442695, %v1394_v58  ;;  %v7260_v61 = vpop.permute.xlu1 %7259 }
 0x5c5   :  { %v7262_v62 = vunpack.i.h.bf16 %v7260_v61  ;;  %v7261_v63 = vunpack.i.l.bf16 %v7260_v61 }
 0x5c6   :  { %7464 = vpow2.f32 %v1396_v60 }
 0x5c7   :  { %v7023_v0 = vpack.c.bf16 %v7262_v62, %v7261_v63  ;;  %7466 = vpow2.f32 %v1398_v59 }
 0x5c8   :  { %v1870_v1 = vpop.permute.xlu1 %1869 }
 0x5c9   :  { %7024 = vmatprep.subr.bf16.mxu0 %v7023_v0  ;;  %6705 = vmatprep.mubr.msk.f32.mxu1 %vm162_vm1, %v1870_v1 }
 0x5cc   :  { %v1872_v27 = vpop.permute.xlu1 %1871 }
 0x5d0   :  { %v7465_v2 = vpop.eup %7464 }
 0x5d1   :  { %v1400_v3 = vsel %vm246_vm3, %v7465_v2, 0.0  ;;  %v7467_v4 = vpop.eup %7466 }
 0x5d2   :  { %1401 = vadd.xlane.f32.xlu0 %v1400_v3  ;;  %v1403_v5 = vsel %vm246_vm3, %v7467_v4, 0.0 }
 0x5d6   :  { %1404 = vadd.xlane.f32.xlu0 %v1403_v5 }
 0x5ec   :  { %7264 = vrot.lane.b32.xlu0 %v7749_v13, %s8630_s29  ;;  %s8640_s29 = smov 44  }
 0x65f   :  { %v1402_v6 = vpop.xlane.xlu0 %1401 }
 0x660   :  { %7468 = vrcp.f32 %v1402_v6 }
 0x663   :  { %v1405_v7 = vpop.xlane.xlu0 %1404 }
 0x664   :  { %7470 = vrcp.f32 %v1405_v7 }
 0x667   :  { %v7265_v8 = vpop.permute.xlu0 %7264 }
 0x668   :  { %v7267_v9 = vunpack.i.h.bf16 %v7265_v8  ;;  %v7266_v11 = vunpack.i.l.bf16 %v7265_v8 }
 0x66a   :  { %v7037_v14 = vpack.c.bf16 %v7267_v9, %v7266_v11  ;;  %v7469_v15 = vpop.eup %7468 }
 0x66b   :  { %v1408_v20 = vmul.f32 %v7469_v15, %v7465_v2 }
 0x66c   :  { %v6657_v16 = vpop.f32.mrb[10].mxu0  ;;  %7039 = vmatprep.subr.msk.bf16.mxu1 %vm7765_vm2, %v7037_v14 }
 0x66d   :  { %v1202_v18 = vpop.f32.mrb[11].mxu0  ;;  %7042 = vmatpush3.bf16.xpose.msk.msra.mxu1 %vm7765_vm2, %v7037_v14 }
 0x66e   :  { %v7471_v19 = vpop.eup %7470  ;;  %6660 = vmatprep.mubr.msk.f32.mxu0 %vm162_vm1, %v1202_v18 }
 0x66f   :  { %6661 = vmatmul.mubr.msk.f32.vlgmr.msra.gmra.mrb[6].mxu0 %vm162_vm1, %v6657_v16  ;;  %v6688_v21 = vpop.f32.mrb[10].mxu1  ;;  %v1409_v25 = vmul.f32 %v7471_v19, %v7467_v4 }
 0x670   :  { %7026 = vmatpush3.bf16.msra.mxu0 %v7023_v0  ;;  %v1671_v22 = vadd.f32 %v6688_v21, %v7790_v31  ;;  %6674 = vmatprep.mubr.msk.f32.mxu0 %vm246_vm3, %v1408_v20  ;;  %v1665_v23 = vpop.f32.mrb[11].mxu1 }
 0x671   :  { %v1666_v24 = vadd.f32 %v1665_v23, %v7795_v32  ;;  %6677 = vmatprep.subr.msk.mxu0 %vm564_vm4, %v7935_v29 }
 0x672   :  { %v1677_v26 = vsel %vm246_vm3, %v1671_v22, -inf }
 0x673   :  { %1678 = vmax.xlane.f32.xlu1 %v1677_v26  ;;  %6675 = vmatmul.mubr.msk.f32.vlgmr.msra.gmra.mrb[12].mxu0 %vm246_vm3, %v1409_v25  ;;  %v1674_v28 = vsel %vm246_vm3, %v1666_v24, -inf  ;;  %v155_v26 = vld [vmem:[%s8610_s4 + $0x18] sm:$0xff] }
 0x674   :  { %6706 = vmatmul.mubr.msk.f32.vlgmr.msra.gmra.mrb[12].mxu1 %vm162_vm1, %v1872_v27  ;;  %1675 = vmax.xlane.f32.xlu0 %v1674_v28 }
 0x675   :  { %6678 = vmatpush3.msk.msra.mxu0 %vm564_vm4, %v7935_v29 }
 0x684   :  { %7269 = vrot.lane.b32.xlu1 %v7749_v13, %s8640_s29 }
 0x688   :  { %2155 = vrot.lane.b32.xlu1 %v7741_v12, %s8638_s27 }
 0x68c   :  { %2157 = vrot.lane.b32.xlu1 %v7739_v10, %s8638_s27  ;;  %s8659_s27 = smov 48  }
 0x700   :  { %v1679_v30 = vpop.xlane.xlu1 %1678 }
 0x701   :  { %v1681_v33 = vsub.f32 %v1671_v22, %v1679_v30  ;;  %v1676_v34 = vpop.xlane.xlu0 %1675 }
 0x702   :  { %v1680_v35 = vsub.f32 %v1666_v24, %v1676_v34 }
 0x703   :  { %v1684_v36 = vmul.f32 1.442695, %v1681_v33 }
 0x704   :  { %v1682_v37 = vmul.f32 1.442695, %v1680_v35  ;;  %v7270_v38 = vpop.permute.xlu1 %7269 }
 0x705   :  { %v7272_v39 = vunpack.i.h.bf16 %v7270_v38  ;;  %v7271_v40 = vunpack.i.l.bf16 %v7270_v38 }
 0x706   :  { %7472 = vpow2.f32 %v1682_v37 }
 0x707   :  { %v7033_v12 = vpack.c.bf16 %v7272_v39, %v7271_v40  ;;  %7474 = vpow2.f32 %v1684_v36 }
 0x708   :  { %v2156_v41 = vpop.permute.xlu1 %2155 }
 0x709   :  { %7034 = vmatprep.subr.bf16.mxu0 %v7033_v12  ;;  %6724 = vmatprep.mubr.msk.f32.mxu1 %vm162_vm1, %v2156_v41 }
 0x70c   :  { %v2158_v63 = vpop.permute.xlu1 %2157 }
 0x710   :  { %v7473_v42 = vpop.eup %7472 }
 0x711   :  { %v1686_v43 = vsel %vm246_vm3, %v7473_v42, 0.0  ;;  %v7475_v10 = vpop.eup %7474 }
 0x712   :  { %1687 = vadd.xlane.f32.xlu0 %v1686_v43  ;;  %v1689_v44 = vsel %vm246_vm3, %v7475_v10, 0.0 }
 0x716   :  { %1690 = vadd.xlane.f32.xlu0 %v1689_v44 }
 0x72c   :  { %7274 = vrot.lane.b32.xlu0 %v7749_v13, %s8635_s26  ;;  %s8636_s26 = smov 36  }
 0x746   :  { %v6676_v45 = vpop.f32.mrb[12].mxu0 }
 0x747   :  { %v1488_v47 = vpop.f32.mrb[13].mxu0  ;;  %v6707_v48 = vpop.f32.mrb[12].mxu1 }
 0x748   :  { %v1957_v49 = vadd.f32 %v6707_v48, %v7790_v31  ;;  %6679 = vmatprep.mubr.msk.f32.mxu0 %vm162_vm1, %v1488_v47  ;;  %v1951_v50 = vpop.f32.mrb[13].mxu1 }
 0x749   :  { %v1952_v51 = vadd.f32 %v1951_v50, %v7795_v32  ;;  %6680 = vmatmul.mubr.msk.f32.vlgmr.msra.gmra.mrb[6].mxu0 %vm162_vm1, %v6676_v45 }
 0x74a   :  { %7036 = vmatpush3.bf16.msra.mxu0 %v7033_v12  ;;  %v1963_v52 = vsel %vm246_vm3, %v1957_v49, -inf }
 0x74b   :  { %1964 = vmax.xlane.f32.xlu1 %v1963_v52  ;;  %v1960_v53 = vsel %vm246_vm3, %v1952_v51, -inf  ;;  %6696 = vmatprep.subr.msk.mxu0 %vm564_vm4, %v1783_v46 }
 0x74c   :  { %1961 = vmax.xlane.f32.xlu0 %v1960_v53 }
 0x75c   :  { %7279 = vrot.lane.b32.xlu1 %v7749_v13, %s8637_s28  ;;  %s8656_s28 = smov 52  }
 0x760   :  { %7284 = vrot.lane.b32.xlu1 %v7749_v13, %s8636_s26  ;;  %s8655_s26 = smov 80  }
 0x79f   :  { %v1688_v54 = vpop.xlane.xlu0 %1687 }
 0x7a0   :  { %7476 = vrcp.f32 %v1688_v54 }
 0x7a3   :  { %v1691_v55 = vpop.xlane.xlu0 %1690 }
 0x7a4   :  { %7478 = vrcp.f32 %v1691_v55 }
 0x7a7   :  { %v7275_v56 = vpop.permute.xlu0 %7274 }
 0x7a8   :  { %v7277_v57 = vunpack.i.h.bf16 %v7275_v56  ;;  %v7276_v58 = vunpack.i.l.bf16 %v7275_v56  ;;  %v6088_v56 = vld [vmem:[%s8611_s5] ss:$0 sm:$0xff] }
 0x7aa   :  { %v7477_v59 = vpop.eup %7476  ;;  %v7047_v60 = vpack.c.bf16 %v7277_v57, %v7276_v58 }
 0x7ab   :  { %v1694_v61 = vmul.f32 %v7477_v59, %v7473_v42 }
 0x7ac   :  { %7049 = vmatprep.subr.msk.bf16.mxu1 %vm7765_vm2, %v7047_v60 }
 0x7ad   :  { %6693 = vmatprep.mubr.msk.f32.mxu0 %vm246_vm3, %v1694_v61  ;;  %7052 = vmatpush3.bf16.xpose.msk.msra.mxu1 %vm7765_vm2, %v7047_v60  ;;  %v7576_v61 = vld [vmem:[%s8647_s0 + $0x8] sm:$0xff] }
 0x7ae   :  { %v7479_v62 = vpop.eup %7478 }
 0x7af   :  { %v1695_v13 = vmul.f32 %v7479_v62, %v7475_v10 }
 0x7b1   :  { %6694 = vmatmul.mubr.msk.f32.vlgmr.msra.gmra.mrb[14].mxu0 %vm246_vm3, %v1695_v13  ;;  %v7577_v13 = vld [vmem:[%s8647_s0] sm:$0xff] }
 0x7b2   :  { %6697 = vmatpush3.msk.msra.mxu0 %vm564_vm4, %v1783_v46  ;;  %v2355_v46 = vrot.slane %v155_v26, 4 }
 0x7b4   :  { %6725 = vmatmul.mubr.msk.f32.vlgmr.msra.gmra.mrb[14].mxu1 %vm162_vm1, %v2158_v63 }
 0x7d8   :  { %v1965_v0 = vpop.xlane.xlu1 %1964 }
 0x7d9   :  { %v1967_v1 = vsub.f32 %v1957_v49, %v1965_v0  ;;  %v1962_v2 = vpop.xlane.xlu0 %1961 }
 0x7da   :  { %v1966_v3 = vsub.f32 %v1952_v51, %v1962_v2 }
 0x7db   :  { %v1970_v4 = vmul.f32 1.442695, %v1967_v1 }
 0x7dc   :  { %v1968_v5 = vmul.f32 1.442695, %v1966_v3  ;;  %v7280_v6 = vpop.permute.xlu1 %7279 }
 0x7dd   :  { %v7282_v7 = vunpack.i.h.bf16 %v7280_v6  ;;  %v7281_v8 = vunpack.i.l.bf16 %v7280_v6 }
 0x7de   :  { %7480 = vpow2.f32 %v1968_v5 }
 0x7df   :  { %v7043_v9 = vpack.c.bf16 %v7282_v7, %v7281_v8  ;;  %7482 = vpow2.f32 %v1970_v4 }
 0x7e0   :  { %v7285_v21 = vpop.permute.xlu1 %7284 }
 0x7e1   :  { %7044 = vmatprep.subr.bf16.mxu0 %v7043_v9  ;;  %v7287_v27 = vunpack.i.h.bf16 %v7285_v21  ;;  %v7286_v28 = vunpack.i.l.bf16 %v7285_v21  ;;  %v7628_v21 = vmov 0  }
 0x7e2   :  { %2590 = vmatprep.mubr.bf16.mxu1 %v7628_v21 }
 0x7e3   :  { %v7053_v35 = vpack.c.bf16 %v7287_v27, %v7286_v28 }
 0x7e8   :  { %v7481_v11 = vpop.eup %7480 }
 0x7e9   :  { %v1972_v14 = vsel %vm246_vm3, %v7481_v11, 0.0  ;;  %v7483_v15 = vpop.eup %7482 }
 0x7ea   :  { %1973 = vadd.xlane.f32.xlu0 %v1972_v14  ;;  %v1975_v16 = vsel %vm246_vm3, %v7483_v15, 0.0 }
 0x7ee   :  { %1976 = vadd.xlane.f32.xlu0 %v1975_v16  ;;  %v7370_v16 = vld [vmem:[%s8614_s8 + $0x4] ss:$12 sps:$4 sm:$0xff]  }
 0x7ef   :  { %2558 = vmatprep.subr.bf16.mxu1 %v7370_v16 }
 0x877   :  { %v1974_v18 = vpop.xlane.xlu0 %1973 }
 0x878   :  { %7484 = vrcp.f32 %v1974_v18  ;;  %v7627_v18 = vmov 0.0  }
 0x87b   :  { %v1977_v19 = vpop.xlane.xlu0 %1976 }
 0x87c   :  { %7486 = vrcp.f32 %v1977_v19  ;;  %v7371_v19 = vld [vmem:[%s8614_s8 + $0x8] ss:$12 sps:$4 sm:$0xff]  }
 0x882   :  { %v7485_v20 = vpop.eup %7484 }
 0x883   :  { %v1980_v25 = vmul.f32 %v7485_v20, %v7481_v11  ;;  %v7374_v20 = vld [vmem:[%s8614_s8 + $0x1c] ss:$12 sps:$4 sm:$0xff]  }
 0x884   :  { %v6695_v22 = vpop.f32.mrb[14].mxu0 }
 0x885   :  { %v1774_v23 = vpop.f32.mrb[15].mxu0 }
 0x886   :  { %v7487_v24 = vpop.eup %7486  ;;  %6698 = vmatprep.mubr.msk.f32.mxu0 %vm162_vm1, %v1774_v23  ;;  %v7375_v23 = vld [vmem:[%s8614_s8 + $0x20] ss:$12 sps:$4 sm:$0xff]  }
 0x887   :  { %6699 = vmatmul.mubr.msk.f32.vlgmr.msra.gmra.mrb[6].mxu0 %vm162_vm1, %v6695_v22  ;;  %v6726_v29 = vpop.f32.mrb[14].mxu1  ;;  %v1981_v33 = vmul.f32 %v7487_v24, %v7483_v15  ;;  %v7368_v15 = vld [vmem:[%s8614_s8] ss:$12 sps:$4 sm:$0xff]   ;;  %v7372_v22 = vld [vmem:[%s8614_s8 + $0x18] ss:$12 sps:$4 sm:$0xff]  }
 0x888   :  { %7046 = vmatpush3.bf16.msra.mxu0 %v7043_v9  ;;  %6712 = vmatprep.mubr.msk.f32.mxu0 %vm246_vm3, %v1980_v25  ;;  %v2237_v30 = vpop.f32.mrb[15].mxu1  ;;  %v2243_v36 = vadd.f32 %v6726_v29, %v7790_v31  ;;  %v7377_v24 = vld [vmem:[%s8616_s10 + $0x40] sm:$0xff]  }
 0x889   :  { %v2238_v34 = vadd.f32 %v2237_v30, %v7795_v32  ;;  %6715 = vmatprep.subr.msk.mxu0 %vm564_vm4, %v155_v26  ;;  %2559 = vmatpush1.bf16.msra.mxu1 %v7368_v15 }
 0x88a   :  { %v2249_v38 = vsel %vm246_vm3, %v2243_v36, -inf  ;;  %2560 = vmatprep.subr.bf16.mxu1 %v7374_v20 }
 0x88b   :  { %6713 = vmatmul.mubr.msk.f32.vlgmr.msra.gmra.mrb[16].mxu0 %vm246_vm3, %v1981_v33  ;;  %v2246_v37 = vsel %vm246_vm3, %v2238_v34, -inf }
 0x88c   :  { %6716 = vmatpush3.msk.msra.mxu0 %vm564_vm4, %v155_v26  ;;  %2247 = vmax.xlane.f32.xlu0 %v2246_v37 }
 0x88d   :  { %7054 = vmatprep.subr.bf16.mxu0 %v7053_v35  ;;  %2561 = vmatpush1.bf16.msra.mxu1 %v7372_v22 }
 0x88e   :  { %6411 = vmatprep.subr.bf16.mxu1 %v7377_v24 }
 0x890   :  { %2250 = vmax.xlane.f32.xlu0 %v2249_v38 }
 0x919   :  { %v2248_v39 = vpop.xlane.xlu0 %2247 }
 0x91a   :  { %v2252_v40 = vsub.f32 %v2238_v34, %v2248_v39  ;;  %v6090_v39 = vld [vmem:[%s8613_s7] ss:$0 sm:$0xff] }
 0x91c   :  { %v2254_v12 = vmul.f32 1.442695, %v2252_v40 }
 0x91d   :  { %v2251_v32 = vpop.xlane.xlu0 %2250 }
 0x91e   :  { %7488 = vpow2.f32 %v2254_v12  ;;  %v2253_v41 = vsub.f32 %v2243_v36, %v2251_v32 }
 0x920   :  { %v2256_v42 = vmul.f32 1.442695, %v2253_v41  ;;  %v7376_v41 = vld [vmem:[%s8616_s10 + $0x80] sm:$0xff]  }
 0x922   :  { %7490 = vpow2.f32 %v2256_v42  ;;  %v7378_v42 = vld [vmem:[%s8616_s10] sm:$0xff]  }
 0x928   :  { %v7489_v31 = vpop.eup %7488 }
 0x929   :  { %v2258_v43 = vsel %vm246_vm3, %v7489_v31, 0.0 }
 0x92a   :  { %2259 = vadd.xlane.f32.xlu0 %v2258_v43  ;;  %v7380_v43 = vld [vmem:[%s8616_s10 + $0x48] sm:$0xff]  }
 0x92c   :  { %v7491_v10 = vpop.eup %7490 }
 0x92d   :  { %v2261_v44 = vsel %vm246_vm3, %v7491_v10, 0.0 }
 0x92e   :  { %2262 = vadd.xlane.f32.xlu0 %v2261_v44  ;;  %v7381_v44 = vld [vmem:[%s8616_s10 + $0x8] sm:$0xff]  }
 0x95e   :  { %v6714_v45 = vpop.f32.mrb[16].mxu0 }
 0x95f   :  { %v2060_v47 = vpop.f32.mrb[17].mxu0 }
 0x960   :  { %6717 = vmatprep.mubr.msk.f32.mxu0 %vm162_vm1, %v2060_v47  ;;  %v7384_v47 = vld [vmem:[%s8616_s10 + $0x10] sm:$0xff]  }
 0x961   :  { %6718 = vmatmul.mubr.msk.f32.vlgmr.msra.gmra.mrb[6].mxu0 %vm162_vm1, %v6714_v45  ;;  %v7383_v45 = vld [vmem:[%s8616_s10 + $0x50] sm:$0xff]  }
 0x962   :  { %7056 = vmatpush3.bf16.msra.mxu0 %v7053_v35  ;;  %v6089_v35 = vld [vmem:[%s8612_s6] ss:$0 sm:$0xff] }
 0x963   :  { %6734 = vmatprep.subr.msk.mxu0 %vm564_vm4, %v2355_v46 }
 0x9b7   :  { %v2260_v48 = vpop.xlane.xlu0 %2259 }
 0x9b8   :  { %7492 = vrcp.f32 %v2260_v48  ;;  %v7386_v48 = vld [vmem:[%s8616_s10 + $0x58] sm:$0xff]  }
 0x9bb   :  { %v2263_v49 = vpop.xlane.xlu0 %2262 }
 0x9bc   :  { %7494 = vrcp.f32 %v2263_v49  ;;  %v7385_v49 = vld [vmem:[%s8616_s10 + $0x98] sm:$0xff]  }
 0x9c2   :  { %v7493_v50 = vpop.eup %7492 }
 0x9c3   :  { %v2266_v51 = vmul.f32 %v7493_v50, %v7489_v31  ;;  %v7387_v50 = vld [vmem:[%s8616_s10 + $0x18] sm:$0xff]  }
 0x9c5   :  { %6731 = vmatprep.mubr.msk.f32.mxu0 %vm246_vm3, %v2266_v51  ;;  %v7389_v51 = vld [vmem:[%s8616_s10 + $0x60] sm:$0xff]  }
 0x9c6   :  { %v7495_v52 = vpop.eup %7494 }
 0x9c7   :  { %v2267_v53 = vmul.f32 %v7495_v52, %v7491_v10  ;;  %v7379_v10 = vld [vmem:[%s8616_s10 + $0x88] sm:$0xff]   ;;  %v7388_v52 = vld [vmem:[%s8616_s10 + $0xa0] sm:$0xff]  }
 0x9c9   :  { %6732 = vmatmul.mubr.msk.f32.vlgmr.msra.gmra.mrb[18].mxu0 %vm246_vm3, %v2267_v53  ;;  %v7390_v53 = vld [vmem:[%s8616_s10 + $0x20] sm:$0xff]  }
 0x9ca   :  { %6735 = vmatpush3.msk.msra.mxu0 %vm564_vm4, %v2355_v46  ;;  %v7382_v46 = vld [vmem:[%s8616_s10 + $0x90] sm:$0xff]  }
 0x9cb   :  { %6739 = vmatprep.subr.bf16.mxu0 %v7627_v18 }
 0xa9c   :  { %v6733_v54 = vpop.f32.mrb[18].mxu0 }
 0xa9d   :  { %v2346_v55 = vpop.f32.mrb[19].mxu0 }
 0xa9e   :  { %6736 = vmatprep.mubr.msk.f32.mxu0 %vm162_vm1, %v2346_v55  ;;  %v7391_v55 = vld [vmem:[%s8616_s10 + $0xa8] sm:$0xff]  }
 0xa9f   :  { %6737 = vmatmul.mubr.msk.f32.vlgmr.msra.gmra.mrb[6].mxu0 %vm162_vm1, %v6733_v54  ;;  %v7392_v54 = vld [vmem:[%s8616_s10 + $0x68] sm:$0xff]  }
 0xaa0   :  { %6740 = vmatpush3.bf16.msra.mxu0 %v7371_v19  ;;  %6743 = vmatprep.mubr.msk.bf16.mxu0 %vm7629_vm5, %v7627_v18 }
 0xaa1   :  { %6741 = vmatprep.subr.bf16.mxu0 %v7627_v18 }
 0xaa4   :  { %6742 = vmatpush3.bf16.msra.mxu0 %v7375_v23 }
 0xaa5   :  { %6747 = vmatprep.subr.bf16.mxu0 %v7627_v18 }
 0xb72   :  { %v6738_v57 = vpop.f32.mrb[6].mxu0 }
 0xb73   :  { %v2449_v58 = vadd.f32 %v6738_v57, %v6088_v56  ;;  %v2430_v59 = vpop.f32.mrb[7].mxu0  ;;  %v7394_v57 = vld [vmem:[%s8616_s10 + $0xb0] sm:$0xff]  }
 0xb74   :  { %v2448_v60 = vadd.f32 %v6088_v56, %v2430_v59  ;;  %v7393_v56 = vld [vmem:[%s8616_s10 + $0x28] sm:$0xff]   ;;  %v7396_v59 = vld [vmem:[%s8616_s10 + $0x30] sm:$0xff]  }
 0xb75   :  { %v2451_v62 = vadd.f32 %v7576_v61, %v2449_v58  ;;  %v7395_v58 = vld [vmem:[%s8616_s10 + $0x70] sm:$0xff]   ;;  %v7398_v61 = vld [vmem:[%s8616_s10 + $0x78] sm:$0xff]  }
 0xb76   :  { %v2450_v63 = vadd.f32 %v7577_v13, %v2448_v60  ;;  %v7397_v60 = vld [vmem:[%s8616_s10 + $0xb8] sm:$0xff]   ;;  %v2508_v13 = vlaneseq }
 0xb77   :  { %v2457_v0 = vsel %vm70_vm0, %v2451_v62, 0.0 }
 0xb78   :  { %2458 = vadd.xlane.f32.xlu1 %v2457_v0  ;;  %v2454_v1 = vsel %vm70_vm0, %v2450_v63, 0.0 }
 0xb79   :  { %2455 = vadd.xlane.f32.xlu0 %v2454_v1 }
 0xc05   :  { %v2459_v2 = vpop.xlane.xlu1 %2458 }
 0xc06   :  { %v2462_v3 = vmul.f32 0.03125, %v2459_v2  ;;  %v2456_v4 = vpop.xlane.xlu0 %2455  ;;  %v2506_v2 = vld [vmem:[%s8615_s9] sm:$0x7] }
 0xc07   :  { %v2461_v5 = vmul.f32 0.03125, %v2456_v4 }
 0xc08   :  { %v2464_v6 = vsub.f32 %v2451_v62, %v2462_v3  ;;  %v7399_v62 = vld [vmem:[%s8616_s10 + $0x38] sm:$0xff]  }
 0xc09   :  { %v2463_v7 = vsub.f32 %v2450_v63, %v2461_v5  ;;  %v8127_v63 = vshrl.u32 %v2508_v13, 7 }
 0xc0a   :  { %v2466_v11 = vmul.f32 %v2464_v6, %v2464_v6 }
 0xc0b   :  { %v2465_v8 = vmul.f32 %v2463_v7, %v2463_v7  ;;  %v2510_v0 = vsub.s32 0, %v8127_v63  ;;  %v2518_v1 = vsub.s32 2, %v8127_v63  ;;  %v2514_v3 = vsub.s32 1, %v8127_v63 }
 0xc0c   :  { %v2470_v14 = vsel %vm70_vm0, %v2466_v11, 0.0 }
 0xc0d   :  { %v2467_v9 = vsel %vm70_vm0, %v2465_v8, 0.0  ;;  %v2511_v4 = vrot.slane %v2506_v2, %v2510_v0  ;;  %v2519_v5 = vrot.slane %v2506_v2, %v2518_v1 }
 0xc0e   :  { %2468 = vadd.xlane.f32.xlu0 %v2467_v9 }
 0xc12   :  { %2471 = vadd.xlane.f32.xlu0 %v2470_v14 }
 0xc9b   :  { %v2469_v25 = vpop.xlane.xlu0 %2468 }
 0xc9c   :  { %v2473_v26 = vmul.f32 0.03125, %v2469_v25 }
 0xc9e   :  { %v2475_v27 = vadd.f32 1e-05, %v2473_v26 }
 0xc9f   :  { %v2472_v28 = vpop.xlane.xlu0 %2471 }
 0xca0   :  { %7496 = vrsqrt.f32 %v2475_v27  ;;  %v2474_v29 = vmul.f32 0.03125, %v2472_v28 }
 0xca2   :  { %v2476_v30 = vadd.f32 1e-05, %v2474_v29 }
 0xca4   :  { %7498 = vrsqrt.f32 %v2476_v30 }
 0xcaa   :  { %v7497_v33 = vpop.eup %7496 }
 0xcab   :  { %v2479_v34 = vmul.f32 %v7497_v33, %v2463_v7 }
 0xcad   :  { %v2487_v37 = vmul.f32 %v6089_v35, %v2479_v34 }
 0xcae   :  { %v7499_v36 = vpop.eup %7498 }
 0xcaf   :  { %v2480_v38 = vmul.f32 %v7499_v36, %v2464_v6  ;;  %v8041_v12 = vadd.f32 %v6090_v39, %v2487_v37  ;;  %v2515_v6 = vrot.slane %v2506_v2, %v2514_v3  ;;  %v6127_v2 = vld [vmem:[%s8608_s2 + $0x28] sm:$0xff] }
 0xcb1   :  { %v2488_v40 = vmul.f32 %v6089_v35, %v2480_v38 }
 0xcb3   :  { %v8043_v32 = vadd.f32 %v6090_v39, %v2488_v40 }
 0xcb5   :  { %v2497_v31 = vpack.c.bf16 %v8043_v32, %v8041_v12 }
 0xcb7   :  { %6097 = vmatmul.mubr.msk.bf16.vlgmr.msra.gmra.mrb[16].mxu1 %vm70_vm0, %v2497_v31  ;;  %6744 = vmatmul.mubr.msk.bf16.vlgmr.msra.gmra.mrb[20].mxu0 %vm70_vm0, %v2497_v31 }
 0xcb8   :  { %6748 = vmatpush3.bf16.msra.mxu0 %v7376_v41  ;;  %6412 = vmatpush3.bf16.msra.mxu1 %v7378_v42  ;;  %v6099_v42 = vld [vmem:[%s8617_s11] ss:$0 sm:$0xff] }
 0xcb9   :  { %6749 = vmatprep.subr.bf16.mxu0 %v7627_v18  ;;  %6413 = vmatprep.subr.bf16.mxu1 %v7380_v43 }
 0xcba   :  { %6763 = vmatprep.mubr.msk.bf16.mxu0 %vm7629_vm5, %v7627_v18 }
 0xcbc   :  { %6750 = vmatpush3.bf16.msra.mxu0 %v7379_v10  ;;  %6414 = vmatpush3.bf16.msra.mxu1 %v7381_v44 }
 0xcbd   :  { %6751 = vmatprep.subr.bf16.mxu0 %v7627_v18  ;;  %6415 = vmatprep.subr.bf16.mxu1 %v7383_v45 }
 0xcc0   :  { %6752 = vmatpush3.bf16.msra.mxu0 %v7382_v46  ;;  %6416 = vmatpush3.bf16.msra.mxu1 %v7384_v47 }
 0xcc1   :  { %6753 = vmatprep.subr.bf16.mxu0 %v7627_v18  ;;  %6417 = vmatprep.subr.bf16.mxu1 %v7386_v48 }
 0xcc4   :  { %6754 = vmatpush3.bf16.msra.mxu0 %v7385_v49  ;;  %6418 = vmatpush3.bf16.msra.mxu1 %v7387_v50 }
 0xcc5   :  { %6755 = vmatprep.subr.bf16.mxu0 %v7627_v18  ;;  %6419 = vmatprep.subr.bf16.mxu1 %v7389_v51 }
 0xcc8   :  { %6756 = vmatpush3.bf16.msra.mxu0 %v7388_v52  ;;  %6420 = vmatpush3.bf16.msra.mxu1 %v7390_v53 }
 0xcc9   :  { %6757 = vmatprep.subr.bf16.mxu0 %v7627_v18  ;;  %6421 = vmatprep.subr.bf16.mxu1 %v7392_v54 }
 0xccc   :  { %6758 = vmatpush3.bf16.msra.mxu0 %v7391_v55  ;;  %6422 = vmatpush3.bf16.msra.mxu1 %v7393_v56 }
 0xccd   :  { %6759 = vmatprep.subr.bf16.mxu0 %v7627_v18  ;;  %6423 = vmatprep.subr.bf16.mxu1 %v7395_v58 }
 0xcd0   :  { %6760 = vmatpush3.bf16.msra.mxu0 %v7394_v57  ;;  %6424 = vmatpush3.bf16.msra.mxu1 %v7396_v59 }
 0xcd1   :  { %6761 = vmatprep.subr.bf16.mxu0 %v7627_v18  ;;  %6425 = vmatprep.subr.bf16.mxu1 %v7398_v61 }
 0xcd4   :  { %6762 = vmatpush3.bf16.msra.mxu0 %v7397_v60  ;;  %6426 = vmatpush3.bf16.msra.mxu1 %v7399_v62 }
 0xd8a   :  { %v2592_v7 = vpop.f32.mrb[16].mxu1  ;;  %v2635_v8 = vpop.f32.mrb[20].mxu0 }
 0xd8b   :  { %v2593_v9 = vadd.f32 %v2592_v7, %v2511_v4  ;;  %v2636_v11 = vadd.f32 %v2635_v8, %v2519_v5  ;;  %v2594_v14 = vpop.f32.mrb[17].mxu1  ;;  %v6745_v15 = vpop.f32.mrb[21].mxu0 }
 0xd8c   :  { %v2595_v16 = vadd.f32 %v2594_v14, %v2515_v6  ;;  %v2596_v19 = vpop.f32.mrb[18].mxu1  ;;  %v2638_v20 = vpop.f32.mrb[22].mxu0 }
 0xd8d   :  { %v2597_v22 = vadd.f32 %v2596_v19, %v2511_v4  ;;  %v2639_v23 = vadd.f32 %v2638_v20, %v2519_v5  ;;  %v2598_v24 = vpop.f32.mrb[19].mxu1  ;;  %v6746_v25 = vpop.f32.mrb[23].mxu0  ;;  %v2642_v27 = vmax.f32 %v2593_v9, 0.0  ;;  %v2644_v28 = vmax.f32 %v2636_v11, 0.0  ;;  %v6128_v5 = vld [vmem:[%s8608_s2 + $0x30] sm:$0xff] }
 0xd8e   :  { %v2599_v26 = vadd.f32 %v2598_v24, %v2515_v6  ;;  %v2643_v33 = vmax.f32 %v2595_v16, 0.0  ;;  %v6129_v6 = vld [vmem:[%s8608_s2 + $0x38] sm:$0xff]  ;;  %v6124_v20 = vld [vmem:[%s8618_s12] ss:$0 sm:$0xff] }
 0xd8f   :  { %v2645_v29 = vmax.f32 %v2597_v22, 0.0  ;;  %v2647_v30 = vmax.f32 %v2639_v23, 0.0  ;;  %v7061_v7 = vpack.c.bf16 %v6129_v6, %v6128_v5  ;;  %v6125_v23 = vld [vmem:[%s8619_s13] ss:$0 sm:$0xff] }
 0xd90   :  { %v2646_v34 = vmax.f32 %v2599_v26, 0.0 }
 0xd91   :  { %v2648_v35 = vpack.c.bf16 %v2645_v29, %v2642_v27  ;;  %v2650_v36 = vpack.c.bf16 %v2647_v30, %v2644_v28  ;;  %v6131_v30 = vld [vmem:[%s8609_s3 + $0x1] ss:$0 sm:$0xff]  ;;  %s8660_s3 = smov 104  }
 0xd92   :  { %v2649_v37 = vpack.c.bf16 %v2646_v34, %v2643_v33 }
 0xd93   :  { %6764 = vmatmul.mubr.bf16.vlgmr.msra.gmra.mrb[24].mxu0 %v2650_v36 }
 0xd94   :  { %2882 = vmatprep.mubr.bf16.mxu1 %v2649_v37 }
 0xd95   :  { %2883 = vmatmul.mubr.bf16.vlgmr.msra.gmra.mrb[20].mxu1 %v2648_v35 }
 0xe66   :  { %v2925_v38 = vpop.f32.mrb[24].mxu0 }
 0xe67   :  { %v6765_v39 = vpop.f32.mrb[25].mxu0 }
 0xe68   :  { %v6427_v40 = vpop.f32.mrb[20].mxu1  ;;  %v2928_v41 = vpop.f32.mrb[26].mxu0 }
 0xe69   :  { %v6428_v31 = vpop.f32.mrb[21].mxu1  ;;  %v6766_v43 = vpop.f32.mrb[27].mxu0 }
 0xe6a   :  { %v6429_v10 = vadd.f32 %v6428_v31, %v6427_v40  ;;  %v6430_v44 = vpop.f32.mrb[22].mxu1  ;;  %v8200_v43 = vld [vmem:[%s8607_s1] sm:$0xff] }
 0xe6b   :  { %v6431_v45 = vpop.f32.mrb[23].mxu1 }
 0xe6c   :  { %v2885_v46 = vadd.f32 %v6429_v10, %v6099_v42  ;;  %v6432_v47 = vadd.f32 %v6431_v45, %v6430_v44  ;;  %v8206_v44 = vld [vmem:[%s8607_s1 + $0x8] sm:$0xff]  ;;  %s8650_s1 = smov 84  }
 0xe6e   :  { %v2888_v48 = vadd.f32 %v6432_v47, %v6099_v42  ;;  %v2926_v49 = vadd.f32 %v2925_v38, %v2885_v46 }
 0xe70   :  { %v2932_v50 = vadd.f32 %v2926_v49, %v8041_v12  ;;  %v2929_v51 = vadd.f32 %v2928_v41, %v2888_v48 }
 0xe72   :  { %v2936_v52 = vsel %vm70_vm0, %v2932_v50, 0.0  ;;  %v2933_v53 = vadd.f32 %v2929_v51, %v8043_v32  ;;  %v6126_v32 = vld [vmem:[%s8608_s2 + $0x20] sm:$0xff] }
 0xe73   :  { %2937 = vadd.xlane.f32.xlu0 %v2936_v52  ;;  %v7057_v4 = vpack.c.bf16 %v6127_v2, %v6126_v32 }
 0xe74   :  { %v2939_v54 = vsel %vm70_vm0, %v2933_v53, 0.0 }
 0xe75   :  { %7058 = vmatprep.subr.bf16.mxu1 %v7057_v4 }
 0xe76   :  { %7060 = vmatpush3.bf16.msra.mxu1 %v7057_v4 }
 0xe77   :  { %2940 = vadd.xlane.f32.xlu0 %v2939_v54  ;;  %7062 = vmatprep.subr.bf16.mxu1 %v7061_v7 }
 0xe7a   :  { %7064 = vmatpush3.bf16.msra.mxu1 %v7061_v7 }
 0xf00   :  { %v2938_v55 = vpop.xlane.xlu0 %2937 }
 0xf01   :  { %v2942_v56 = vmul.f32 0.03125, %v2938_v55 }
 0xf03   :  { %v2944_v57 = vsub.f32 %v2932_v50, %v2942_v56 }
 0xf04   :  { %v2941_v58 = vpop.xlane.xlu0 %2940 }
 0xf05   :  { %v2943_v59 = vmul.f32 0.03125, %v2941_v58  ;;  %v2946_v60 = vmul.f32 %v2944_v57, %v2944_v57 }
 0xf07   :  { %v2945_v61 = vsub.f32 %v2933_v53, %v2943_v59  ;;  %v2948_v62 = vsel %vm70_vm0, %v2946_v60, 0.0 }
 0xf08   :  { %2949 = vadd.xlane.f32.xlu0 %v2948_v62 }
 0xf09   :  { %v2947_v12 = vmul.f32 %v2945_v61, %v2945_v61 }
 0xf0b   :  { %v2951_v13 = vsel %vm70_vm0, %v2947_v12, 0.0 }
 0xf0c   :  { %2952 = vadd.xlane.f32.xlu0 %v2951_v13 }
 0xf95   :  { %v2950_v8 = vpop.xlane.xlu0 %2949 }
 0xf96   :  { %v2954_v9 = vmul.f32 0.03125, %v2950_v8 }
 0xf98   :  { %v2956_v11 = vadd.f32 1e-05, %v2954_v9 }
 0xf99   :  { %v2953_v14 = vpop.xlane.xlu0 %2952 }
 0xf9a   :  { %7500 = vrsqrt.f32 %v2956_v11  ;;  %v2955_v15 = vmul.f32 0.03125, %v2953_v14 }
 0xf9c   :  { %v2957_v16 = vadd.f32 1e-05, %v2955_v15 }
 0xf9e   :  { %7502 = vrsqrt.f32 %v2957_v16 }
 0xfa4   :  { %v7501_v19 = vpop.eup %7500 }
 0xfa5   :  { %v2960_v22 = vmul.f32 %v7501_v19, %v2944_v57 }
 0xfa7   :  { %v2968_v24 = vmul.f32 %v6124_v20, %v2960_v22 }
 0xfa8   :  { %v7503_v25 = vpop.eup %7502 }
 0xfa9   :  { %v2961_v26 = vmul.f32 %v7503_v25, %v2945_v61  ;;  %v8168_v27 = vadd.f32 %v6125_v23, %v2968_v24 }
 0xfab   :  { %v2969_v28 = vmul.f32 %v6124_v20, %v2961_v26  ;;  %6775 = vmatprep.mubr.msk.f32.mxu1 %vm70_vm0, %v8168_v27 }
 0xfad   :  { %v8172_v29 = vadd.f32 %v6125_v23, %v2969_v28 }
 0xfaf   :  { %6776 = vmatmul.mubr.msk.f32.vlgmr.msra.gmra.mrb[24].mxu1 %vm70_vm0, %v8172_v29 }
0x1082   :  { %v6777_v33 = vpop.f32.mrb[24].mxu1 }
0x1083   :  { %v8179_v34 = vadd.f32 %v6777_v33, %v6131_v30  ;;  %v3063_v35 = vpop.f32.mrb[25].mxu1 }
0x1084   :  { %v8181_v36 = vadd.f32 %v6131_v30, %v3063_v35 }
0x1086   :  { %6782 = vmatprep.mubr.msk.f32.mxu0 %vm162_vm1, %v8181_v36  ;;  %v8187_v37 = vpack.i.bf16 %v8179_v34, %v8181_v36 }
0x1088   :  { %7289 = vrot.lane.b32.xlu0 %v8187_v37, %s7605_s22  ;;  %s8662_s22 = smov 44  }
0x10fa   :  { %v7290_v38 = vpop.permute.xlu0 %7289 }
0x10fb   :  { %v7292_v39 = vunpack.i.h.bf16 %v7290_v38  ;;  %v7291_v40 = vunpack.i.l.bf16 %v7290_v38 }
0x10fd   :  { %v7065_v41 = vpack.c.bf16 %v7292_v39, %v7291_v40 }
0x10ff   :  { %7067 = vmatprep.subr.msk.bf16.mxu0 %vm7765_vm2, %v7065_v41 }
0x1100   :  { %7070 = vmatpush3.bf16.xpose.msk.msra.mxu0 %vm7765_vm2, %v7065_v41 }
0x1107   :  { %6783 = vmatmul.mubr.msk.f32.vlgmr.msra.gmra.mrb[28].mxu0 %vm162_vm1, %v8179_v34 }
0x11da   :  { %v6784_v42 = vpop.f32.mrb[28].mxu0 }
0x11db   :  { %v3157_v31 = vpop.f32.mrb[29].mxu0  ;;  %v3163_v45 = vadd.f32 %v8206_v44, %v6784_v42 }
0x11dc   :  { %v3158_v10 = vadd.f32 %v8200_v43, %v3157_v31 }
0x11dd   :  { %v3169_v47 = vsel %vm246_vm3, %v3163_v45, -inf }
0x11de   :  { %v3166_v46 = vsel %vm246_vm3, %v3158_v10, -inf }
0x11df   :  { %3167 = vmax.xlane.f32.xlu1 %v3166_v46 }
0x11e3   :  { %3170 = vmax.xlane.f32.xlu1 %v3169_v47 }
0x11f4   :  { %7294 = vrot.lane.b32.xlu1 %v8187_v37, %s7611_s18 }
0x11f8   :  { %7299 = vrot.lane.b32.xlu1 %v8187_v37, %s7606_s23  ;;  %s8652_s23 = smov 116  }
0x11fc   :  { %3275 = vrot.lane.b32.xlu1 %v8181_v36, %s7604_s21 }
0x126c   :  { %v3168_v48 = vpop.xlane.xlu1 %3167 }
0x126d   :  { %v3172_v49 = vsub.f32 %v3158_v10, %v3168_v48 }
0x126f   :  { %v3174_v50 = vmul.f32 1.442695, %v3172_v49 }
0x1270   :  { %v3171_v51 = vpop.xlane.xlu1 %3170 }
0x1271   :  { %7504 = vpow2.f32 %v3174_v50  ;;  %v3173_v52 = vsub.f32 %v3163_v45, %v3171_v51 }
0x1273   :  { %v3176_v53 = vmul.f32 1.442695, %v3173_v52 }
0x1274   :  { %v7295_v54 = vpop.permute.xlu1 %7294 }
0x1275   :  { %7506 = vpow2.f32 %v3176_v53  ;;  %v7297_v55 = vunpack.i.h.bf16 %v7295_v54  ;;  %v7296_v56 = vunpack.i.l.bf16 %v7295_v54 }
0x1277   :  { %v7071_v57 = vpack.c.bf16 %v7297_v55, %v7296_v56 }
0x1278   :  { %v7300_v58 = vpop.permute.xlu1 %7299 }
0x1279   :  { %v7302_v59 = vunpack.i.h.bf16 %v7300_v58  ;;  %v7301_v60 = vunpack.i.l.bf16 %v7300_v58  ;;  %7072 = vmatprep.subr.bf16.mxu1 %v7071_v57 }
0x127a   :  { %7074 = vmatpush3.bf16.msra.mxu1 %v7071_v57 }
0x127b   :  { %v7505_v61 = vpop.eup %7504  ;;  %v7075_v62 = vpack.c.bf16 %v7302_v59, %v7301_v60 }
0x127c   :  { %v3178_v12 = vsel %vm246_vm3, %v7505_v61, 0.0  ;;  %v3276_v2 = vpop.permute.xlu1 %3275 }
0x127d   :  { %3179 = vadd.xlane.f32.xlu1 %v3178_v12  ;;  %7077 = vmatprep.subr.msk.bf16.mxu1 %vm7765_vm2, %v7075_v62 }
0x127f   :  { %v7507_v13 = vpop.eup %7506 }
0x1280   :  { %v3181_v32 = vsel %vm246_vm3, %v7507_v13, 0.0 }
0x1281   :  { %3182 = vadd.xlane.f32.xlu0 %v3181_v32 }
0x128e   :  { %3277 = vrot.lane.b32.xlu1 %v8179_v34, %s7604_s21  ;;  %s8651_s21 = smov 60  }
0x1292   :  { %7304 = vrot.lane.b32.xlu1 %v8187_v37, %s7608_s25  ;;  %s8654_s25 = smov 112  }
0x1296   :  { %3645 = vrot.lane.b32.xlu1 %v8179_v34, %s7607_s24 }
0x1297   :  { %3643 = vrot.lane.b32.xlu0 %v8181_v36, %s7607_s24  ;;  %s8653_s24 = smov 56  }
0x130a   :  { %v3180_v4 = vpop.xlane.xlu1 %3179 }
0x130b   :  { %7508 = vrcp.f32 %v3180_v4 }
0x130e   :  { %v3183_v5 = vpop.xlane.xlu0 %3182  ;;  %v3278_v6 = vpop.permute.xlu1 %3277 }
0x130f   :  { %7510 = vrcp.f32 %v3183_v5 }
0x1312   :  { %v7305_v8 = vpop.permute.xlu1 %7304  ;;  %v3644_v20 = vpop.permute.xlu0 %3643 }
0x1313   :  { %v7307_v11 = vunpack.i.h.bf16 %v7305_v8  ;;  %v7306_v14 = vunpack.i.l.bf16 %v7305_v8 }
0x1315   :  { %v7509_v7 = vpop.eup %7508  ;;  %v7085_v19 = vpack.c.bf16 %v7307_v11, %v7306_v14 }
0x1316   :  { %v3186_v9 = vmul.f32 %v7509_v7, %v7505_v61  ;;  %v3646_v22 = vpop.permute.xlu1 %3645 }
0x1318   :  { %6789 = vmatprep.mubr.msk.f32.mxu1 %vm246_vm3, %v3186_v9 }
0x1319   :  { %v7511_v15 = vpop.eup %7510 }
0x131a   :  { %v3187_v16 = vmul.f32 %v7511_v15, %v7507_v13 }
0x131c   :  { %6790 = vmatmul.mubr.msk.f32.vlgmr.msra.gmra.mrb[26].mxu1 %vm246_vm3, %v3187_v16 }
0x131d   :  { %7080 = vmatpush3.bf16.xpose.msk.msra.mxu1 %vm7765_vm2, %v7075_v62  ;;  %6796 = vmatprep.mubr.msk.f32.mxu1 %vm162_vm1, %v3276_v2 }
0x131e   :  { %7087 = vmatprep.subr.msk.bf16.mxu1 %vm7765_vm2, %v7085_v19 }
0x1324   :  { %6797 = vmatmul.mubr.msk.f32.vlgmr.msra.gmra.mrb[28].mxu1 %vm162_vm1, %v3278_v6 }
0x1325   :  { %7090 = vmatpush3.bf16.xpose.msk.msra.mxu1 %vm7765_vm2, %v7085_v19  ;;  %6820 = vmatprep.mubr.msk.f32.mxu1 %vm162_vm1, %v3644_v20 }
0x132c   :  { %6821 = vmatmul.mubr.msk.f32.vlgmr.msra.gmra.mrb[30].mxu1 %vm162_vm1, %v3646_v22 }
0x13ef   :  { %v8241_v23 = vpop.f32.mrb[26].mxu1 }
0x13f0   :  { %v8243_v24 = vpop.f32.mrb[27].mxu1 }
0x13f7   :  { %v6798_v25 = vpop.f32.mrb[28].mxu1 }
0x13f8   :  { %v3363_v26 = vadd.f32 %v8206_v44, %v6798_v25  ;;  %v3357_v28 = vpop.f32.mrb[29].mxu1 }
0x13f9   :  { %v3358_v30 = vadd.f32 %v8200_v43, %v3357_v28  ;;  %v6134_v28 = vld [vmem:[%s8610_s4 + $0x20] sm:$0xff] }
0x13fa   :  { %v3369_v33 = vsel %vm246_vm3, %v3363_v26, -inf }
0x13fb   :  { %3370 = vmax.xlane.f32.xlu0 %v3369_v33  ;;  %v3366_v35 = vsel %vm246_vm3, %v3358_v30, -inf }
0x13fc   :  { %3367 = vmax.xlane.f32.xlu1 %v3366_v35 }
0x13ff   :  { %v6822_v38 = vpop.f32.mrb[30].mxu1 }
0x1400   :  { %v3725_v39 = vpop.f32.mrb[31].mxu1  ;;  %v3731_v61 = vadd.f32 %v8206_v44, %v6822_v38 }
0x1401   :  { %v3726_v40 = vadd.f32 %v8200_v43, %v3725_v39 }
0x1402   :  { %v3737_v62 = vsel %vm246_vm3, %v3731_v61, -inf }
0x1403   :  { %v3734_v41 = vsel %vm246_vm3, %v3726_v40, -inf }
0x1411   :  { %7314 = vrot.lane.b32.xlu0 %v8187_v37, %s8650_s1 }
0x1430   :  { %3735 = vmax.xlane.f32.xlu0 %v3734_v41 }
0x1488   :  { %v3371_v42 = vpop.xlane.xlu0 %3370 }
0x1489   :  { %v3373_v31 = vsub.f32 %v3363_v26, %v3371_v42  ;;  %v3368_v10 = vpop.xlane.xlu1 %3367 }
0x148a   :  { %v3372_v45 = vsub.f32 %v3358_v30, %v3368_v10  ;;  %v3476_v30 = vrot.slane %v6134_v28, 4 }
0x148b   :  { %v3376_v46 = vmul.f32 1.442695, %v3373_v31 }
0x148c   :  { %v3374_v47 = vmul.f32 1.442695, %v3372_v45  ;;  %v7315_v48 = vpop.permute.xlu0 %7314 }
0x148d   :  { %7512 = vpow2.f32 %v3376_v46  ;;  %v7317_v49 = vunpack.i.h.bf16 %v7315_v48  ;;  %v7316_v50 = vunpack.i.l.bf16 %v7315_v48 }
0x148e   :  { %7514 = vpow2.f32 %v3374_v47 }
0x148f   :  { %v7095_v51 = vpack.c.bf16 %v7317_v49, %v7316_v50 }
0x1491   :  { %7097 = vmatprep.subr.msk.bf16.mxu1 %vm7765_vm2, %v7095_v51 }
0x1492   :  { %7100 = vmatpush3.bf16.xpose.msk.msra.mxu1 %vm7765_vm2, %v7095_v51 }
0x1497   :  { %v7513_v52 = vpop.eup %7512 }
0x1498   :  { %v3381_v53 = vsel %vm246_vm3, %v7513_v52, 0.0  ;;  %v7515_v54 = vpop.eup %7514 }
0x1499   :  { %3382 = vadd.xlane.f32.xlu1 %v3381_v53  ;;  %v3378_v55 = vsel %vm246_vm3, %v7515_v54, 0.0 }
0x149d   :  { %3379 = vadd.xlane.f32.xlu1 %v3378_v55 }
0x14ae   :  { %7309 = vrot.lane.b32.xlu1 %v8187_v37, %s8651_s21  ;;  %s8663_s21 = smov 100  }
0x14b2   :  { %3929 = vrot.lane.b32.xlu1 %v8181_v36, %s8652_s23 }
0x14b6   :  { %3931 = vrot.lane.b32.xlu1 %v8179_v34, %s8652_s23  ;;  %s8664_s23 = smov 68  }
0x14bd   :  { %v3736_v56 = vpop.xlane.xlu0 %3735 }
0x14be   :  { %v3740_v57 = vsub.f32 %v3726_v40, %v3736_v56 }
0x14c0   :  { %v3742_v58 = vmul.f32 1.442695, %v3740_v57 }
0x14c2   :  { %7516 = vpow2.f32 %v3742_v58 }
0x14cc   :  { %v8265_v59 = vpop.eup %7516 }
0x14cd   :  { %v3746_v60 = vsel %vm246_vm3, %v8265_v59, 0.0 }
0x14ce   :  { %3747 = vadd.xlane.f32.xlu0 %v3746_v60 }
0x14da   :  { %3738 = vmax.xlane.f32.xlu1 %v3737_v62 }
0x14eb   :  { %7319 = vrot.lane.b32.xlu1 %v8187_v37, %s8653_s24  ;;  %s8665_s24 = smov 40  }
0x14ef   :  { %4215 = vrot.lane.b32.xlu1 %v8181_v36, %s8654_s25 }
0x14f3   :  { %4217 = vrot.lane.b32.xlu1 %v8179_v34, %s8654_s25  ;;  %s8666_s25 = smov 36  }
0x1526   :  { %v3383_v12 = vpop.xlane.xlu1 %3382 }
0x1527   :  { %7518 = vrcp.f32 %v3383_v12 }
0x152a   :  { %v3380_v13 = vpop.xlane.xlu1 %3379 }
0x152b   :  { %7520 = vrcp.f32 %v3380_v13 }
0x152e   :  { %v7310_v32 = vpop.permute.xlu1 %7309 }
0x152f   :  { %v7312_v2 = vunpack.i.h.bf16 %v7310_v32  ;;  %v7311_v4 = vunpack.i.l.bf16 %v7310_v32 }
0x1531   :  { %v7081_v5 = vpack.c.bf16 %v7312_v2, %v7311_v4  ;;  %v7519_v7 = vpop.eup %7518 }
0x1532   :  { %v3930_v6 = vpop.permute.xlu1 %3929  ;;  %v3387_v14 = vmul.f32 %v7519_v7, %v7513_v52 }
0x1533   :  { %7082 = vmatprep.subr.bf16.mxu0 %v7081_v5  ;;  %6839 = vmatprep.mubr.msk.f32.mxu1 %vm162_vm1, %v3930_v6 }
0x1534   :  { %7084 = vmatpush3.bf16.msra.mxu0 %v7081_v5 }
0x1535   :  { %v7521_v8 = vpop.eup %7520  ;;  %6806 = vmatprep.subr.msk.mxu0 %vm564_vm4, %v3476_v30 }
0x1536   :  { %v3932_v9 = vpop.permute.xlu1 %3931  ;;  %v3386_v11 = vmul.f32 %v7521_v8, %v7515_v54 }
0x1537   :  { %6840 = vmatmul.mubr.msk.f32.vlgmr.msra.gmra.mrb[32].mxu1 %vm162_vm1, %v3932_v9 }
0x1538   :  { %6803 = vmatprep.mubr.msk.f32.mxu0 %vm246_vm3, %v3386_v11 }
0x1539   :  { %6804 = vmatmul.mubr.msk.f32.vlgmr.msra.gmra.mrb[30].mxu0 %vm246_vm3, %v3387_v14 }
0x153a   :  { %6807 = vmatpush3.msk.msra.mxu0 %vm564_vm4, %v3476_v30 }
0x153b   :  { %6811 = vmatprep.subr.msk.mxu0 %vm564_vm4, %v6134_v28 }
0x155b   :  { %v3748_v33 = vpop.xlane.xlu0 %3747 }
0x1567   :  { %v3739_v15 = vpop.xlane.xlu1 %3738 }
0x1568   :  { %v3741_v16 = vsub.f32 %v3731_v61, %v3739_v15 }
0x156a   :  { %v3744_v19 = vmul.f32 1.442695, %v3741_v16 }
0x156b   :  { %v7320_v20 = vpop.permute.xlu1 %7319 }
0x156c   :  { %7522 = vpow2.f32 %v3744_v19  ;;  %v7322_v10 = vunpack.i.h.bf16 %v7320_v20  ;;  %v7321_v45 = vunpack.i.l.bf16 %v7320_v20 }
0x156d   :  { %7524 = vrcp.f32 %v3748_v33 }
0x156e   :  { %v7091_v52 = vpack.c.bf16 %v7322_v10, %v7321_v45 }
0x156f   :  { %v4216_v22 = vpop.permute.xlu1 %4215 }
0x1570   :  { %6858 = vmatprep.mubr.msk.f32.mxu1 %vm162_vm1, %v4216_v22 }
0x1573   :  { %v4218_v54 = vpop.permute.xlu1 %4217 }
0x1576   :  { %v7523_v25 = vpop.eup %7522 }
0x1577   :  { %v3749_v26 = vsel %vm246_vm3, %v7523_v25, 0.0  ;;  %v7525_v53 = vpop.eup %7524 }
0x1578   :  { %3750 = vadd.xlane.f32.xlu0 %v3749_v26  ;;  %v3754_v56 = vmul.f32 %v7525_v53, %v8265_v59 }
0x158e   :  { %7324 = vrot.lane.b32.xlu0 %v8187_v37, %s8655_s26 }
0x1605   :  { %v3751_v35 = vpop.xlane.xlu0 %3750 }
0x1606   :  { %7526 = vrcp.f32 %v3751_v35 }
0x1609   :  { %v7325_v38 = vpop.permute.xlu0 %7324 }
0x160a   :  { %v7327_v39 = vunpack.i.h.bf16 %v7325_v38  ;;  %v7326_v40 = vunpack.i.l.bf16 %v7325_v38  ;;  %v6841_v41 = vpop.f32.mrb[32].mxu1 }
0x160b   :  { %v4017_v42 = vadd.f32 %v8206_v44, %v6841_v41  ;;  %v4011_v31 = vpop.f32.mrb[33].mxu1 }
0x160c   :  { %v7105_v46 = vpack.c.bf16 %v7327_v39, %v7326_v40  ;;  %v4012_v47 = vadd.f32 %v8200_v43, %v4011_v31  ;;  %v6805_v48 = vpop.f32.mrb[30].mxu0 }
0x160d   :  { %v3466_v49 = vpop.f32.mrb[31].mxu0  ;;  %v4023_v50 = vsel %vm246_vm3, %v4017_v42, -inf }
0x160e   :  { %4024 = vmax.xlane.f32.xlu1 %v4023_v50  ;;  %6808 = vmatprep.mubr.msk.f32.mxu0 %vm162_vm1, %v3466_v49  ;;  %v4020_v51 = vsel %vm246_vm3, %v4012_v47, -inf }
0x160f   :  { %7107 = vmatprep.subr.msk.bf16.mxu1 %vm7765_vm2, %v7105_v46  ;;  %4021 = vmax.xlane.f32.xlu0 %v4020_v51 }
0x1610   :  { %6809 = vmatmul.mubr.msk.f32.vlgmr.msra.gmra.mrb[32].mxu0 %vm162_vm1, %v6805_v48  ;;  %7110 = vmatpush3.bf16.xpose.msk.msra.mxu1 %vm7765_vm2, %v7105_v46  ;;  %v7527_v55 = vpop.eup %7526 }
0x1611   :  { %6812 = vmatpush3.msk.msra.mxu0 %vm564_vm4, %v6134_v28  ;;  %6813 = vmatprep.mubr.msk.f32.mxu0 %vm162_vm1, %v8243_v24  ;;  %v3755_v57 = vmul.f32 %v7527_v55, %v7523_v25  ;;  %v6135_v24 = vld [vmem:[%s8610_s4 + $0x28] sm:$0xff] }
0x1612   :  { %7092 = vmatprep.subr.bf16.mxu0 %v7091_v52  ;;  %v4129_v22 = vrot.slane %v6135_v24, 4 }
0x1617   :  { %6859 = vmatmul.mubr.msk.f32.vlgmr.msra.gmra.mrb[34].mxu1 %vm162_vm1, %v4218_v54 }
0x1618   :  { %6814 = vmatmul.mubr.msk.f32.vlgmr.msra.gmra.mrb[32].mxu0 %vm162_vm1, %v8241_v23 }
0x1619   :  { %7094 = vmatpush3.bf16.msra.mxu0 %v7091_v52  ;;  %6827 = vmatprep.mubr.msk.f32.mxu0 %vm246_vm3, %v3754_v56 }
0x161a   :  { %6830 = vmatprep.subr.msk.mxu0 %vm564_vm4, %v6135_v24 }
0x161c   :  { %6828 = vmatmul.mubr.msk.f32.vlgmr.msra.gmra.mrb[34].mxu0 %vm246_vm3, %v3755_v57 }
0x161d   :  { %6831 = vmatpush3.msk.msra.mxu0 %vm564_vm4, %v6135_v24 }
0x161f   :  { %7329 = vrot.lane.b32.xlu1 %v8187_v37, %s8656_s28 }
0x1623   :  { %4501 = vrot.lane.b32.xlu1 %v8181_v36, %s8657_s19 }
0x1627   :  { %4503 = vrot.lane.b32.xlu1 %v8179_v34, %s8657_s19 }
0x169b   :  { %v4025_v23 = vpop.xlane.xlu1 %4024 }
0x169c   :  { %v4027_v58 = vsub.f32 %v4017_v42, %v4025_v23  ;;  %v4022_v59 = vpop.xlane.xlu0 %4021 }
0x169d   :  { %v4026_v60 = vsub.f32 %v4012_v47, %v4022_v59 }
0x169e   :  { %v4030_v61 = vmul.f32 1.442695, %v4027_v58 }
0x169f   :  { %v4028_v62 = vmul.f32 1.442695, %v4026_v60  ;;  %v7330_v12 = vpop.permute.xlu1 %7329 }
0x16a0   :  { %v7332_v13 = vunpack.i.h.bf16 %v7330_v12  ;;  %v7331_v32 = vunpack.i.l.bf16 %v7330_v12 }
0x16a1   :  { %7528 = vpow2.f32 %v4028_v62 }
0x16a2   :  { %v7101_v2 = vpack.c.bf16 %v7332_v13, %v7331_v32  ;;  %7530 = vpow2.f32 %v4030_v61 }
0x16a3   :  { %v4502_v4 = vpop.permute.xlu1 %4501 }
0x16a4   :  { %7102 = vmatprep.subr.bf16.mxu0 %v7101_v2  ;;  %6877 = vmatprep.mubr.msk.f32.mxu1 %vm162_vm1, %v4502_v4 }
0x16a7   :  { %v4504_v31 = vpop.permute.xlu1 %4503 }
0x16ab   :  { %v7529_v5 = vpop.eup %7528 }
0x16ac   :  { %v4032_v6 = vsel %vm246_vm3, %v7529_v5, 0.0  ;;  %v7531_v7 = vpop.eup %7530 }
0x16ad   :  { %4033 = vadd.xlane.f32.xlu0 %v4032_v6  ;;  %v4035_v8 = vsel %vm246_vm3, %v7531_v7, 0.0 }
0x16b1   :  { %4036 = vadd.xlane.f32.xlu0 %v4035_v8 }
0x16c7   :  { %7334 = vrot.lane.b32.xlu0 %v8187_v37, %s8658_s20 }
0x16ea   :  { %v6860_v9 = vpop.f32.mrb[34].mxu1 }
0x16eb   :  { %v4303_v11 = vadd.f32 %v8206_v44, %v6860_v9  ;;  %v4297_v14 = vpop.f32.mrb[35].mxu1 }
0x16ec   :  { %v4298_v15 = vadd.f32 %v8200_v43, %v4297_v14 }
0x16ed   :  { %v4309_v16 = vsel %vm246_vm3, %v4303_v11, -inf }
0x16ee   :  { %4310 = vmax.xlane.f32.xlu1 %v4309_v16  ;;  %v4306_v19 = vsel %vm246_vm3, %v4298_v15, -inf  ;;  %v6136_v16 = vld [vmem:[%s8610_s4 + $0x30] sm:$0xff] }
0x16ef   :  { %4307 = vmax.xlane.f32.xlu0 %v4306_v19  ;;  %v6829_v20 = vpop.f32.mrb[34].mxu0 }
0x16f0   :  { %v3834_v25 = vpop.f32.mrb[35].mxu0 }
0x16f1   :  { %6832 = vmatprep.mubr.msk.f32.mxu0 %vm162_vm1, %v3834_v25 }
0x16f2   :  { %6833 = vmatmul.mubr.msk.f32.vlgmr.msra.gmra.mrb[32].mxu0 %vm162_vm1, %v6829_v20 }
0x16f3   :  { %7104 = vmatpush3.bf16.msra.mxu0 %v7101_v2 }
0x16f4   :  { %6849 = vmatprep.subr.msk.mxu0 %vm564_vm4, %v4129_v22 }
0x16ff   :  { %7339 = vrot.lane.b32.xlu1 %v8187_v37, %s8659_s27 }
0x1703   :  { %4787 = vrot.lane.b32.xlu1 %v8181_v36, %s8660_s3 }
0x1707   :  { %4789 = vrot.lane.b32.xlu1 %v8179_v34, %s8660_s3 }
0x173a   :  { %v4034_v26 = vpop.xlane.xlu0 %4033 }
0x173b   :  { %7532 = vrcp.f32 %v4034_v26 }
0x173e   :  { %v4037_v28 = vpop.xlane.xlu0 %4036 }
0x173f   :  { %7534 = vrcp.f32 %v4037_v28 }
0x1742   :  { %v7335_v30 = vpop.permute.xlu0 %7334 }
0x1743   :  { %v7337_v33 = vunpack.i.h.bf16 %v7335_v30  ;;  %v7336_v35 = vunpack.i.l.bf16 %v7335_v30 }
0x1745   :  { %v7533_v38 = vpop.eup %7532  ;;  %v7115_v39 = vpack.c.bf16 %v7337_v33, %v7336_v35 }
0x1746   :  { %v4040_v40 = vmul.f32 %v7533_v38, %v7529_v5 }
0x1747   :  { %7117 = vmatprep.subr.msk.bf16.mxu1 %vm7765_vm2, %v7115_v39 }
0x1748   :  { %6846 = vmatprep.mubr.msk.f32.mxu0 %vm246_vm3, %v4040_v40  ;;  %7120 = vmatpush3.bf16.xpose.msk.msra.mxu1 %vm7765_vm2, %v7115_v39 }
0x1749   :  { %v7535_v41 = vpop.eup %7534 }
0x174a   :  { %v4041_v42 = vmul.f32 %v7535_v41, %v7531_v7 }
0x174c   :  { %6847 = vmatmul.mubr.msk.f32.vlgmr.msra.gmra.mrb[36].mxu0 %vm246_vm3, %v4041_v42 }
0x174d   :  { %6850 = vmatpush3.msk.msra.mxu0 %vm564_vm4, %v4129_v22 }
0x174f   :  { %6878 = vmatmul.mubr.msk.f32.vlgmr.msra.gmra.mrb[36].mxu1 %vm162_vm1, %v4504_v31  ;;  %v4701_v31 = vrot.slane %v6136_v16, 4 }
0x177b   :  { %v4311_v10 = vpop.xlane.xlu1 %4310 }
0x177c   :  { %v4313_v45 = vsub.f32 %v4303_v11, %v4311_v10  ;;  %v4308_v46 = vpop.xlane.xlu0 %4307 }
0x177d   :  { %v4312_v47 = vsub.f32 %v4298_v15, %v4308_v46 }
0x177e   :  { %v4316_v48 = vmul.f32 1.442695, %v4313_v45 }
0x177f   :  { %v4314_v49 = vmul.f32 1.442695, %v4312_v47  ;;  %v7340_v50 = vpop.permute.xlu1 %7339 }
0x1780   :  { %v7342_v51 = vunpack.i.h.bf16 %v7340_v50  ;;  %v7341_v52 = vunpack.i.l.bf16 %v7340_v50 }
0x1781   :  { %7536 = vpow2.f32 %v4314_v49 }
0x1782   :  { %v7111_v53 = vpack.c.bf16 %v7342_v51, %v7341_v52  ;;  %7538 = vpow2.f32 %v4316_v48 }
0x1783   :  { %v4788_v54 = vpop.permute.xlu1 %4787 }
0x1784   :  { %7112 = vmatprep.subr.bf16.mxu0 %v7111_v53  ;;  %6896 = vmatprep.mubr.msk.f32.mxu1 %vm162_vm1, %v4788_v54 }
0x1787   :  { %v4790_v15 = vpop.permute.xlu1 %4789 }
0x178b   :  { %v7537_v55 = vpop.eup %7536 }
0x178c   :  { %v4318_v56 = vsel %vm246_vm3, %v7537_v55, 0.0  ;;  %v7539_v57 = vpop.eup %7538 }
0x178d   :  { %4319 = vadd.xlane.f32.xlu0 %v4318_v56  ;;  %v4321_v24 = vsel %vm246_vm3, %v7539_v57, 0.0 }
0x1791   :  { %4322 = vadd.xlane.f32.xlu0 %v4321_v24 }
0x17a7   :  { %7344 = vrot.lane.b32.xlu0 %v8187_v37, %s8661_s30 }
0x181a   :  { %v4320_v23 = vpop.xlane.xlu0 %4319 }
0x181b   :  { %7540 = vrcp.f32 %v4320_v23 }
0x181e   :  { %v4323_v58 = vpop.xlane.xlu0 %4322 }
0x181f   :  { %7542 = vrcp.f32 %v4323_v58  ;;  %v6848_v59 = vpop.f32.mrb[36].mxu0 }
0x1820   :  { %v4120_v60 = vpop.f32.mrb[37].mxu0 }
0x1821   :  { %6851 = vmatprep.mubr.msk.f32.mxu0 %vm162_vm1, %v4120_v60 }
0x1822   :  { %v7345_v61 = vpop.permute.xlu0 %7344  ;;  %6852 = vmatmul.mubr.msk.f32.vlgmr.msra.gmra.mrb[32].mxu0 %vm162_vm1, %v6848_v59  ;;  %v6879_v62 = vpop.f32.mrb[36].mxu1 }
0x1823   :  { %v7347_v12 = vunpack.i.h.bf16 %v7345_v61  ;;  %v7346_v13 = vunpack.i.l.bf16 %v7345_v61  ;;  %7114 = vmatpush3.bf16.msra.mxu0 %v7111_v53  ;;  %v4589_v32 = vadd.f32 %v8206_v44, %v6879_v62  ;;  %v4583_v2 = vpop.f32.mrb[37].mxu1 }
0x1824   :  { %v4584_v4 = vadd.f32 %v8200_v43, %v4583_v2  ;;  %6868 = vmatprep.subr.msk.mxu0 %vm564_vm4, %v6136_v16 }
0x1825   :  { %v7541_v5 = vpop.eup %7540  ;;  %v7125_v6 = vpack.c.bf16 %v7347_v12, %v7346_v13  ;;  %v4595_v7 = vsel %vm246_vm3, %v4589_v32, -inf }
0x1826   :  { %4596 = vmax.xlane.f32.xlu1 %v4595_v7  ;;  %v4592_v8 = vsel %vm246_vm3, %v4584_v4, -inf  ;;  %v4326_v9 = vmul.f32 %v7541_v5, %v7537_v55 }
0x1827   :  { %7127 = vmatprep.subr.msk.bf16.mxu1 %vm7765_vm2, %v7125_v6  ;;  %4593 = vmax.xlane.f32.xlu0 %v4592_v8 }
0x1828   :  { %6865 = vmatprep.mubr.msk.f32.mxu0 %vm246_vm3, %v4326_v9  ;;  %7130 = vmatpush3.bf16.xpose.msk.msra.mxu1 %vm7765_vm2, %v7125_v6 }
0x1829   :  { %v7543_v11 = vpop.eup %7542 }
0x182a   :  { %v4327_v14 = vmul.f32 %v7543_v11, %v7539_v57 }
0x182c   :  { %6866 = vmatmul.mubr.msk.f32.vlgmr.msra.gmra.mrb[38].mxu0 %vm246_vm3, %v4327_v14 }
0x182d   :  { %6869 = vmatpush3.msk.msra.mxu0 %vm564_vm4, %v6136_v16 }
0x182f   :  { %6897 = vmatmul.mubr.msk.f32.vlgmr.msra.gmra.mrb[38].mxu1 %vm162_vm1, %v4790_v15  ;;  %v6137_v15 = vld [vmem:[%s8610_s4 + $0x38] sm:$0xff] }
0x1837   :  { %7349 = vrot.lane.b32.xlu1 %v8187_v37, %s8662_s22 }
0x183b   :  { %5073 = vrot.lane.b32.xlu1 %v8181_v36, %s8663_s21 }
0x183f   :  { %5075 = vrot.lane.b32.xlu1 %v8179_v34, %s8663_s21 }
0x18b3   :  { %v4597_v19 = vpop.xlane.xlu1 %4596 }
0x18b4   :  { %v4599_v20 = vsub.f32 %v4589_v32, %v4597_v19  ;;  %v4594_v22 = vpop.xlane.xlu0 %4593 }
0x18b5   :  { %v4598_v25 = vsub.f32 %v4584_v4, %v4594_v22 }
0x18b6   :  { %v4602_v26 = vmul.f32 1.442695, %v4599_v20 }
0x18b7   :  { %v4600_v28 = vmul.f32 1.442695, %v4598_v25  ;;  %v7350_v30 = vpop.permute.xlu1 %7349 }
0x18b8   :  { %v7352_v33 = vunpack.i.h.bf16 %v7350_v30  ;;  %v7351_v35 = vunpack.i.l.bf16 %v7350_v30 }
0x18b9   :  { %7544 = vpow2.f32 %v4600_v28 }
0x18ba   :  { %v7121_v38 = vpack.c.bf16 %v7352_v33, %v7351_v35  ;;  %7546 = vpow2.f32 %v4602_v26 }
0x18bb   :  { %v5074_v36 = vpop.permute.xlu1 %5073 }
0x18bc   :  { %7122 = vmatprep.subr.bf16.mxu0 %v7121_v38  ;;  %6915 = vmatprep.mubr.msk.f32.mxu1 %vm162_vm1, %v5074_v36 }
0x18bf   :  { %v5076_v58 = vpop.permute.xlu1 %5075 }
0x18c3   :  { %v7545_v39 = vpop.eup %7544 }
0x18c4   :  { %v4604_v40 = vsel %vm246_vm3, %v7545_v39, 0.0  ;;  %v7547_v34 = vpop.eup %7546 }
0x18c5   :  { %4605 = vadd.xlane.f32.xlu0 %v4604_v40  ;;  %v4607_v41 = vsel %vm246_vm3, %v7547_v34, 0.0 }
0x18c9   :  { %4608 = vadd.xlane.f32.xlu0 %v4607_v41 }
0x18df   :  { %7354 = vrot.lane.b32.xlu0 %v8187_v37, %s8664_s23 }
0x18ff   :  { %v6867_v42 = vpop.f32.mrb[38].mxu0 }
0x1900   :  { %v4406_v10 = vpop.f32.mrb[39].mxu0 }
0x1901   :  { %6870 = vmatprep.mubr.msk.f32.mxu0 %vm162_vm1, %v4406_v10 }
0x1902   :  { %6871 = vmatmul.mubr.msk.f32.vlgmr.msra.gmra.mrb[32].mxu0 %vm162_vm1, %v6867_v42  ;;  %v6898_v45 = vpop.f32.mrb[38].mxu1 }
0x1903   :  { %7124 = vmatpush3.bf16.msra.mxu0 %v7121_v38  ;;  %v4875_v46 = vadd.f32 %v8206_v44, %v6898_v45  ;;  %v4869_v47 = vpop.f32.mrb[39].mxu1 }
0x1904   :  { %v4870_v48 = vadd.f32 %v8200_v43, %v4869_v47  ;;  %6887 = vmatprep.subr.msk.mxu0 %vm564_vm4, %v4701_v31 }
0x1905   :  { %v4881_v49 = vsel %vm246_vm3, %v4875_v46, -inf }
0x1906   :  { %4882 = vmax.xlane.f32.xlu1 %v4881_v49  ;;  %v4878_v50 = vsel %vm246_vm3, %v4870_v48, -inf  ;;  %v5273_v49 = vrot.slane %v6137_v15, 4 }
0x1907   :  { %4879 = vmax.xlane.f32.xlu0 %v4878_v50 }
0x1917   :  { %7359 = vrot.lane.b32.xlu1 %v8187_v37, %s8665_s24 }
0x191b   :  { %7364 = vrot.lane.b32.xlu1 %v8187_v37, %s8666_s25 }
0x1952   :  { %v4606_v51 = vpop.xlane.xlu0 %4605 }
0x1953   :  { %7548 = vrcp.f32 %v4606_v51 }
0x1956   :  { %v4609_v52 = vpop.xlane.xlu0 %4608 }
0x1957   :  { %7550 = vrcp.f32 %v4609_v52 }
0x195a   :  { %v7355_v53 = vpop.permute.xlu0 %7354 }
0x195b   :  { %v7357_v54 = vunpack.i.h.bf16 %v7355_v53  ;;  %v7356_v55 = vunpack.i.l.bf16 %v7355_v53 }
0x195d   :  { %v7549_v56 = vpop.eup %7548  ;;  %v7135_v57 = vpack.c.bf16 %v7357_v54, %v7356_v55 }
0x195e   :  { %v4612_v24 = vmul.f32 %v7549_v56, %v7545_v39 }
0x195f   :  { %7137 = vmatprep.subr.msk.bf16.mxu1 %vm7765_vm2, %v7135_v57 }
0x1960   :  { %6884 = vmatprep.mubr.msk.f32.mxu0 %vm246_vm3, %v4612_v24  ;;  %7140 = vmatpush3.bf16.xpose.msk.msra.mxu1 %vm7765_vm2, %v7135_v57 }
0x1961   :  { %v7551_v23 = vpop.eup %7550 }
0x1962   :  { %v4613_v37 = vmul.f32 %v7551_v23, %v7547_v34  ;;  %v6211_v23 = vld [vmem:[%s8611_s5 + $0x1] ss:$0 sm:$0xff] }
0x1964   :  { %6885 = vmatmul.mubr.msk.f32.vlgmr.msra.gmra.mrb[40].mxu0 %vm246_vm3, %v4613_v37 }
0x1965   :  { %6888 = vmatpush3.msk.msra.mxu0 %vm564_vm4, %v4701_v31 }
0x1967   :  { %6916 = vmatmul.mubr.msk.f32.vlgmr.msra.gmra.mrb[40].mxu1 %vm162_vm1, %v5076_v58 }
0x1968   :  { %5512 = vmatprep.mubr.bf16.mxu1 %v7628_v21 }
0x1993   :  { %v4883_v59 = vpop.xlane.xlu1 %4882 }
0x1994   :  { %v4885_v60 = vsub.f32 %v4875_v46, %v4883_v59  ;;  %v4880_v61 = vpop.xlane.xlu0 %4879 }
0x1995   :  { %v4884_v62 = vsub.f32 %v4870_v48, %v4880_v61 }
0x1996   :  { %v4888_v12 = vmul.f32 1.442695, %v4885_v60 }
0x1997   :  { %v4886_v13 = vmul.f32 1.442695, %v4884_v62  ;;  %v7360_v32 = vpop.permute.xlu1 %7359 }
0x1998   :  { %v7362_v17 = vunpack.i.h.bf16 %v7360_v32  ;;  %v7361_v2 = vunpack.i.l.bf16 %v7360_v32 }
0x1999   :  { %7552 = vpow2.f32 %v4886_v13 }
0x199a   :  { %v7131_v4 = vpack.c.bf16 %v7362_v17, %v7361_v2  ;;  %7554 = vpow2.f32 %v4888_v12 }
0x199b   :  { %v7365_v25 = vpop.permute.xlu1 %7364 }
0x199c   :  { %7132 = vmatprep.subr.bf16.mxu0 %v7131_v4  ;;  %v7367_v33 = vunpack.i.h.bf16 %v7365_v25  ;;  %v7366_v35 = vunpack.i.l.bf16 %v7365_v25 }
0x19a3   :  { %v7553_v5 = vpop.eup %7552 }
0x19a4   :  { %v4890_v6 = vsel %vm246_vm3, %v7553_v5, 0.0  ;;  %v7555_v7 = vpop.eup %7554 }
0x19a5   :  { %4891 = vadd.xlane.f32.xlu0 %v4890_v6  ;;  %v4893_v21 = vsel %vm246_vm3, %v7555_v7, 0.0 }
0x19a9   :  { %4894 = vadd.xlane.f32.xlu0 %v4893_v21 }
0x1a32   :  { %v4892_v8 = vpop.xlane.xlu0 %4891 }
0x1a33   :  { %7556 = vrcp.f32 %v4892_v8 }
0x1a36   :  { %v4895_v9 = vpop.xlane.xlu0 %4894 }
0x1a37   :  { %7558 = vrcp.f32 %v4895_v9  ;;  %v6886_v11 = vpop.f32.mrb[40].mxu0  ;;  %v7400_v9 = vld [vmem:[%s8614_s8 + $0x30] ss:$12 sps:$4 sm:$0xff]  }
0x1a38   :  { %v4692_v14 = vpop.f32.mrb[41].mxu0 }
0x1a39   :  { %6889 = vmatprep.mubr.msk.f32.mxu0 %vm162_vm1, %v4692_v14  ;;  %v7406_v14 = vld [vmem:[%s8614_s8 + $0x4c] ss:$12 sps:$4 sm:$0xff]  }
0x1a3a   :  { %6890 = vmatmul.mubr.msk.f32.vlgmr.msra.gmra.mrb[32].mxu0 %vm162_vm1, %v6886_v11  ;;  %v6917_v16 = vpop.f32.mrb[40].mxu1  ;;  %v7403_v11 = vld [vmem:[%s8614_s8 + $0x38] ss:$12 sps:$4 sm:$0xff]  }
0x1a3b   :  { %7134 = vmatpush3.bf16.msra.mxu0 %v7131_v4  ;;  %v5155_v19 = vpop.f32.mrb[41].mxu1  ;;  %v5161_v26 = vadd.f32 %v8206_v44, %v6917_v16  ;;  %v7407_v16 = vld [vmem:[%s8614_s8 + $0x50] ss:$12 sps:$4 sm:$0xff]  }
0x1a3c   :  { %v5156_v20 = vadd.f32 %v8200_v43, %v5155_v19  ;;  %6906 = vmatprep.subr.msk.mxu0 %vm564_vm4, %v6137_v15  ;;  %v7141_v43 = vpack.c.bf16 %v7367_v33, %v7366_v35  ;;  %v7409_v19 = vld [vmem:[%s8616_s10 + $0x100] sm:$0xff]  }
0x1a3d   :  { %v7557_v22 = vpop.eup %7556  ;;  %v5167_v39 = vsel %vm246_vm3, %v5161_v26, -inf }
0x1a3e   :  { %v5164_v28 = vsel %vm246_vm3, %v5156_v20, -inf  ;;  %v4898_v30 = vmul.f32 %v7557_v22, %v7553_v5 }
0x1a3f   :  { %5165 = vmax.xlane.f32.xlu0 %v5164_v28 }
0x1a40   :  { %6903 = vmatprep.mubr.msk.f32.mxu0 %vm246_vm3, %v4898_v30 }
0x1a41   :  { %v7559_v38 = vpop.eup %7558 }
0x1a42   :  { %v4899_v36 = vmul.f32 %v7559_v38, %v7555_v7  ;;  %v6214_v38 = vld [vmem:[%s8612_s6 + $0x1] ss:$0 sm:$0xff] }
0x1a43   :  { %5168 = vmax.xlane.f32.xlu0 %v5167_v39 }
0x1a44   :  { %6904 = vmatmul.mubr.msk.f32.vlgmr.msra.gmra.mrb[42].mxu0 %vm246_vm3, %v4899_v36 }
0x1a45   :  { %6907 = vmatpush3.msk.msra.mxu0 %vm564_vm4, %v6137_v15  ;;  %v7404_v15 = vld [vmem:[%s8614_s8 + $0x48] ss:$12 sps:$4 sm:$0xff]  }
0x1a46   :  { %7142 = vmatprep.subr.bf16.mxu0 %v7141_v43 }
0x1acc   :  { %v5166_v44 = vpop.xlane.xlu0 %5165 }
0x1acd   :  { %v5170_v40 = vsub.f32 %v5156_v20, %v5166_v44  ;;  %v6215_v44 = vld [vmem:[%s8613_s7 + $0x1] ss:$0 sm:$0xff] }
0x1acf   :  { %v5172_v34 = vmul.f32 1.442695, %v5170_v40 }
0x1ad0   :  { %v5169_v41 = vpop.xlane.xlu0 %5168 }
0x1ad1   :  { %7560 = vpow2.f32 %v5172_v34  ;;  %v5171_v42 = vsub.f32 %v5161_v26, %v5169_v41 }
0x1ad3   :  { %v5174_v31 = vmul.f32 1.442695, %v5171_v42  ;;  %v7408_v42 = vld [vmem:[%s8616_s10 + $0x140] sm:$0xff]  }
0x1ad5   :  { %7562 = vpow2.f32 %v5174_v31  ;;  %v7410_v31 = vld [vmem:[%s8616_s10 + $0xc0] sm:$0xff]  }
0x1adb   :  { %v7561_v10 = vpop.eup %7560 }
0x1adc   :  { %v5176_v45 = vsel %vm246_vm3, %v7561_v10, 0.0 }
0x1add   :  { %5177 = vadd.xlane.f32.xlu0 %v5176_v45  ;;  %v7412_v45 = vld [vmem:[%s8616_s10 + $0x108] sm:$0xff]  }
0x1adf   :  { %v7563_v46 = vpop.eup %7562 }
0x1ae0   :  { %v5179_v47 = vsel %vm246_vm3, %v7563_v46, 0.0 }
0x1ae1   :  { %5180 = vadd.xlane.f32.xlu0 %v5179_v47  ;;  %v7413_v47 = vld [vmem:[%s8616_s10 + $0xc8] sm:$0xff]  }
0x1b17   :  { %v6905_v48 = vpop.f32.mrb[42].mxu0 }
0x1b18   :  { %v4978_v50 = vpop.f32.mrb[43].mxu0 }
0x1b19   :  { %6908 = vmatprep.mubr.msk.f32.mxu0 %vm162_vm1, %v4978_v50  ;;  %v7416_v50 = vld [vmem:[%s8616_s10 + $0xd0] sm:$0xff]  }
0x1b1a   :  { %6909 = vmatmul.mubr.msk.f32.vlgmr.msra.gmra.mrb[32].mxu0 %vm162_vm1, %v6905_v48  ;;  %v7415_v48 = vld [vmem:[%s8616_s10 + $0x110] sm:$0xff]  }
0x1b1b   :  { %7144 = vmatpush3.bf16.msra.mxu0 %v7141_v43 }
0x1b1c   :  { %6925 = vmatprep.subr.msk.mxu0 %vm564_vm4, %v5273_v49 }
0x1b6a   :  { %v5178_v51 = vpop.xlane.xlu0 %5177 }
0x1b6b   :  { %7564 = vrcp.f32 %v5178_v51  ;;  %v7418_v51 = vld [vmem:[%s8616_s10 + $0x118] sm:$0xff]  }
0x1b6e   :  { %v5181_v52 = vpop.xlane.xlu0 %5180 }
0x1b6f   :  { %7566 = vrcp.f32 %v5181_v52  ;;  %v7417_v52 = vld [vmem:[%s8616_s10 + $0x158] sm:$0xff]  }
0x1b75   :  { %v7565_v53 = vpop.eup %7564 }
0x1b76   :  { %v5184_v54 = vmul.f32 %v7565_v53, %v7561_v10  ;;  %v7419_v53 = vld [vmem:[%s8616_s10 + $0xd8] sm:$0xff]  }
0x1b78   :  { %6922 = vmatprep.mubr.msk.f32.mxu0 %vm246_vm3, %v5184_v54  ;;  %v7421_v54 = vld [vmem:[%s8616_s10 + $0x120] sm:$0xff]  }
0x1b79   :  { %v7567_v55 = vpop.eup %7566 }
0x1b7a   :  { %v5185_v56 = vmul.f32 %v7567_v55, %v7563_v46  ;;  %v7411_v46 = vld [vmem:[%s8616_s10 + $0x148] sm:$0xff]   ;;  %v7420_v55 = vld [vmem:[%s8616_s10 + $0x160] sm:$0xff]  }
0x1b7c   :  { %6923 = vmatmul.mubr.msk.f32.vlgmr.msra.gmra.mrb[44].mxu0 %vm246_vm3, %v5185_v56  ;;  %v7422_v56 = vld [vmem:[%s8616_s10 + $0xe0] sm:$0xff]  }
0x1b7d   :  { %6926 = vmatpush3.msk.msra.mxu0 %vm564_vm4, %v5273_v49  ;;  %v7414_v49 = vld [vmem:[%s8616_s10 + $0x150] sm:$0xff]  }
0x1b7e   :  { %6930 = vmatprep.subr.bf16.mxu0 %v7627_v18 }
0x1c4f   :  { %v6924_v57 = vpop.f32.mrb[44].mxu0 }
0x1c50   :  { %v5264_v24 = vpop.f32.mrb[45].mxu0 }
0x1c51   :  { %6927 = vmatprep.mubr.msk.f32.mxu0 %vm162_vm1, %v5264_v24  ;;  %v7423_v24 = vld [vmem:[%s8616_s10 + $0x168] sm:$0xff]  }
0x1c52   :  { %6928 = vmatmul.mubr.msk.f32.vlgmr.msra.gmra.mrb[32].mxu0 %vm162_vm1, %v6924_v57  ;;  %v7424_v57 = vld [vmem:[%s8616_s10 + $0x128] sm:$0xff]  }
0x1c53   :  { %6934 = vmatprep.mubr.msk.bf16.mxu0 %vm7629_vm5, %v7627_v18  ;;  %6931 = vmatpush3.bf16.msra.mxu0 %v7403_v11 }
0x1c54   :  { %6932 = vmatprep.subr.bf16.mxu0 %v7627_v18 }
0x1c57   :  { %6933 = vmatpush3.bf16.msra.mxu0 %v7407_v16 }
0x1c58   :  { %6938 = vmatprep.subr.bf16.mxu0 %v7627_v18 }
0x1d25   :  { %v6929_v37 = vpop.f32.mrb[32].mxu0 }
0x1d26   :  { %v5368_v58 = vadd.f32 %v6929_v37, %v6211_v23  ;;  %v5348_v59 = vpop.f32.mrb[33].mxu0  ;;  %v7426_v37 = vld [vmem:[%s8616_s10 + $0x170] sm:$0xff]  }
0x1d27   :  { %v5367_v60 = vadd.f32 %v6211_v23, %v5348_v59  ;;  %v7425_v23 = vld [vmem:[%s8616_s10 + $0xe8] sm:$0xff]   ;;  %v7428_v59 = vld [vmem:[%s8616_s10 + $0xf0] sm:$0xff]  }
0x1d28   :  { %v5370_v61 = vadd.f32 %v5368_v58, %v8172_v29  ;;  %v7427_v58 = vld [vmem:[%s8616_s10 + $0x130] sm:$0xff]  }
0x1d29   :  { %v5369_v62 = vadd.f32 %v5367_v60, %v8168_v27  ;;  %v7402_v27 = vld [vmem:[%s8614_s8 + $0x34] ss:$12 sps:$4 sm:$0xff]   ;;  %v7429_v60 = vld [vmem:[%s8616_s10 + $0x178] sm:$0xff]  }
0x1d2a   :  { %v5378_v12 = vsel %vm70_vm0, %v5370_v61, 0.0  ;;  %5480 = vmatprep.subr.bf16.mxu1 %v7402_v27 }
0x1d2b   :  { %5379 = vadd.xlane.f32.xlu1 %v5378_v12  ;;  %v5375_v13 = vsel %vm70_vm0, %v5369_v62, 0.0  ;;  %5481 = vmatpush1.bf16.msra.mxu1 %v7400_v9 }
0x1d2c   :  { %5376 = vadd.xlane.f32.xlu0 %v5375_v13  ;;  %5482 = vmatprep.subr.bf16.mxu1 %v7406_v14 }
0x1d2f   :  { %5483 = vmatpush1.bf16.msra.mxu1 %v7404_v15 }
0x1d30   :  { %6539 = vmatprep.subr.bf16.mxu1 %v7409_v19 }
0x1db8   :  { %v5380_v32 = vpop.xlane.xlu1 %5379 }
0x1db9   :  { %v5382_v17 = vmul.f32 0.03125, %v5380_v32  ;;  %v5377_v2 = vpop.xlane.xlu0 %5376 }
0x1dba   :  { %v5381_v4 = vmul.f32 0.03125, %v5377_v2 }
0x1dbb   :  { %v5384_v5 = vsub.f32 %v5370_v61, %v5382_v17  ;;  %v7430_v61 = vld [vmem:[%s8616_s10 + $0x138] sm:$0xff]  }
0x1dbc   :  { %v5383_v6 = vsub.f32 %v5369_v62, %v5381_v4  ;;  %v7431_v62 = vld [vmem:[%s8616_s10 + $0xf8] sm:$0xff]  }
0x1dbd   :  { %v5386_v8 = vmul.f32 %v5384_v5, %v5384_v5 }
0x1dbe   :  { %v5385_v7 = vmul.f32 %v5383_v6, %v5383_v6 }
0x1dbf   :  { %v5390_v29 = vsel %vm70_vm0, %v5386_v8, 0.0 }
0x1dc0   :  { %v5387_v21 = vsel %vm70_vm0, %v5385_v7, 0.0 }
0x1dc1   :  { %5388 = vadd.xlane.f32.xlu0 %v5387_v21 }
0x1dc5   :  { %5391 = vadd.xlane.f32.xlu0 %v5390_v29 }
0x1e4e   :  { %v5389_v20 = vpop.xlane.xlu0 %5388 }
0x1e4f   :  { %v5393_v22 = vmul.f32 0.03125, %v5389_v20 }
0x1e51   :  { %v5395_v25 = vadd.f32 1e-05, %v5393_v22 }
0x1e52   :  { %v5392_v26 = vpop.xlane.xlu0 %5391 }
0x1e53   :  { %7568 = vrsqrt.f32 %v5395_v25  ;;  %v5394_v28 = vmul.f32 0.03125, %v5392_v26 }
0x1e55   :  { %v5396_v30 = vadd.f32 1e-05, %v5394_v28 }
0x1e57   :  { %7570 = vrsqrt.f32 %v5396_v30 }
0x1e5d   :  { %v7569_v33 = vpop.eup %7568 }
0x1e5e   :  { %v5399_v35 = vmul.f32 %v7569_v33, %v5383_v6 }
0x1e60   :  { %v5407_v39 = vmul.f32 %v6214_v38, %v5399_v35  ;;  %v6282_v35 = vld [vmem:[%s8617_s11 + $0x1] ss:$0 sm:$0xff] }
0x1e61   :  { %v7571_v36 = vpop.eup %7570 }
0x1e62   :  { %v5400_v43 = vmul.f32 %v7571_v36, %v5384_v5  ;;  %v8467_v34 = vadd.f32 %v6215_v44, %v5407_v39 }
0x1e64   :  { %v5408_v40 = vmul.f32 %v6214_v38, %v5400_v43 }
0x1e66   :  { %v8469_v41 = vadd.f32 %v6215_v44, %v5408_v40 }
0x1e68   :  { %v5417_v10 = vpack.c.bf16 %v8469_v41, %v8467_v34 }
0x1e6a   :  { %6231 = vmatmul.mubr.msk.bf16.vlgmr.msra.gmra.mrb[44].mxu1 %vm70_vm0, %v5417_v10  ;;  %6935 = vmatmul.mubr.msk.bf16.vlgmr.msra.gmra.mrb[48].mxu0 %vm70_vm0, %v5417_v10 }
0x1e6b   :  { %6939 = vmatpush3.bf16.msra.mxu0 %v7408_v42  ;;  %6540 = vmatpush3.bf16.msra.mxu1 %v7410_v31 }
0x1e6c   :  { %6940 = vmatprep.subr.bf16.mxu0 %v7627_v18  ;;  %6541 = vmatprep.subr.bf16.mxu1 %v7412_v45 }
0x1e6d   :  { %6954 = vmatprep.mubr.msk.bf16.mxu0 %vm7629_vm5, %v7627_v18 }
0x1e6f   :  { %6941 = vmatpush3.bf16.msra.mxu0 %v7411_v46  ;;  %6542 = vmatpush3.bf16.msra.mxu1 %v7413_v47 }
0x1e70   :  { %6942 = vmatprep.subr.bf16.mxu0 %v7627_v18  ;;  %6543 = vmatprep.subr.bf16.mxu1 %v7415_v48 }
0x1e73   :  { %6943 = vmatpush3.bf16.msra.mxu0 %v7414_v49  ;;  %6544 = vmatpush3.bf16.msra.mxu1 %v7416_v50 }
0x1e74   :  { %6944 = vmatprep.subr.bf16.mxu0 %v7627_v18  ;;  %6545 = vmatprep.subr.bf16.mxu1 %v7418_v51 }
0x1e77   :  { %6945 = vmatpush3.bf16.msra.mxu0 %v7417_v52  ;;  %6546 = vmatpush3.bf16.msra.mxu1 %v7419_v53 }
0x1e78   :  { %6946 = vmatprep.subr.bf16.mxu0 %v7627_v18  ;;  %6547 = vmatprep.subr.bf16.mxu1 %v7421_v54 }
0x1e7b   :  { %6947 = vmatpush3.bf16.msra.mxu0 %v7420_v55  ;;  %6548 = vmatpush3.bf16.msra.mxu1 %v7422_v56 }
0x1e7c   :  { %6948 = vmatprep.subr.bf16.mxu0 %v7627_v18  ;;  %6549 = vmatprep.subr.bf16.mxu1 %v7424_v57 }
0x1e7f   :  { %6949 = vmatpush3.bf16.msra.mxu0 %v7423_v24  ;;  %6550 = vmatpush3.bf16.msra.mxu1 %v7425_v23  ;;  %v5905_v23 = vld [vmem:[%s8620_s14 + $0x8] sm:$0xff] }
0x1e80   :  { %6950 = vmatprep.subr.bf16.mxu0 %v7627_v18  ;;  %6551 = vmatprep.subr.bf16.mxu1 %v7427_v58  ;;  %v5906_v58 = vld [vmem:[%s8620_s14 + $0x10] sm:$0xff] }
0x1e83   :  { %6951 = vmatpush3.bf16.msra.mxu0 %v7426_v37  ;;  %6552 = vmatpush3.bf16.msra.mxu1 %v7428_v59  ;;  %v5907_v59 = vld [vmem:[%s8620_s14 + $0x18] sm:$0xff] }
0x1e84   :  { %6952 = vmatprep.subr.bf16.mxu0 %v7627_v18  ;;  %6553 = vmatprep.subr.bf16.mxu1 %v7430_v61  ;;  %v6224_v18 = vld [vmem:[%s8615_s9 + $0x3] sm:$0x7] }
0x1e85   :  { %v5433_v12 = vrot.slane %v6224_v18, %v2510_v0  ;;  %v5441_v13 = vrot.slane %v6224_v18, %v2518_v1  ;;  %v5437_v32 = vrot.slane %v6224_v18, %v2514_v3 }
0x1e87   :  { %6953 = vmatpush3.bf16.msra.mxu0 %v7429_v60  ;;  %6554 = vmatpush3.bf16.msra.mxu1 %v7431_v62  ;;  %v7149_v60 = vpack.c.bf16 %v5907_v59, %v5906_v58 }
0x1f3d   :  { %v5514_v17 = vpop.f32.mrb[44].mxu1  ;;  %v5557_v2 = vpop.f32.mrb[48].mxu0 }
0x1f3e   :  { %v5515_v4 = vadd.f32 %v5514_v17, %v5433_v12  ;;  %v5558_v5 = vadd.f32 %v5557_v2, %v5441_v13  ;;  %v5516_v6 = vpop.f32.mrb[45].mxu1  ;;  %v6936_v7 = vpop.f32.mrb[49].mxu0  ;;  %v6309_v2 = vld [vmem:[%s8618_s12 + $0x1] ss:$0 sm:$0xff]  ;;  %s7630_s12 = smov [#allocation2]  }
0x1f3f   :  { %v5517_v21 = vadd.f32 %v5516_v6, %v5437_v32  ;;  %v5518_v8 = vpop.f32.mrb[46].mxu1  ;;  %v5560_v29 = vpop.f32.mrb[50].mxu0  ;;  %s6005_s22 = sshll.u32 %s7630_s12, 4  ;;  %s6006_s22 = int_to_ptr.vmem [resolvable:$true] %s6005_s22 }
0x1f40   :  { %v5519_v27 = vadd.f32 %v5518_v8, %v5433_v12  ;;  %v5561_v9 = vadd.f32 %v5560_v29, %v5441_v13  ;;  %v5520_v11 = vpop.f32.mrb[47].mxu1  ;;  %v6937_v14 = vpop.f32.mrb[51].mxu0  ;;  %v5564_v15 = vmax.f32 %v5515_v4, 0.0  ;;  %v5566_v16 = vmax.f32 %v5558_v5, 0.0  ;;  %v6310_v5 = vld [vmem:[%s8619_s13 + $0x1] ss:$0 sm:$0xff]  ;;  %p7585_p1 = scmp.lt.s32.totalorder %s6006_s22, %s6006_s22 }
0x1f41   :  { %v5521_v0 = vadd.f32 %v5520_v11, %v5437_v32  ;;  %v5565_v63 = vmax.f32 %v5517_v21, 0.0  ;;  %s7580_s13 = scalar_lea.vmem %s6006_s22, 32 }
0x1f42   :  { %v5567_v1 = vmax.f32 %v5519_v27, 0.0  ;;  %v5569_v19 = vmax.f32 %v5561_v9, 0.0  ;;  %v6311_v9 = vld [vmem:[%s8621_s15] ss:$0 sm:$0xff]  ;;  %p7581_p0 = scmp.ne.s32.totalorder %s6006_s22, %s7580_s13  ;;  %p7586_p2 = scmp.lt.s32.totalorder %s7580_s13, %s7580_s13 }
0x1f43   :  { %v5568_v3 = vmax.f32 %v5521_v0, 0.0 }
0x1f44   :  { %v5570_v20 = vpack.c.bf16 %v5567_v1, %v5564_v15  ;;  %v5572_v22 = vpack.c.bf16 %v5569_v19, %v5566_v16  ;;  %p7587_p3 = por %p7586_p2, %p7585_p1 }
0x1f45   :  { %v5571_v25 = vpack.c.bf16 %v5568_v3, %v5565_v63 }
0x1f46   :  { %6955 = vmatmul.mubr.bf16.vlgmr.msra.gmra.mrb[52].mxu0 %v5572_v22  ;;  %p7588_p4 = pnand %p7587_p3, %p7581_p0 }
0x1f47   :  { %5806 = vmatprep.mubr.bf16.mxu1 %v5571_v25 }
0x1f48   :  { %5807 = vmatmul.mubr.bf16.vlgmr.msra.gmra.mrb[48].mxu1 %v5570_v20 }
0x2019   :  { %v5849_v26 = vpop.f32.mrb[52].mxu0 }
0x201a   :  { %v6956_v28 = vpop.f32.mrb[53].mxu0 }
0x201b   :  { %v6555_v30 = vpop.f32.mrb[48].mxu1  ;;  %v5852_v33 = vpop.f32.mrb[54].mxu0 }
0x201c   :  { %v6556_v38 = vpop.f32.mrb[49].mxu1  ;;  %v6957_v36 = vpop.f32.mrb[55].mxu0 }
0x201d   :  { %v6557_v39 = vadd.f32 %v6556_v38, %v6555_v30  ;;  %v6558_v43 = vpop.f32.mrb[50].mxu1 }
0x201e   :  { %v6559_v44 = vpop.f32.mrb[51].mxu1 }
0x201f   :  { %v5809_v40 = vadd.f32 %v6557_v39, %v6282_v35  ;;  %v6560_v42 = vadd.f32 %v6559_v44, %v6558_v43 }
0x2021   :  { %v5850_v31 = vadd.f32 %v5849_v26, %v5809_v40  ;;  %v5812_v10 = vadd.f32 %v6560_v42, %v6282_v35 }
0x2023   :  { %v5853_v45 = vadd.f32 %v5852_v33, %v5812_v10  ;;  %v5856_v46 = vadd.f32 %v5850_v31, %v8467_v34 }
0x2025   :  { %v5862_v47 = vsel %vm70_vm0, %v5856_v46, 0.0  ;;  %v5857_v48 = vadd.f32 %v5853_v45, %v8469_v41  ;;  %v5904_v41 = vld [vmem:[%s8620_s14] sm:$0xff] }
0x2026   :  { %5863 = vadd.xlane.f32.xlu0 %v5862_v47  ;;  %v7145_v37 = vpack.c.bf16 %v5905_v23, %v5904_v41 }
0x2027   :  { %v5865_v49 = vsel %vm70_vm0, %v5857_v48, 0.0 }
0x2028   :  { %7146 = vmatprep.subr.bf16.mxu1 %v7145_v37 }
0x2029   :  { %7148 = vmatpush3.bf16.msra.mxu1 %v7145_v37 }
0x202a   :  { %5866 = vadd.xlane.f32.xlu0 %v5865_v49  ;;  %7150 = vmatprep.subr.bf16.mxu1 %v7149_v60 }
0x202d   :  { %7152 = vmatpush3.bf16.msra.mxu1 %v7149_v60 }
0x20b3   :  { %v5864_v50 = vpop.xlane.xlu0 %5863 }
0x20b4   :  { %v5868_v51 = vmul.f32 0.03125, %v5864_v50 }
0x20b6   :  { %v5870_v52 = vsub.f32 %v5856_v46, %v5868_v51 }
0x20b7   :  { %v5867_v53 = vpop.xlane.xlu0 %5866 }
0x20b8   :  { %v5869_v54 = vmul.f32 0.03125, %v5867_v53  ;;  %v5872_v55 = vmul.f32 %v5870_v52, %v5870_v52 }
0x20ba   :  { %v5871_v56 = vsub.f32 %v5857_v48, %v5869_v54  ;;  %v5874_v57 = vsel %vm70_vm0, %v5872_v55, 0.0 }
0x20bb   :  { %5875 = vadd.xlane.f32.xlu0 %v5874_v57 }
0x20bc   :  { %v5873_v24 = vmul.f32 %v5871_v56, %v5871_v56 }
0x20be   :  { %v5877_v34 = vsel %vm70_vm0, %v5873_v24, 0.0 }
0x20bf   :  { %5878 = vadd.xlane.f32.xlu0 %v5877_v34 }
0x2148   :  { %v5876_v61 = vpop.xlane.xlu0 %5875 }
0x2149   :  { %v5880_v62 = vmul.f32 0.03125, %v5876_v61 }
0x214b   :  { %v5882_v18 = vadd.f32 1e-05, %v5880_v62 }
0x214c   :  { %v5879_v12 = vpop.xlane.xlu0 %5878 }
0x214d   :  { %7572 = vrsqrt.f32 %v5882_v18  ;;  %v5881_v13 = vmul.f32 0.03125, %v5879_v12 }
0x214f   :  { %v5883_v32 = vadd.f32 1e-05, %v5881_v13 }
0x2151   :  { %7574 = vrsqrt.f32 %v5883_v32 }
0x2157   :  { %v7573_v17 = vpop.eup %7572 }
0x2158   :  { %v5886_v4 = vmul.f32 %v7573_v17, %v5870_v52 }
0x215a   :  { %v5894_v6 = vmul.f32 %v6309_v2, %v5886_v4 }
0x215b   :  { %v7575_v7 = vpop.eup %7574 }
0x215c   :  { %v5887_v21 = vmul.f32 %v7575_v7, %v5871_v56  ;;  %v5902_v8 = vadd.f32 %v6310_v5, %v5894_v6 }
0x215e   :  { %v5895_v29 = vmul.f32 %v6309_v2, %v5887_v21  ;;  %6966 = vmatprep.mubr.msk.f32.mxu1 %vm70_vm0, %v5902_v8 }
0x2160   :  { %v5903_v27 = vadd.f32 %v6310_v5, %v5895_v29 }
0x2162   :  { %6967 = vmatmul.mubr.msk.f32.vlgmr.msra.gmra.mrb[42].mxu1 %vm70_vm0, %v5903_v27 }
0x2235   :  { %v6968_v11 = vpop.f32.mrb[42].mxu1 }
0x2236   :  { %v5993_v14 = vadd.f32 %v6968_v11, %v6311_v9  ;;  %v5987_v0 = vpop.f32.mrb[43].mxu1 }
0x2237   :  { %v5988_v15 = vadd.f32 %v6311_v9, %v5987_v0 }
0x2238   :  { %5998 = vst.msk [vmem:[#allocation2 - $0x6] sm:$0x80] %vm5996_vm6, %v5993_v14 }
0x2239   :  { %5997 = vst.msk [vmem:[#allocation2 - $0x7] sm:$0x80] %vm5996_vm6, %v5988_v15 }
0x223a   :  { %7591 = shalt.err (!%p7588_p4)
}
0x223b   :  { %s7592_s15 = scalar_lea.hbm %s8622_s16, 32 }
0x223c   :  { %p7593_p5 = scmp.ne.s32.totalorder %s8622_s16, %s7592_s15  ;;  %p7596_p6 = scmp.lt.u32.totalorder %s7592_s15, %s8622_s16 }
0x223e   :  { %p7598_p7 = pnand %p7596_p6, %p7593_p5 }
0x2240   :  { %7601 = shalt.err (!%p7598_p7)
}
0x2241   :  { %6008 = dma.vmem_to_hbm [thread:$0]  %s6006_s22, 32, %s8622_s16, [#allocation3]  }
0x2242   :  { %7602 = dma.done.wait [#allocation3], 32  }
0x2243   :  { %7603 = vsyncadd [#allocation3], 4294967264 }
0x2244   :  { %6012 = vsyncpa [#allocation3], 1 }

</bundles_post_ra>
